<compile_context>
chip_gen: v7x
topology: tpu7x:2x2x1
jax: 0.10.0
libtpu: 0.0.40
codegen_flags: <defaults>
</compile_context>

<pallas_src>
import math

import jax
import jax.numpy as jnp
from jax import lax
from jax.experimental import pallas as pl
from jax.experimental.pallas import tpu as pltpu

ROW_GROUPS = 2                       # leading "parallel" axis of the recurrences
VMEM_LIMIT = 64 * 1024 * 1024        # fits v7x's 64 MiB physical VMEM; ok on v5e/v6e


# -----------------------------------------------------------------------------
# small helper (used inside kernels)
# -----------------------------------------------------------------------------
def _softmax(x, axis):
    m = jnp.max(x, axis=axis, keepdims=True)
    e = jnp.exp(x - m)
    return e / jnp.sum(e, axis=axis, keepdims=True)


# -----------------------------------------------------------------------------
# Dense kernel: y = x @ W + b   (x bf16, W pre-transposed (K, N) bf16, b (1, N) f32)
# -----------------------------------------------------------------------------
def dense_kernel(x_ref, w_ref, b_ref, o_ref):
    o_ref[...] = (
        jnp.dot(x_ref[...], w_ref[...], preferred_element_type=jnp.float32)
        + b_ref[...]
    ).astype(o_ref.dtype)


def _pick_row_tile(m):
    for tm in (512, 256, 128):       # 256-multiples keep the v6e/v7x 256x256 MXU full
        if m >= tm and m % tm == 0:
            return tm
    return m


def dense(x, w_t, b, out_dtype=jnp.bfloat16):
    """y = x @ w_t + b.  x: (M, K) bf16; w_t: (K, N) bf16; b: (1, N) f32."""
    M, K = x.shape
    N = w_t.shape[1]
    tm = _pick_row_tile(M)
    tn = 256 if (N > 512 and N % 256 == 0) else N
    # TODO(synk): tile K with a VMEM f32 accumulator for very large K so the resident
    # (K, tn) weight block stays inside the v7x 64 MiB VMEM budget.
    return pl.pallas_call(
        dense_kernel,
        out_shape=jax.ShapeDtypeStruct((M, N), out_dtype),
        grid=(M // tm, N // tn),
        in_specs=[
            pl.BlockSpec((tm, K), lambda i, j: (i, 0)),
            pl.BlockSpec((K, tn), lambda i, j: (0, j)),
            pl.BlockSpec((1, tn), lambda i, j: (0, j)),
        ],
        out_specs=pl.BlockSpec((tm, tn), lambda i, j: (i, j)),
        compiler_params=pltpu.CompilerParams(
            dimension_semantics=("parallel", "parallel"),
            vmem_limit_bytes=VMEM_LIMIT),
    )(x, w_t, b)


# -----------------------------------------------------------------------------
# Bidirectional LSTM recurrence: grid=(P, S) -> ("parallel", "arbitrary").
#   h/c per direction persist in VMEM scratch; W_hh_f / W_hh_b resident in VMEM.
#   Backward direction reads gates (and writes outputs) at time index S-1-t via the
#   BlockSpec index maps, so no XLA reversal passes are needed; padded steps are
#   masked by a resident length column (no per-step mask DMA).
# -----------------------------------------------------------------------------
def lstm_step_kernel(gf_ref, gb_ref, lens_ref, whf_ref, whb_ref,
                     of_ref, ob_ref, hf_s, cf_s, hb_s, cb_s):
    t = pl.program_id(1)
    S = pl.num_programs(1)

    @pl.when(t == 0)
    def _init():
        hf_s[...] = jnp.zeros_like(hf_s)
        cf_s[...] = jnp.zeros_like(cf_s)
        hb_s[...] = jnp.zeros_like(hb_s)
        cb_s[...] = jnp.zeros_like(cb_s)

    H = hf_s.shape[1]
    lens = lens_ref[0]                       # (Ng, 1) int32, resident
    v_f = lens > t                           # fwd step t valid while t < len
    v_b = lens > (S - 1 - t)                 # bwd processes original time S-1-t

    def direction(g_ref, wh_ref, h_s, c_s, keep, o_ref):
        # per-direction hidden matmul: nothing discarded, no select on the result
        g = g_ref[0, 0].astype(jnp.float32) + jnp.dot(
            h_s[...].astype(jnp.bfloat16), wh_ref[...],
            preferred_element_type=jnp.float32)            # (Ng, 4H)
        i_g = jax.nn.sigmoid(g[:, 0 * H:1 * H])            # PyTorch gate order i,f,g,o
        f_g = jax.nn.sigmoid(g[:, 1 * H:2 * H])
        c_g = jnp.tanh(g[:, 2 * H:3 * H])
        o_g = jax.nn.sigmoid(g[:, 3 * H:4 * H])
        c_new = f_g * c_s[...] + i_g * c_g
        h_new = o_g * jnp.tanh(c_new)
        h_s[...] = jnp.where(keep, h_new, h_s[...])
        c_s[...] = jnp.where(keep, c_new, c_s[...])
        o_ref[0, 0] = jnp.where(keep, h_new, 0.0).astype(o_ref.dtype)  # pad -> 0

    direction(gf_ref, whf_ref, hf_s, cf_s, v_f, of_ref)
    direction(gb_ref, whb_ref, hb_s, cb_s, v_b, ob_ref)


def bilstm(gates, lens_col, whh_f, whh_b, H):
    """gates: (S, P, Ng, 8H) bf16 step-major; [..., :4H] fwd input gates, [..., 4H:]
    bwd input gates, BOTH in natural time order.  lens_col: (P, Ng, 1) int32.
    Returns (out_f, out_b), each (S, P, Ng, H) bf16 in natural time order, zero
    beyond the valid length (pad_packed semantics)."""
    S, P, Ng, _ = gates.shape
    H4 = 4 * H
    out_sds = jax.ShapeDtypeStruct((S, P, Ng, H), jnp.bfloat16)
    return pl.pallas_call(
        lstm_step_kernel,
        out_shape=(out_sds, out_sds),
        grid=(P, S),
        in_specs=[
            pl.BlockSpec((1, 1, Ng, H4), lambda p, t: (t, p, 0, 0)),
            pl.BlockSpec((1, 1, Ng, H4), lambda p, t, S=S: (S - 1 - t, p, 0, 1)),
            pl.BlockSpec((1, Ng, 1), lambda p, t: (p, 0, 0)),
            pl.BlockSpec((H, H4), lambda p, t: (0, 0)),     # resident across steps
            pl.BlockSpec((H, H4), lambda p, t: (0, 0)),
        ],
        out_specs=(pl.BlockSpec((1, 1, Ng, H), lambda p, t: (t, p, 0, 0)),
                   pl.BlockSpec((1, 1, Ng, H), lambda p, t, S=S: (S - 1 - t, p, 0, 0))),
        scratch_shapes=[pltpu.VMEM((Ng, H), jnp.float32) for _ in range(4)],
        compiler_params=pltpu.CompilerParams(
            dimension_semantics=("parallel", "arbitrary"),
            vmem_limit_bytes=VMEM_LIMIT),
    )(gates, gates, lens_col, whh_f, whh_b)


# -----------------------------------------------------------------------------
# Fused attention + m-concat + (folded) comp-layer input projection.
# Gridded over the batch: per-example blocks, pipelined, megacore-parallel.
# -----------------------------------------------------------------------------
def attention_comp_kernel(pe_ref, he_ref, pm_ref, hm_ref,
                          wa_ref, wb_ref, wc_ref, bc_ref, pg_ref, hg_ref):
    pe = pe_ref[0]                               # (Sp, 2H) bf16
    he = he_ref[0]                               # (Sh, 2H) bf16
    mask = pm_ref[0] * hm_ref[0]                 # (Sp, 1) * (1, Sh) -> (Sp, Sh)
    wa, wb, wc, bc = wa_ref[...], wb_ref[...], wc_ref[...], bc_ref[...]

    align = lax.dot_general(pe, he, (((1,), (1,)), ((), ())),
                            preferred_element_type=jnp.float32)     # (Sp, Sh)
    # Faithful to the PyTorch reference: masked entries are filled with -1e-7
    # (NOT a large negative), so they still get near-uniform softmax weight.
    align = jnp.where(mask < 1e-8, jnp.float32(-1e-7), align)
    w_prem = _softmax(align, axis=1)             # softmax over hypo positions
    w_hypo = _softmax(align, axis=0)             # softmax over prem positions
    patt = jnp.dot(w_prem.astype(jnp.bfloat16), he,
                   preferred_element_type=jnp.float32)              # (Sp, 2H)
    hatt = lax.dot_general(w_hypo.astype(jnp.bfloat16), pe,
                           (((0,), (0,)), ((), ())),
                           preferred_element_type=jnp.float32)      # (Sh, 2H)

    def comp_proj(enc, att):
        # m = [enc, att, enc-att, enc*att];  m @ W == enc@(We+Wd) + att@(Wa-Wd) + (enc*att)@Wm
        prod = (enc.astype(jnp.float32) * att).astype(jnp.bfloat16)
        return (jnp.dot(enc, wa, preferred_element_type=jnp.float32)
                + jnp.dot(att.astype(jnp.bfloat16), wb, preferred_element_type=jnp.float32)
                + jnp.dot(prod, wc, preferred_element_type=jnp.float32)
                + bc)

    pg_ref[0] = comp_proj(pe, patt).astype(pg_ref.dtype)   # (Sp, 8H) comp-LSTM gates
    hg_ref[0] = comp_proj(he, hatt).astype(hg_ref.dtype)   # (Sh, 8H)


def attention_comp(prem_enc, hypo_enc, prem_mask, hypo_mask, wa, wb, wc, bc):
    B, Sp, D2 = prem_enc.shape
    Sh = hypo_enc.shape[1]
    G = wa.shape[1]
    pm = prem_mask.astype(jnp.float32)[:, :, None]      # (B, Sp, 1)
    hm = hypo_mask.astype(jnp.float32)[:, None, :]      # (B, 1, Sh)
    return pl.pallas_call(
        attention_comp_kernel,
        out_shape=(jax.ShapeDtypeStruct((B, Sp, G), jnp.bfloat16),
                   jax.ShapeDtypeStruct((B, Sh, G), jnp.bfloat16)),
        grid=(B,),
        in_specs=[
            pl.BlockSpec((1, Sp, D2), lambda b: (b, 0, 0)),
            pl.BlockSpec((1, Sh, D2), lambda b: (b, 0, 0)),
            pl.BlockSpec((1, Sp, 1), lambda b: (b, 0, 0)),
            pl.BlockSpec((1, 1, Sh), lambda b: (b, 0, 0)),
            pl.BlockSpec((D2, G), lambda b: (0, 0)),
            pl.BlockSpec((D2, G), lambda b: (0, 0)),
            pl.BlockSpec((D2, G), lambda b: (0, 0)),
            pl.BlockSpec((1, G), lambda b: (0, 0)),
        ],
        out_specs=(pl.BlockSpec((1, Sp, G), lambda b: (b, 0, 0)),
                   pl.BlockSpec((1, Sh, G), lambda b: (b, 0, 0))),
        compiler_params=pltpu.CompilerParams(
            dimension_semantics=("parallel",),
            vmem_limit_bytes=VMEM_LIMIT),
    )(prem_enc, hypo_enc, pm, hm, wa, wb, wc, bc)


# -----------------------------------------------------------------------------
# Fused masked avg/max pooling (both sentences, batch-vectorized) + MLP + softmax.
# Consumes the recurrence's step-major output directly (pooling reduces over axis 0).
# -----------------------------------------------------------------------------
def pool_mlp_kernel(cf_ref, cb_ref, inv_ref, maxlen_ref,
                    w1_ref, b1_ref, w2_ref, b2_ref, logit_ref, prob_ref):
    S, N, _ = cf_ref.shape
    B = N // 2
    cf = cf_ref[...].astype(jnp.float32)             # (S, N, H)
    cb = cb_ref[...].astype(jnp.float32)
    inv = inv_ref[0]                                 # (N, 1) f32
    t_idx = lax.broadcasted_iota(jnp.int32, (S, N, 1), 0)
    incl = t_idx < maxlen_ref[...]                   # pad_packed pads to max(lens)

    avg_f = jnp.sum(cf, axis=0) * inv                # invalid steps are already 0
    avg_b = jnp.sum(cb, axis=0) * inv
    ninf = jnp.float32(-jnp.inf)
    max_f = jnp.max(jnp.where(incl, cf, ninf), axis=0)
    max_b = jnp.max(jnp.where(incl, cb, ninf), axis=0)

    # feature order == torch.cat([prem_avg, prem_max, hypo_avg, hypo_max], -1),
    # each 2H block laid out [fwd | bwd] (PyTorch bidirectional output order).
    feat = jnp.concatenate(
        [avg_f[:B], avg_b[:B], max_f[:B], max_b[:B],
         avg_f[B:], avg_b[B:], max_f[B:], max_b[B:]], axis=-1)        # (B, 8H)

    h1 = jnp.tanh(jnp.dot(feat.astype(jnp.bfloat16), w1_ref[...],
                          preferred_element_type=jnp.float32) + b1_ref[...])
    logits = jnp.dot(h1.astype(jnp.bfloat16), w2_ref[...],
                     preferred_element_type=jnp.float32) + b2_ref[...]
    logit_ref[...] = logits
    prob_ref[...] = _softmax(logits, axis=1)


def pool_mlp(cf, cb, inv_len, maxlen, params):
    S, N, H = cf.shape
    B = N // 2
    C = params["w_mlp2"].shape[1]

    def full(shape):
        n = len(shape)
        return pl.BlockSpec(shape, lambda i, n=n: (0,) * n)

    return pl.pallas_call(
        pool_mlp_kernel,
        out_shape=(jax.ShapeDtypeStruct((B, C), jnp.float32),
                   jax.ShapeDtypeStruct((B, C), jnp.float32)),
        grid=(1,),
        in_specs=[full((S, N, H)), full((S, N, H)),
                  full((1, N, 1)), full((1, N, 1)),
                  full(params["w_mlp1"].shape), full(params["b_mlp1"].shape),
                  full(params["w_mlp2"].shape), full(params["b_mlp2"].shape)],
        out_specs=(full((B, C)), full((B, C))),
        compiler_params=pltpu.CompilerParams(
            dimension_semantics=("arbitrary",),
            vmem_limit_bytes=VMEM_LIMIT),
    )(cf, cb, inv_len, maxlen,
      params["w_mlp1"], params["b_mlp1"], params["w_mlp2"], params["b_mlp2"])


# -----------------------------------------------------------------------------
# Full forward
# -----------------------------------------------------------------------------
def nli_forward(params, prem, premlen, hypo, hypolen):
    H = params["whh_enc_f"].shape[0]
    B, Sp = prem.shape
    Sh = hypo.shape[1]
    S = max(Sp, Sh)
    Ng = B
    N = ROW_GROUPS * B                        # stacked rows: [prem batch | hypo batch]

    # Pad tokens to a common S so prem+hypo run as ONE stacked recurrence
    # (attention still uses the original Sp/Sh slices, so semantics are unchanged).
    prem_p = jnp.pad(prem, ((0, 0), (0, S - Sp)), constant_values=1)
    hypo_p = jnp.pad(hypo, ((0, 0), (0, S - Sh)), constant_values=1)
    tok = jnp.concatenate([prem_p, hypo_p], axis=0)                   # (N, S)
    lens = jnp.concatenate([premlen, hypolen], axis=0).astype(jnp.int32)
    lens_col = lens.reshape(ROW_GROUPS, Ng, 1)

    # TODO(synk): embedding gather stays in XLA (no clean Pallas tiling); it gathers
    # straight into the step-major (S, N, E) bf16 layout the rest of the net consumes.
    x_steps = params["embedding"][tok.T]                              # (S, N, E) bf16
    E = x_steps.shape[-1]

    # One merged input-projection matmul for BOTH sentences and BOTH directions,
    # emitted directly in the step-major bf16 layout the recurrence streams.
    gates = dense(x_steps.reshape(S * N, E), params["w_enc_in"], params["b_enc_in"])
    gates = gates.reshape(S, ROW_GROUPS, Ng, 8 * H)

    # Encoder BiLSTM: one Pallas call, S serial steps, fwd+bwd fused, prem+hypo
    # stacked, row groups split over the leading "parallel" axis (v7x megacore).
    ef, eb = bilstm(gates, lens_col, params["whh_enc_f"], params["whh_enc_b"], H)
    enc = jnp.concatenate([ef, eb], axis=-1).reshape(S, N, 2 * H)
    enc = jnp.transpose(enc, (1, 0, 2))                               # (N, S, 2H) bf16
    prem_enc = enc[:B, :Sp]
    hypo_enc = enc[B:, :Sh]

    prem_mask = prem != 1
    hypo_mask = hypo != 1
    # attention + [enc, att, enc-att, enc*att] + folded comp Linear & LSTM input proj.
    prem_cg, hypo_cg = attention_comp(
        prem_enc, hypo_enc, prem_mask, hypo_mask,
        params["w_comp_A"], params["w_comp_B"], params["w_comp_C"], params["b_comp"])

    pg = jnp.pad(prem_cg, ((0, 0), (0, S - Sp), (0, 0)))
    hg = jnp.pad(hypo_cg, ((0, 0), (0, S - Sh), (0, 0)))
    cg = jnp.transpose(jnp.concatenate([pg, hg], axis=0), (1, 0, 2))  # (S, N, 8H) bf16
    cg = cg.reshape(S, ROW_GROUPS, Ng, 8 * H)

    # Composition BiLSTM (same fused recurrence kernel).
    cff, cbb = bilstm(cg, lens_col, params["whh_comp_f"], params["whh_comp_b"], H)
    cff = cff.reshape(S, N, H)
    cbb = cbb.reshape(S, N, H)

    inv_len = (1.0 / lens.astype(jnp.float32)).reshape(1, N, 1)
    maxlen = jnp.concatenate(
        [jnp.broadcast_to(jnp.max(premlen), (B,)),
         jnp.broadcast_to(jnp.max(hypolen), (B,))]).astype(jnp.int32).reshape(1, N, 1)

    # Fused masked avg/max pooling of both sentences + 2-layer MLP + softmax.
    return pool_mlp(cff, cbb, inv_len, maxlen, params)


# -----------------------------------------------------------------------------
# Deterministic PyTorch-like parameter init + packing into inference layout
# -----------------------------------------------------------------------------
def _uniform(key, shape, bound):
    return jax.random.uniform(key, shape, jnp.float32, -bound, bound)


def init_lstm(key, input_size, H):
    k = 1.0 / math.sqrt(H)
    ks = jax.random.split(key, 8)
    return {
        "w_ih_f": _uniform(ks[0], (4 * H, input_size), k),
        "w_hh_f": _uniform(ks[1], (4 * H, H), k),
        "b_f": _uniform(ks[2], (4 * H,), k) + _uniform(ks[3], (4 * H,), k),
        "w_ih_b": _uniform(ks[4], (4 * H, input_size), k),
        "w_hh_b": _uniform(ks[5], (4 * H, H), k),
        "b_b": _uniform(ks[6], (4 * H,), k) + _uniform(ks[7], (4 * H,), k),
    }


def init_params(key, V, E, H, C):
    ks = jax.random.split(key, 8)
    return {
        "embedding": jax.random.normal(ks[0], (V, E), jnp.float32),
        "enc_lstm": init_lstm(ks[1], E, H),
        "comp": {
            "lin_w": _uniform(ks[2], (H, 8 * H), 1.0 / math.sqrt(8 * H)),
            "lin_b": _uniform(ks[3], (H,), 1.0 / math.sqrt(8 * H)),
            "lstm": init_lstm(ks[4], H, H),
        },
        "mlp": {
            "w1": _uniform(ks[5], (H, 8 * H), 1.0 / math.sqrt(8 * H)),
            "b1": _uniform(ks[6], (H,), 1.0 / math.sqrt(8 * H)),
            "w2": _uniform(ks[7], (C, H), 1.0 / math.sqrt(H)),
            "b2": jnp.zeros((C,), jnp.float32),
        },
    }


def pack_params(p):
    """Pre-transpose to (K, N), split fwd/bwd hidden projections, fold the comp
    Linear into the comp-LSTM input projection, and cast matmul weights / the
    embedding table to bf16 (f32 accumulation everywhere)."""
    H = p["enc_lstm"]["w_hh_f"].shape[1]
    enc, comp, mlp = p["enc_lstm"], p["comp"], p["mlp"]
    cl = comp["lstm"]
    bf = jnp.bfloat16

    w_enc_in = jnp.concatenate([enc["w_ih_f"].T, enc["w_ih_b"].T], axis=1)    # (E, 8H)
    b_enc_in = jnp.concatenate([enc["b_f"], enc["b_b"]])                      # (8H,)

    w_ih_fb = jnp.concatenate([cl["w_ih_f"].T, cl["w_ih_b"].T], axis=1)       # (H, 8H)
    w_fold = comp["lin_w"].T @ w_ih_fb                                        # (8H, 8H)
    b_comp = comp["lin_b"] @ w_ih_fb + jnp.concatenate([cl["b_f"], cl["b_b"]])
    D2 = 2 * H
    We, Wa = w_fold[0:D2], w_fold[D2:2 * D2]
    Wd, Wm = w_fold[2 * D2:3 * D2], w_fold[3 * D2:4 * D2]

    return {
        "embedding": p["embedding"].astype(bf),
        "w_enc_in": w_enc_in.astype(bf),
        "b_enc_in": b_enc_in.reshape(1, -1),
        "whh_enc_f": enc["w_hh_f"].T.astype(bf),       # (H, 4H)
        "whh_enc_b": enc["w_hh_b"].T.astype(bf),
        "w_comp_A": (We + Wd).astype(bf),
        "w_comp_B": (Wa - Wd).astype(bf),
        "w_comp_C": Wm.astype(bf),
        "b_comp": b_comp.reshape(1, -1),
        "whh_comp_f": cl["w_hh_f"].T.astype(bf),
        "whh_comp_b": cl["w_hh_b"].T.astype(bf),
        "w_mlp1": mlp["w1"].T.astype(bf),              # (8H, H)
        "b_mlp1": mlp["b1"].reshape(1, -1),
        "w_mlp2": mlp["w2"].T.astype(bf),              # (H, C)
        "b_mlp2": mlp["b2"].reshape(1, -1),
    }


# -----------------------------------------------------------------------------
# Driver
# -----------------------------------------------------------------------------
if __name__ == "__main__":
    V, E, H, C = 50, 16, 32, 3          # vocab, embed dim, hidden, num_class
    B, Sp, Sh = 2, 8, 8

    key = jax.random.PRNGKey(0)
    k_par, k_p, k_h = jax.random.split(key, 3)
    params = pack_params(init_params(k_par, V, E, H, C))

    premlen = jnp.array([8, 5], dtype=jnp.int32)
    hypolen = jnp.array([8, 6], dtype=jnp.int32)

    # Tokens in [2, V); pad positions (t >= len) get pad token 1 (matches get_mask).
    prem_tok = jax.random.randint(k_p, (B, Sp), 2, V, dtype=jnp.int32)
    hypo_tok = jax.random.randint(k_h, (B, Sh), 2, V, dtype=jnp.int32)
    tp = jnp.arange(Sp)[None, :]
    th = jnp.arange(Sh)[None, :]
    prem = jnp.where(tp < premlen[:, None], prem_tok, 1)
    hypo = jnp.where(th < hypolen[:, None], hypo_tok, 1)

    fwd = jax.jit(nli_forward)
    logits, probs = fwd(params, prem, premlen, hypo, hypolen)
    jax.block_until_ready((logits, probs))

    assert logits.shape == (B, C) and probs.shape == (B, C)
    assert bool(jnp.all(jnp.isfinite(logits)))
    assert bool(jnp.allclose(jnp.sum(probs, axis=1), 1.0, atol=1e-5))
    print("KERNEL_OK")
</pallas_src>

<mosaic_0001>
module attributes {stable_mosaic.version = 11 : i64} {
  func.func @lstm_step_kernel(%arg0: i32, %arg1: i32, %arg2: memref<1x1x2x128xbf16, #tpu.memory_space<vmem>>, %arg3: memref<1x1x2x128xbf16, #tpu.memory_space<vmem>>, %arg4: memref<1x2x1xi32, #tpu.memory_space<vmem>>, %arg5: memref<32x128xbf16, #tpu.memory_space<vmem>>, %arg6: memref<32x128xbf16, #tpu.memory_space<vmem>>, %arg7: memref<1x1x2x32xbf16, #tpu.memory_space<vmem>>, %arg8: memref<1x1x2x32xbf16, #tpu.memory_space<vmem>>, %arg9: memref<2x32xf32, #tpu.memory_space<vmem>>, %arg10: memref<2x32xf32, #tpu.memory_space<vmem>>, %arg11: memref<2x32xf32, #tpu.memory_space<vmem>>, %arg12: memref<2x32xf32, #tpu.memory_space<vmem>>) attributes {dimension_semantics = [#tpu.dimension_semantics<parallel>, #tpu.dimension_semantics<arbitrary>], iteration_bounds = array<i64: 2, 8>, scalar_prefetch = 0 : i64, scratch_operands = 4 : i64, tpu.core_type = #tpu.core_type<tc>, window_params = [{transform_indices = @transform_0, window_bounds = array<i64: 1, 1, 2, 128>}, {transform_indices = @transform_1, window_bounds = array<i64: 1, 1, 2, 128>}, {transform_indices = @transform_2, window_bounds = array<i64: 1, 2, 1>}, {pipeline_mode = #tpu.pipeline_mode<synchronous>, transform_indices = @transform_3, window_bounds = array<i64: 32, 128>}, {pipeline_mode = #tpu.pipeline_mode<synchronous>, transform_indices = @transform_4, window_bounds = array<i64: 32, 128>}, {transform_indices = @transform_5, window_bounds = array<i64: 1, 1, 2, 32>}, {transform_indices = @transform_6, window_bounds = array<i64: 1, 1, 2, 32>}]} {
    %c0_i32 = arith.constant 0 : i32
    %0 = arith.cmpi eq, %arg1, %c0_i32 : i32
    %1 = arith.extui %0 : i1 to i32
    %c0_i32_0 = arith.constant 0 : i32
    %2 = arith.cmpi ne, %1, %c0_i32_0 : i32
    scf.if %2 {
      %cst_56 = arith.constant 0.000000e+00 : f32
      %114 = vector.broadcast %cst_56 : f32 to vector<2x32xf32>
      %c0_57 = arith.constant 0 : index
      %c0_58 = arith.constant 0 : index
      %115 = vector.load %arg9[%c0_57, %c0_58] : memref<2x32xf32, #tpu.memory_space<vmem>>, vector<2x32xf32>
      tpu.vector_store %arg9[%c0_57, %c0_58], %114 {strides = array<i32>} : memref<2x32xf32, #tpu.memory_space<vmem>>, vector<2x32xf32>,
      %cst_59 = arith.constant 0.000000e+00 : f32
      %116 = vector.broadcast %cst_59 : f32 to vector<2x32xf32>
      %c0_60 = arith.constant 0 : index
      %c0_61 = arith.constant 0 : index
      %117 = vector.load %arg10[%c0_60, %c0_61] : memref<2x32xf32, #tpu.memory_space<vmem>>, vector<2x32xf32>
      tpu.vector_store %arg10[%c0_60, %c0_61], %116 {strides = array<i32>} : memref<2x32xf32, #tpu.memory_space<vmem>>, vector<2x32xf32>,
      %cst_62 = arith.constant 0.000000e+00 : f32
      %118 = vector.broadcast %cst_62 : f32 to vector<2x32xf32>
      %c0_63 = arith.constant 0 : index
      %c0_64 = arith.constant 0 : index
      %119 = vector.load %arg11[%c0_63, %c0_64] : memref<2x32xf32, #tpu.memory_space<vmem>>, vector<2x32xf32>
      tpu.vector_store %arg11[%c0_63, %c0_64], %118 {strides = array<i32>} : memref<2x32xf32, #tpu.memory_space<vmem>>, vector<2x32xf32>,
      %cst_65 = arith.constant 0.000000e+00 : f32
      %120 = vector.broadcast %cst_65 : f32 to vector<2x32xf32>
      %c0_66 = arith.constant 0 : index
      %c0_67 = arith.constant 0 : index
      %121 = vector.load %arg12[%c0_66, %c0_67] : memref<2x32xf32, #tpu.memory_space<vmem>>, vector<2x32xf32>
      tpu.vector_store %arg12[%c0_66, %c0_67], %120 {strides = array<i32>} : memref<2x32xf32, #tpu.memory_space<vmem>>, vector<2x32xf32>,
    } else {
    }
    %c0 = arith.constant 0 : index
    %c0_1 = arith.constant 0 : index
    %c0_2 = arith.constant 0 : index
    %3 = vector.load %arg4[%c0, %c0_1, %c0_2] : memref<1x2x1xi32, #tpu.memory_space<vmem>>, vector<1x2x1xi32>
    %4 = vector.shape_cast %3 : vector<1x2x1xi32> to vector<2x1xi32>
    %5 = vector.broadcast %arg1 : i32 to vector<2x1xi32>
    %6 = arith.cmpi sgt, %4, %5 : vector<2x1xi32>
    %c7_i32 = arith.constant 7 : i32
    %7 = arith.subi %c7_i32, %arg1 : i32
    %8 = vector.broadcast %7 : i32 to vector<2x1xi32>
    %9 = arith.cmpi sgt, %4, %8 : vector<2x1xi32>
    %c0_3 = arith.constant 0 : index
    %c0_4 = arith.constant 0 : index
    %c0_5 = arith.constant 0 : index
    %c0_6 = arith.constant 0 : index
    %10 = vector.load %arg2[%c0_3, %c0_4, %c0_5, %c0_6] : memref<1x1x2x128xbf16, #tpu.memory_space<vmem>>, vector<1x1x2x128xbf16>
    %11 = vector.shape_cast %10 : vector<1x1x2x128xbf16> to vector<2x128xbf16>
    %12 = arith.extf %11 : vector<2x128xbf16> to vector<2x128xf32>
    %c0_7 = arith.constant 0 : index
    %c0_8 = arith.constant 0 : index
    %13 = vector.load %arg9[%c0_7, %c0_8] : memref<2x32xf32, #tpu.memory_space<vmem>>, vector<2x32xf32>
    %14 = arith.truncf %13 : vector<2x32xf32> to vector<2x32xbf16>
    %c0_9 = arith.constant 0 : index
    %c0_10 = arith.constant 0 : index
    %15 = vector.load %arg5[%c0_9, %c0_10] : memref<32x128xbf16, #tpu.memory_space<vmem>>, vector<32x128xbf16>
    %cst = arith.constant dense<0.000000e+00> : vector<2x128xf32>
    %16 = tpu.matmul %14, %15, %cst {dimension_numbers = #tpu.dot_dimension_numbers<[1], [0], [0], [1], [0, 0, 1, 1], [], []>} : vector<2x32xbf16>, vector<32x128xbf16>, vector<2x128xf32> -> vector<2x128xf32>
    %17 = arith.addf %12, %16 : vector<2x128xf32>
    %18 = vector.extract_strided_slice %17 {offsets = [0, 0], sizes = [2, 32], strides = [1, 1]} : vector<2x128xf32> to vector<2x32xf32>
    %19 = arith.negf %18 : vector<2x32xf32>
    %20 = math.exp %19 : vector<2x32xf32>
    %cst_11 = arith.constant 1.000000e+00 : f32
    %21 = vector.broadcast %cst_11 : f32 to vector<2x32xf32>
    %22 = arith.addf %21, %20 : vector<2x32xf32>
    %23 = arith.divf %21, %22 : vector<2x32xf32>
    %24 = vector.extract_strided_slice %17 {offsets = [0, 32], sizes = [2, 32], strides = [1, 1]} : vector<2x128xf32> to vector<2x32xf32>
    %25 = arith.negf %24 : vector<2x32xf32>
    %26 = math.exp %25 : vector<2x32xf32>
    %cst_12 = arith.constant 1.000000e+00 : f32
    %27 = vector.broadcast %cst_12 : f32 to vector<2x32xf32>
    %28 = arith.addf %27, %26 : vector<2x32xf32>
    %29 = arith.divf %27, %28 : vector<2x32xf32>
    %30 = vector.extract_strided_slice %17 {offsets = [0, 64], sizes = [2, 32], strides = [1, 1]} : vector<2x128xf32> to vector<2x32xf32>
    %31 = math.tanh %30 : vector<2x32xf32>
    %32 = vector.extract_strided_slice %17 {offsets = [0, 96], sizes = [2, 32], strides = [1, 1]} : vector<2x128xf32> to vector<2x32xf32>
    %33 = arith.negf %32 : vector<2x32xf32>
    %34 = math.exp %33 : vector<2x32xf32>
    %cst_13 = arith.constant 1.000000e+00 : f32
    %35 = vector.broadcast %cst_13 : f32 to vector<2x32xf32>
    %36 = arith.addf %35, %34 : vector<2x32xf32>
    %37 = arith.divf %35, %36 : vector<2x32xf32>
    %c0_14 = arith.constant 0 : index
    %c0_15 = arith.constant 0 : index
    %38 = vector.load %arg10[%c0_14, %c0_15] : memref<2x32xf32, #tpu.memory_space<vmem>>, vector<2x32xf32>
    %39 = arith.mulf %29, %38 : vector<2x32xf32>
    %40 = arith.mulf %23, %31 : vector<2x32xf32>
    %41 = arith.addf %39, %40 : vector<2x32xf32>
    %42 = math.tanh %41 : vector<2x32xf32>
    %43 = arith.mulf %37, %42 : vector<2x32xf32>
    %c0_16 = arith.constant 0 : index
    %c0_17 = arith.constant 0 : index
    %44 = vector.load %arg9[%c0_16, %c0_17] : memref<2x32xf32, #tpu.memory_space<vmem>>, vector<2x32xf32>
    %45 = vector.shape_cast %6 : vector<2x1xi1> to vector<2x1xi1>
    %46 = vector.broadcast %45 : vector<2x1xi1> to vector<2x32xi1>
    %47 = arith.select %46, %43, %44 : vector<2x32xi1>, vector<2x32xf32>
    %c0_18 = arith.constant 0 : index
    %c0_19 = arith.constant 0 : index
    %48 = vector.load %arg9[%c0_18, %c0_19] : memref<2x32xf32, #tpu.memory_space<vmem>>, vector<2x32xf32>
    tpu.vector_store %arg9[%c0_18, %c0_19], %47 {strides = array<i32>} : memref<2x32xf32, #tpu.memory_space<vmem>>, vector<2x32xf32>,
    %c0_20 = arith.constant 0 : index
    %c0_21 = arith.constant 0 : index
    %49 = vector.load %arg10[%c0_20, %c0_21] : memref<2x32xf32, #tpu.memory_space<vmem>>, vector<2x32xf32>
    %50 = vector.shape_cast %6 : vector<2x1xi1> to vector<2x1xi1>
    %51 = vector.broadcast %50 : vector<2x1xi1> to vector<2x32xi1>
    %52 = arith.select %51, %41, %49 : vector<2x32xi1>, vector<2x32xf32>
    %c0_22 = arith.constant 0 : index
    %c0_23 = arith.constant 0 : index
    %53 = vector.load %arg10[%c0_22, %c0_23] : memref<2x32xf32, #tpu.memory_space<vmem>>, vector<2x32xf32>
    tpu.vector_store %arg10[%c0_22, %c0_23], %52 {strides = array<i32>} : memref<2x32xf32, #tpu.memory_space<vmem>>, vector<2x32xf32>,
    %cst_24 = arith.constant 0.000000e+00 : f32
    %54 = vector.shape_cast %6 : vector<2x1xi1> to vector<2x1xi1>
    %55 = vector.broadcast %54 : vector<2x1xi1> to vector<2x32xi1>
    %56 = vector.broadcast %cst_24 : f32 to vector<2x32xf32>
    %57 = arith.select %55, %43, %56 : vector<2x32xi1>, vector<2x32xf32>
    %58 = arith.truncf %57 : vector<2x32xf32> to vector<2x32xbf16>
    %c0_25 = arith.constant 0 : index
    %c0_26 = arith.constant 0 : index
    %c0_27 = arith.constant 0 : index
    %c0_28 = arith.constant 0 : index
    %59 = vector.load %arg7[%c0_25, %c0_26, %c0_27, %c0_28] : memref<1x1x2x32xbf16, #tpu.memory_space<vmem>>, vector<1x1x2x32xbf16>
    %60 = vector.shape_cast %59 : vector<1x1x2x32xbf16> to vector<2x32xbf16>
    %61 = vector.shape_cast %58 : vector<2x32xbf16> to vector<1x1x2x32xbf16>
    tpu.vector_store %arg7[%c0_25, %c0_26, %c0_27, %c0_28], %61 {strides = array<i32>} : memref<1x1x2x32xbf16, #tpu.memory_space<vmem>>, vector<1x1x2x32xbf16>,
    %c0_29 = arith.constant 0 : index
    %c0_30 = arith.constant 0 : index
    %c0_31 = arith.constant 0 : index
    %c0_32 = arith.constant 0 : index
    %62 = vector.load %arg3[%c0_29, %c0_30, %c0_31, %c0_32] : memref<1x1x2x128xbf16, #tpu.memory_space<vmem>>, vector<1x1x2x128xbf16>
    %63 = vector.shape_cast %62 : vector<1x1x2x128xbf16> to vector<2x128xbf16>
    %64 = arith.extf %63 : vector<2x128xbf16> to vector<2x128xf32>
    %c0_33 = arith.constant 0 : index
    %c0_34 = arith.constant 0 : index
    %65 = vector.load %arg11[%c0_33, %c0_34] : memref<2x32xf32, #tpu.memory_space<vmem>>, vector<2x32xf32>
    %66 = arith.truncf %65 : vector<2x32xf32> to vector<2x32xbf16>
    %c0_35 = arith.constant 0 : index
    %c0_36 = arith.constant 0 : index
    %67 = vector.load %arg6[%c0_35, %c0_36] : memref<32x128xbf16, #tpu.memory_space<vmem>>, vector<32x128xbf16>
    %cst_37 = arith.constant dense<0.000000e+00> : vector<2x128xf32>
    %68 = tpu.matmul %66, %67, %cst_37 {dimension_numbers = #tpu.dot_dimension_numbers<[1], [0], [0], [1], [0, 0, 1, 1], [], []>} : vector<2x32xbf16>, vector<32x128xbf16>, vector<2x128xf32> -> vector<2x128xf32>
    %69 = arith.addf %64, %68 : vector<2x128xf32>
    %70 = vector.extract_strided_slice %69 {offsets = [0, 0], sizes = [2, 32], strides = [1, 1]} : vector<2x128xf32> to vector<2x32xf32>
    %71 = arith.negf %70 : vector<2x32xf32>
    %72 = math.exp %71 : vector<2x32xf32>
    %cst_38 = arith.constant 1.000000e+00 : f32
    %73 = vector.broadcast %cst_38 : f32 to vector<2x32xf32>
    %74 = arith.addf %73, %72 : vector<2x32xf32>
    %75 = arith.divf %73, %74 : vector<2x32xf32>
    %76 = vector.extract_strided_slice %69 {offsets = [0, 32], sizes = [2, 32], strides = [1, 1]} : vector<2x128xf32> to vector<2x32xf32>
    %77 = arith.negf %76 : vector<2x32xf32>
    %78 = math.exp %77 : vector<2x32xf32>
    %cst_39 = arith.constant 1.000000e+00 : f32
    %79 = vector.broadcast %cst_39 : f32 to vector<2x32xf32>
    %80 = arith.addf %79, %78 : vector<2x32xf32>
    %81 = arith.divf %79, %80 : vector<2x32xf32>
    %82 = vector.extract_strided_slice %69 {offsets = [0, 64], sizes = [2, 32], strides = [1, 1]} : vector<2x128xf32> to vector<2x32xf32>
    %83 = math.tanh %82 : vector<2x32xf32>
    %84 = vector.extract_strided_slice %69 {offsets = [0, 96], sizes = [2, 32], strides = [1, 1]} : vector<2x128xf32> to vector<2x32xf32>
    %85 = arith.negf %84 : vector<2x32xf32>
    %86 = math.exp %85 : vector<2x32xf32>
    %cst_40 = arith.constant 1.000000e+00 : f32
    %87 = vector.broadcast %cst_40 : f32 to vector<2x32xf32>
    %88 = arith.addf %87, %86 : vector<2x32xf32>
    %89 = arith.divf %87, %88 : vector<2x32xf32>
    %c0_41 = arith.constant 0 : index
    %c0_42 = arith.constant 0 : index
    %90 = vector.load %arg12[%c0_41, %c0_42] : memref<2x32xf32, #tpu.memory_space<vmem>>, vector<2x32xf32>
    %91 = arith.mulf %81, %90 : vector<2x32xf32>
    %92 = arith.mulf %75, %83 : vector<2x32xf32>
    %93 = arith.addf %91, %92 : vector<2x32xf32>
    %94 = math.tanh %93 : vector<2x32xf32>
    %95 = arith.mulf %89, %94 : vector<2x32xf32>
    %c0_43 = arith.constant 0 : index
    %c0_44 = arith.constant 0 : index
    %96 = vector.load %arg11[%c0_43, %c0_44] : memref<2x32xf32, #tpu.memory_space<vmem>>, vector<2x32xf32>
    %97 = vector.shape_cast %9 : vector<2x1xi1> to vector<2x1xi1>
    %98 = vector.broadcast %97 : vector<2x1xi1> to vector<2x32xi1>
    %99 = arith.select %98, %95, %96 : vector<2x32xi1>, vector<2x32xf32>
    %c0_45 = arith.constant 0 : index
    %c0_46 = arith.constant 0 : index
    %100 = vector.load %arg11[%c0_45, %c0_46] : memref<2x32xf32, #tpu.memory_space<vmem>>, vector<2x32xf32>
    tpu.vector_store %arg11[%c0_45, %c0_46], %99 {strides = array<i32>} : memref<2x32xf32, #tpu.memory_space<vmem>>, vector<2x32xf32>,
    %c0_47 = arith.constant 0 : index
    %c0_48 = arith.constant 0 : index
    %101 = vector.load %arg12[%c0_47, %c0_48] : memref<2x32xf32, #tpu.memory_space<vmem>>, vector<2x32xf32>
    %102 = vector.shape_cast %9 : vector<2x1xi1> to vector<2x1xi1>
    %103 = vector.broadcast %102 : vector<2x1xi1> to vector<2x32xi1>
    %104 = arith.select %103, %93, %101 : vector<2x32xi1>, vector<2x32xf32>
    %c0_49 = arith.constant 0 : index
    %c0_50 = arith.constant 0 : index
    %105 = vector.load %arg12[%c0_49, %c0_50] : memref<2x32xf32, #tpu.memory_space<vmem>>, vector<2x32xf32>
    tpu.vector_store %arg12[%c0_49, %c0_50], %104 {strides = array<i32>} : memref<2x32xf32, #tpu.memory_space<vmem>>, vector<2x32xf32>,
    %cst_51 = arith.constant 0.000000e+00 : f32
    %106 = vector.shape_cast %9 : vector<2x1xi1> to vector<2x1xi1>
    %107 = vector.broadcast %106 : vector<2x1xi1> to vector<2x32xi1>
    %108 = vector.broadcast %cst_51 : f32 to vector<2x32xf32>
    %109 = arith.select %107, %95, %108 : vector<2x32xi1>, vector<2x32xf32>
    %110 = arith.truncf %109 : vector<2x32xf32> to vector<2x32xbf16>
    %c0_52 = arith.constant 0 : index
    %c0_53 = arith.constant 0 : index
    %c0_54 = arith.constant 0 : index
    %c0_55 = arith.constant 0 : index
    %111 = vector.load %arg8[%c0_52, %c0_53, %c0_54, %c0_55] : memref<1x1x2x32xbf16, #tpu.memory_space<vmem>>, vector<1x1x2x32xbf16>
    %112 = vector.shape_cast %111 : vector<1x1x2x32xbf16> to vector<2x32xbf16>
    %113 = vector.shape_cast %110 : vector<2x32xbf16> to vector<1x1x2x32xbf16>
    tpu.vector_store %arg8[%c0_52, %c0_53, %c0_54, %c0_55], %113 {strides = array<i32>} : memref<1x1x2x32xbf16, #tpu.memory_space<vmem>>, vector<1x1x2x32xbf16>,
    return
  }
  func.func @transform_0(%arg0: i32, %arg1: i32) -> (i32, i32, i32, i32) {
    %c0_i32 = arith.constant 0 : i32
    %c0_i32_0 = arith.constant 0 : i32
    %c0_i32_1 = arith.constant 0 : i32
    return %arg1, %arg0, %c0_i32, %c0_i32_0 : i32, i32, i32, i32
  }
  func.func @transform_1(%arg0: i32, %arg1: i32) -> (i32, i32, i32, i32) {
    %c7_i32 = arith.constant 7 : i32
    %0 = arith.subi %c7_i32, %arg1 : i32
    %c0_i32 = arith.constant 0 : i32
    %c1_i32 = arith.constant 1 : i32
    %c0_i32_0 = arith.constant 0 : i32
    return %0, %arg0, %c0_i32, %c1_i32 : i32, i32, i32, i32
  }
  func.func @transform_2(%arg0: i32, %arg1: i32) -> (i32, i32, i32) {
    %c0_i32 = arith.constant 0 : i32
    %c0_i32_0 = arith.constant 0 : i32
    %c0_i32_1 = arith.constant 0 : i32
    return %arg0, %c0_i32, %c0_i32_0 : i32, i32, i32
  }
  func.func @transform_3(%arg0: i32, %arg1: i32) -> (i32, i32) {
    %c0_i32 = arith.constant 0 : i32
    %c0_i32_0 = arith.constant 0 : i32
    %c0_i32_1 = arith.constant 0 : i32
    return %c0_i32, %c0_i32_0 : i32, i32
  }
  func.func @transform_4(%arg0: i32, %arg1: i32) -> (i32, i32) {
    %c0_i32 = arith.constant 0 : i32
    %c0_i32_0 = arith.constant 0 : i32
    %c0_i32_1 = arith.constant 0 : i32
    return %c0_i32, %c0_i32_0 : i32, i32
  }
  func.func @transform_5(%arg0: i32, %arg1: i32) -> (i32, i32, i32, i32) {
    %c0_i32 = arith.constant 0 : i32
    %c0_i32_0 = arith.constant 0 : i32
    %c0_i32_1 = arith.constant 0 : i32
    return %arg1, %arg0, %c0_i32, %c0_i32_0 : i32, i32, i32, i32
  }
  func.func @transform_6(%arg0: i32, %arg1: i32) -> (i32, i32, i32, i32) {
    %c7_i32 = arith.constant 7 : i32
    %0 = arith.subi %c7_i32, %arg1 : i32
    %c0_i32 = arith.constant 0 : i32
    %c0_i32_0 = arith.constant 0 : i32
    %c0_i32_1 = arith.constant 0 : i32
    return %0, %arg0, %c0_i32, %c0_i32_0 : i32, i32, i32, i32
  }
}

module attributes {stable_mosaic.version = 11 : i64} {
  func.func @dense_kernel(%arg0: i32, %arg1: i32, %arg2: memref<32x16xbf16, #tpu.memory_space<vmem>>, %arg3: memref<16x256xbf16, #tpu.memory_space<vmem>>, %arg4: memref<1x256xf32, #tpu.memory_space<vmem>>, %arg5: memref<32x256xbf16, #tpu.memory_space<vmem>>) attributes {dimension_semantics = [#tpu.dimension_semantics<parallel>, #tpu.dimension_semantics<parallel>], iteration_bounds = array<i64: 1, 1>, scalar_prefetch = 0 : i64, scratch_operands = 0 : i64, tpu.core_type = #tpu.core_type<tc>, window_params = [{transform_indices = @transform_0, window_bounds = array<i64: 32, 16>}, {transform_indices = @transform_1, window_bounds = array<i64: 16, 256>}, {transform_indices = @transform_2, window_bounds = array<i64: 1, 256>}, {transform_indices = @transform_3, window_bounds = array<i64: 32, 256>}]} {
    %c0 = arith.constant 0 : index
    %c0_0 = arith.constant 0 : index
    %0 = vector.load %arg2[%c0, %c0_0] : memref<32x16xbf16, #tpu.memory_space<vmem>>, vector<32x16xbf16>
    %c0_1 = arith.constant 0 : index
    %c0_2 = arith.constant 0 : index
    %1 = vector.load %arg3[%c0_1, %c0_2] : memref<16x256xbf16, #tpu.memory_space<vmem>>, vector<16x256xbf16>
    %cst = arith.constant dense<0.000000e+00> : vector<32x256xf32>
    %2 = tpu.matmul %0, %1, %cst {dimension_numbers = #tpu.dot_dimension_numbers<[1], [0], [0], [1], [0, 0, 1, 1], [], []>} : vector<32x16xbf16>, vector<16x256xbf16>, vector<32x256xf32> -> vector<32x256xf32>
    %c0_3 = arith.constant 0 : index
    %c0_4 = arith.constant 0 : index
    %3 = vector.load %arg4[%c0_3, %c0_4] : memref<1x256xf32, #tpu.memory_space<vmem>>, vector<1x256xf32>
    %4 = vector.broadcast %3 : vector<1x256xf32> to vector<32x256xf32>
    %5 = arith.addf %2, %4 : vector<32x256xf32>
    %6 = arith.truncf %5 : vector<32x256xf32> to vector<32x256xbf16>
    %c0_5 = arith.constant 0 : index
    %c0_6 = arith.constant 0 : index
    %7 = vector.load %arg5[%c0_5, %c0_6] : memref<32x256xbf16, #tpu.memory_space<vmem>>, vector<32x256xbf16>
    tpu.vector_store %arg5[%c0_5, %c0_6], %6 {strides = array<i32>} : memref<32x256xbf16, #tpu.memory_space<vmem>>, vector<32x256xbf16>,
    return
  }
  func.func @transform_0(%arg0: i32, %arg1: i32) -> (i32, i32) {
    %c0_i32 = arith.constant 0 : i32
    %c0_i32_0 = arith.constant 0 : i32
    return %arg0, %c0_i32 : i32, i32
  }
  func.func @transform_1(%arg0: i32, %arg1: i32) -> (i32, i32) {
    %c0_i32 = arith.constant 0 : i32
    %c0_i32_0 = arith.constant 0 : i32
    return %c0_i32, %arg1 : i32, i32
  }
  func.func @transform_2(%arg0: i32, %arg1: i32) -> (i32, i32) {
    %c0_i32 = arith.constant 0 : i32
    %c0_i32_0 = arith.constant 0 : i32
    return %c0_i32, %arg1 : i32, i32
  }
  func.func @transform_3(%arg0: i32, %arg1: i32) -> (i32, i32) {
    %c0_i32 = arith.constant 0 : i32
    return %arg0, %arg1 : i32, i32
  }
}

module attributes {stable_mosaic.version = 11 : i64} {
  func.func @attention_comp_kernel(%arg0: i32, %arg1: memref<1x8x64xbf16, #tpu.memory_space<vmem>>, %arg2: memref<1x8x64xbf16, #tpu.memory_space<vmem>>, %arg3: memref<1x8x1xf32, #tpu.memory_space<vmem>>, %arg4: memref<1x1x8xf32, #tpu.memory_space<vmem>>, %arg5: memref<64x256xbf16, #tpu.memory_space<vmem>>, %arg6: memref<64x256xbf16, #tpu.memory_space<vmem>>, %arg7: memref<64x256xbf16, #tpu.memory_space<vmem>>, %arg8: memref<1x256xf32, #tpu.memory_space<vmem>>, %arg9: memref<1x8x256xbf16, #tpu.memory_space<vmem>>, %arg10: memref<1x8x256xbf16, #tpu.memory_space<vmem>>) attributes {dimension_semantics = [#tpu.dimension_semantics<parallel>], iteration_bounds = array<i64: 2>, scalar_prefetch = 0 : i64, scratch_operands = 0 : i64, tpu.core_type = #tpu.core_type<tc>, window_params = [{transform_indices = @transform_0, window_bounds = array<i64: 1, 8, 64>}, {transform_indices = @transform_1, window_bounds = array<i64: 1, 8, 64>}, {transform_indices = @transform_2, window_bounds = array<i64: 1, 8, 1>}, {transform_indices = @transform_3, window_bounds = array<i64: 1, 1, 8>}, {pipeline_mode = #tpu.pipeline_mode<synchronous>, transform_indices = @transform_4, window_bounds = array<i64: 64, 256>}, {pipeline_mode = #tpu.pipeline_mode<synchronous>, transform_indices = @transform_5, window_bounds = array<i64: 64, 256>}, {pipeline_mode = #tpu.pipeline_mode<synchronous>, transform_indices = @transform_6, window_bounds = array<i64: 64, 256>}, {pipeline_mode = #tpu.pipeline_mode<synchronous>, transform_indices = @transform_7, window_bounds = array<i64: 1, 256>}, {transform_indices = @transform_8, window_bounds = array<i64: 1, 8, 256>}, {transform_indices = @transform_9, window_bounds = array<i64: 1, 8, 256>}]} {
    %c0 = arith.constant 0 : index
    %c0_0 = arith.constant 0 : index
    %c0_1 = arith.constant 0 : index
    %0 = vector.load %arg1[%c0, %c0_0, %c0_1] : memref<1x8x64xbf16, #tpu.memory_space<vmem>>, vector<1x8x64xbf16>
    %1 = vector.shape_cast %0 : vector<1x8x64xbf16> to vector<8x64xbf16>
    %c0_2 = arith.constant 0 : index
    %c0_3 = arith.constant 0 : index
    %c0_4 = arith.constant 0 : index
    %2 = vector.load %arg2[%c0_2, %c0_3, %c0_4] : memref<1x8x64xbf16, #tpu.memory_space<vmem>>, vector<1x8x64xbf16>
    %3 = vector.shape_cast %2 : vector<1x8x64xbf16> to vector<8x64xbf16>
    %c0_5 = arith.constant 0 : index
    %c0_6 = arith.constant 0 : index
    %c0_7 = arith.constant 0 : index
    %4 = vector.load %arg3[%c0_5, %c0_6, %c0_7] : memref<1x8x1xf32, #tpu.memory_space<vmem>>, vector<1x8x1xf32>
    %5 = vector.shape_cast %4 : vector<1x8x1xf32> to vector<8x1xf32>
    %c0_8 = arith.constant 0 : index
    %c0_9 = arith.constant 0 : index
    %c0_10 = arith.constant 0 : index
    %6 = vector.load %arg4[%c0_8, %c0_9, %c0_10] : memref<1x1x8xf32, #tpu.memory_space<vmem>>, vector<1x1x8xf32>
    %7 = vector.shape_cast %6 : vector<1x1x8xf32> to vector<1x8xf32>
    %8 = vector.broadcast %5 : vector<8x1xf32> to vector<8x8xf32>
    %9 = vector.broadcast %7 : vector<1x8xf32> to vector<8x8xf32>
    %10 = arith.mulf %8, %9 : vector<8x8xf32>
    %c0_11 = arith.constant 0 : index
    %c0_12 = arith.constant 0 : index
    %11 = vector.load %arg5[%c0_11, %c0_12] : memref<64x256xbf16, #tpu.memory_space<vmem>>, vector<64x256xbf16>
    %c0_13 = arith.constant 0 : index
    %c0_14 = arith.constant 0 : index
    %12 = vector.load %arg6[%c0_13, %c0_14] : memref<64x256xbf16, #tpu.memory_space<vmem>>, vector<64x256xbf16>
    %c0_15 = arith.constant 0 : index
    %c0_16 = arith.constant 0 : index
    %13 = vector.load %arg7[%c0_15, %c0_16] : memref<64x256xbf16, #tpu.memory_space<vmem>>, vector<64x256xbf16>
    %c0_17 = arith.constant 0 : index
    %c0_18 = arith.constant 0 : index
    %14 = vector.load %arg8[%c0_17, %c0_18] : memref<1x256xf32, #tpu.memory_space<vmem>>, vector<1x256xf32>
    %cst = arith.constant dense<0.000000e+00> : vector<8x8xf32>
    %15 = tpu.matmul %1, %3, %cst {dimension_numbers = #tpu.dot_dimension_numbers<[1], [1], [0], [0], [0, 0, 1, 0], [], []>} : vector<8x64xbf16>, vector<8x64xbf16>, vector<8x8xf32> -> vector<8x8xf32>
    %cst_19 = arith.constant 9.99999993E-9 : f32
    %16 = vector.broadcast %cst_19 : f32 to vector<8x8xf32>
    %17 = arith.cmpf olt, %10, %16 : vector<8x8xf32>
    %cst_20 = arith.constant -1.000000e-07 : f32
    %18 = vector.broadcast %cst_20 : f32 to vector<8x8xf32>
    %19 = arith.select %17, %18, %15 : vector<8x8xi1>, vector<8x8xf32>
    %cst_21 = arith.constant dense<0xFF800000> : vector<8xf32>
    %20 = vector.multi_reduction <maximumf>, %19, %cst_21 [1] : vector<8x8xf32> to vector<8xf32>
    %21 = vector.shape_cast %20 : vector<8xf32> to vector<8x1xf32>
    %22 = vector.broadcast %21 : vector<8x1xf32> to vector<8x8xf32>
    %23 = arith.subf %19, %22 : vector<8x8xf32>
    %24 = math.exp %23 : vector<8x8xf32>
    %cst_22 = arith.constant dense<0.000000e+00> : vector<8xf32>
    %25 = vector.multi_reduction <add>, %24, %cst_22 [1] : vector<8x8xf32> to vector<8xf32>
    %26 = vector.shape_cast %25 : vector<8xf32> to vector<8x1xf32>
    %27 = vector.broadcast %26 : vector<8x1xf32> to vector<8x8xf32>
    %28 = arith.divf %24, %27 : vector<8x8xf32>
    %cst_23 = arith.constant dense<0xFF800000> : vector<8xf32>
    %29 = vector.multi_reduction <maximumf>, %19, %cst_23 [0] : vector<8x8xf32> to vector<8xf32>
    %30 = vector.shape_cast %29 : vector<8xf32> to vector<1x8xf32>
    %31 = vector.broadcast %30 : vector<1x8xf32> to vector<8x8xf32>
    %32 = arith.subf %19, %31 : vector<8x8xf32>
    %33 = math.exp %32 : vector<8x8xf32>
    %cst_24 = arith.constant dense<0.000000e+00> : vector<8xf32>
    %34 = vector.multi_reduction <add>, %33, %cst_24 [0] : vector<8x8xf32> to vector<8xf32>
    %35 = vector.shape_cast %34 : vector<8xf32> to vector<1x8xf32>
    %36 = vector.broadcast %35 : vector<1x8xf32> to vector<8x8xf32>
    %37 = arith.divf %33, %36 : vector<8x8xf32>
    %38 = arith.truncf %28 : vector<8x8xf32> to vector<8x8xbf16>
    %cst_25 = arith.constant dense<0.000000e+00> : vector<8x64xf32>
    %39 = tpu.matmul %38, %3, %cst_25 {dimension_numbers = #tpu.dot_dimension_numbers<[1], [0], [0], [1], [0, 0, 1, 1], [], []>} : vector<8x8xbf16>, vector<8x64xbf16>, vector<8x64xf32> -> vector<8x64xf32>
    %40 = arith.truncf %37 : vector<8x8xf32> to vector<8x8xbf16>
    %cst_26 = arith.constant dense<0.000000e+00> : vector<8x64xf32>
    %41 = tpu.matmul %40, %1, %cst_26 {dimension_numbers = #tpu.dot_dimension_numbers<[0], [0], [1], [1], [0, 1, 1, 1], [], []>} : vector<8x8xbf16>, vector<8x64xbf16>, vector<8x64xf32> -> vector<8x64xf32>
    %42 = arith.extf %1 : vector<8x64xbf16> to vector<8x64xf32>
    %43 = arith.mulf %42, %39 : vector<8x64xf32>
    %44 = arith.truncf %43 : vector<8x64xf32> to vector<8x64xbf16>
    %cst_27 = arith.constant dense<0.000000e+00> : vector<8x256xf32>
    %45 = tpu.matmul %1, %11, %cst_27 {dimension_numbers = #tpu.dot_dimension_numbers<[1], [0], [0], [1], [0, 0, 1, 1], [], []>} : vector<8x64xbf16>, vector<64x256xbf16>, vector<8x256xf32> -> vector<8x256xf32>
    %46 = arith.truncf %39 : vector<8x64xf32> to vector<8x64xbf16>
    %cst_28 = arith.constant dense<0.000000e+00> : vector<8x256xf32>
    %47 = tpu.matmul %46, %12, %cst_28 {dimension_numbers = #tpu.dot_dimension_numbers<[1], [0], [0], [1], [0, 0, 1, 1], [], []>} : vector<8x64xbf16>, vector<64x256xbf16>, vector<8x256xf32> -> vector<8x256xf32>
    %48 = arith.addf %45, %47 : vector<8x256xf32>
    %cst_29 = arith.constant dense<0.000000e+00> : vector<8x256xf32>
    %49 = tpu.matmul %44, %13, %cst_29 {dimension_numbers = #tpu.dot_dimension_numbers<[1], [0], [0], [1], [0, 0, 1, 1], [], []>} : vector<8x64xbf16>, vector<64x256xbf16>, vector<8x256xf32> -> vector<8x256xf32>
    %50 = arith.addf %48, %49 : vector<8x256xf32>
    %51 = vector.broadcast %14 : vector<1x256xf32> to vector<8x256xf32>
    %52 = arith.addf %50, %51 : vector<8x256xf32>
    %53 = arith.truncf %52 : vector<8x256xf32> to vector<8x256xbf16>
    %c0_30 = arith.constant 0 : index
    %c0_31 = arith.constant 0 : index
    %c0_32 = arith.constant 0 : index
    %54 = vector.load %arg9[%c0_30, %c0_31, %c0_32] : memref<1x8x256xbf16, #tpu.memory_space<vmem>>, vector<1x8x256xbf16>
    %55 = vector.shape_cast %54 : vector<1x8x256xbf16> to vector<8x256xbf16>
    %56 = vector.shape_cast %53 : vector<8x256xbf16> to vector<1x8x256xbf16>
    tpu.vector_store %arg9[%c0_30, %c0_31, %c0_32], %56 {strides = array<i32>} : memref<1x8x256xbf16, #tpu.memory_space<vmem>>, vector<1x8x256xbf16>,
    %57 = arith.extf %3 : vector<8x64xbf16> to vector<8x64xf32>
    %58 = arith.mulf %57, %41 : vector<8x64xf32>
    %59 = arith.truncf %58 : vector<8x64xf32> to vector<8x64xbf16>
    %cst_33 = arith.constant dense<0.000000e+00> : vector<8x256xf32>
    %60 = tpu.matmul %3, %11, %cst_33 {dimension_numbers = #tpu.dot_dimension_numbers<[1], [0], [0], [1], [0, 0, 1, 1], [], []>} : vector<8x64xbf16>, vector<64x256xbf16>, vector<8x256xf32> -> vector<8x256xf32>
    %61 = arith.truncf %41 : vector<8x64xf32> to vector<8x64xbf16>
    %cst_34 = arith.constant dense<0.000000e+00> : vector<8x256xf32>
    %62 = tpu.matmul %61, %12, %cst_34 {dimension_numbers = #tpu.dot_dimension_numbers<[1], [0], [0], [1], [0, 0, 1, 1], [], []>} : vector<8x64xbf16>, vector<64x256xbf16>, vector<8x256xf32> -> vector<8x256xf32>
    %63 = arith.addf %60, %62 : vector<8x256xf32>
    %cst_35 = arith.constant dense<0.000000e+00> : vector<8x256xf32>
    %64 = tpu.matmul %59, %13, %cst_35 {dimension_numbers = #tpu.dot_dimension_numbers<[1], [0], [0], [1], [0, 0, 1, 1], [], []>} : vector<8x64xbf16>, vector<64x256xbf16>, vector<8x256xf32> -> vector<8x256xf32>
    %65 = arith.addf %63, %64 : vector<8x256xf32>
    %66 = vector.broadcast %14 : vector<1x256xf32> to vector<8x256xf32>
    %67 = arith.addf %65, %66 : vector<8x256xf32>
    %68 = arith.truncf %67 : vector<8x256xf32> to vector<8x256xbf16>
    %c0_36 = arith.constant 0 : index
    %c0_37 = arith.constant 0 : index
    %c0_38 = arith.constant 0 : index
    %69 = vector.load %arg10[%c0_36, %c0_37, %c0_38] : memref<1x8x256xbf16, #tpu.memory_space<vmem>>, vector<1x8x256xbf16>
    %70 = vector.shape_cast %69 : vector<1x8x256xbf16> to vector<8x256xbf16>
    %71 = vector.shape_cast %68 : vector<8x256xbf16> to vector<1x8x256xbf16>
    tpu.vector_store %arg10[%c0_36, %c0_37, %c0_38], %71 {strides = array<i32>} : memref<1x8x256xbf16, #tpu.memory_space<vmem>>, vector<1x8x256xbf16>,
    return
  }
  func.func @transform_0(%arg0: i32) -> (i32, i32, i32) {
    %c0_i32 = arith.constant 0 : i32
    %c0_i32_0 = arith.constant 0 : i32
    %c0_i32_1 = arith.constant 0 : i32
    return %arg0, %c0_i32, %c0_i32_0 : i32, i32, i32
  }
  func.func @transform_1(%arg0: i32) -> (i32, i32, i32) {
    %c0_i32 = arith.constant 0 : i32
    %c0_i32_0 = arith.constant 0 : i32
    %c0_i32_1 = arith.constant 0 : i32
    return %arg0, %c0_i32, %c0_i32_0 : i32, i32, i32
  }
  func.func @transform_2(%arg0: i32) -> (i32, i32, i32) {
    %c0_i32 = arith.constant 0 : i32
    %c0_i32_0 = arith.constant 0 : i32
    %c0_i32_1 = arith.constant 0 : i32
    return %arg0, %c0_i32, %c0_i32_0 : i32, i32, i32
  }
  func.func @transform_3(%arg0: i32) -> (i32, i32, i32) {
    %c0_i32 = arith.constant 0 : i32
    %c0_i32_0 = arith.constant 0 : i32
    %c0_i32_1 = arith.constant 0 : i32
    return %arg0, %c0_i32, %c0_i32_0 : i32, i32, i32
  }
  func.func @transform_4(%arg0: i32) -> (i32, i32) {
    %c0_i32 = arith.constant 0 : i32
    %c0_i32_0 = arith.constant 0 : i32
    %c0_i32_1 = arith.constant 0 : i32
    return %c0_i32, %c0_i32_0 : i32, i32
  }
  func.func @transform_5(%arg0: i32) -> (i32, i32) {
    %c0_i32 = arith.constant 0 : i32
    %c0_i32_0 = arith.constant 0 : i32
    %c0_i32_1 = arith.constant 0 : i32
    return %c0_i32, %c0_i32_0 : i32, i32
  }
  func.func @transform_6(%arg0: i32) -> (i32, i32) {
    %c0_i32 = arith.constant 0 : i32
    %c0_i32_0 = arith.constant 0 : i32
    %c0_i32_1 = arith.constant 0 : i32
    return %c0_i32, %c0_i32_0 : i32, i32
  }
  func.func @transform_7(%arg0: i32) -> (i32, i32) {
    %c0_i32 = arith.constant 0 : i32
    %c0_i32_0 = arith.constant 0 : i32
    %c0_i32_1 = arith.constant 0 : i32
    return %c0_i32, %c0_i32_0 : i32, i32
  }
  func.func @transform_8(%arg0: i32) -> (i32, i32, i32) {
    %c0_i32 = arith.constant 0 : i32
    %c0_i32_0 = arith.constant 0 : i32
    %c0_i32_1 = arith.constant 0 : i32
    return %arg0, %c0_i32, %c0_i32_0 : i32, i32, i32
  }
  func.func @transform_9(%arg0: i32) -> (i32, i32, i32) {
    %c0_i32 = arith.constant 0 : i32
    %c0_i32_0 = arith.constant 0 : i32
    %c0_i32_1 = arith.constant 0 : i32
    return %arg0, %c0_i32, %c0_i32_0 : i32, i32, i32
  }
}

module attributes {stable_mosaic.version = 11 : i64} {
  func.func @pool_mlp_kernel(%arg0: i32, %arg1: memref<8x4x32xbf16, #tpu.memory_space<vmem>>, %arg2: memref<8x4x32xbf16, #tpu.memory_space<vmem>>, %arg3: memref<1x4x1xf32, #tpu.memory_space<vmem>>, %arg4: memref<1x4x1xi32, #tpu.memory_space<vmem>>, %arg5: memref<256x32xbf16, #tpu.memory_space<vmem>>, %arg6: memref<1x32xf32, #tpu.memory_space<vmem>>, %arg7: memref<32x3xbf16, #tpu.memory_space<vmem>>, %arg8: memref<1x3xf32, #tpu.memory_space<vmem>>, %arg9: memref<2x3xf32, #tpu.memory_space<vmem>>, %arg10: memref<2x3xf32, #tpu.memory_space<vmem>>) attributes {dimension_semantics = [#tpu.dimension_semantics<arbitrary>], iteration_bounds = array<i64: 1>, scalar_prefetch = 0 : i64, scratch_operands = 0 : i64, tpu.core_type = #tpu.core_type<tc>, window_params = [{pipeline_mode = #tpu.pipeline_mode<synchronous>, transform_indices = @transform_0, window_bounds = array<i64: 8, 4, 32>}, {pipeline_mode = #tpu.pipeline_mode<synchronous>, transform_indices = @transform_1, window_bounds = array<i64: 8, 4, 32>}, {pipeline_mode = #tpu.pipeline_mode<synchronous>, transform_indices = @transform_2, window_bounds = array<i64: 1, 4, 1>}, {pipeline_mode = #tpu.pipeline_mode<synchronous>, transform_indices = @transform_3, window_bounds = array<i64: 1, 4, 1>}, {pipeline_mode = #tpu.pipeline_mode<synchronous>, transform_indices = @transform_4, window_bounds = array<i64: 256, 32>}, {pipeline_mode = #tpu.pipeline_mode<synchronous>, transform_indices = @transform_5, window_bounds = array<i64: 1, 32>}, {pipeline_mode = #tpu.pipeline_mode<synchronous>, transform_indices = @transform_6, window_bounds = array<i64: 32, 3>}, {pipeline_mode = #tpu.pipeline_mode<synchronous>, transform_indices = @transform_7, window_bounds = array<i64: 1, 3>}, {pipeline_mode = #tpu.pipeline_mode<synchronous>, transform_indices = @transform_8, window_bounds = array<i64: 2, 3>}, {pipeline_mode = #tpu.pipeline_mode<synchronous>, transform_indices = @transform_9, window_bounds = array<i64: 2, 3>}]} {
    %c0 = arith.constant 0 : index
    %c0_0 = arith.constant 0 : index
    %c0_1 = arith.constant 0 : index
    %0 = vector.load %arg1[%c0, %c0_0, %c0_1] : memref<8x4x32xbf16, #tpu.memory_space<vmem>>, vector<8x4x32xbf16>
    %1 = arith.extf %0 : vector<8x4x32xbf16> to vector<8x4x32xf32>
    %c0_2 = arith.constant 0 : index
    %c0_3 = arith.constant 0 : index
    %c0_4 = arith.constant 0 : index
    %2 = vector.load %arg2[%c0_2, %c0_3, %c0_4] : memref<8x4x32xbf16, #tpu.memory_space<vmem>>, vector<8x4x32xbf16>
    %3 = arith.extf %2 : vector<8x4x32xbf16> to vector<8x4x32xf32>
    %c0_5 = arith.constant 0 : index
    %c0_6 = arith.constant 0 : index
    %c0_7 = arith.constant 0 : index
    %4 = vector.load %arg3[%c0_5, %c0_6, %c0_7] : memref<1x4x1xf32, #tpu.memory_space<vmem>>, vector<1x4x1xf32>
    %5 = vector.shape_cast %4 : vector<1x4x1xf32> to vector<4x1xf32>
    %6 = tpu.iota {dimensions = array<i32: 0>} : vector<8x4x1xi32>
    %c0_8 = arith.constant 0 : index
    %c0_9 = arith.constant 0 : index
    %c0_10 = arith.constant 0 : index
    %7 = vector.load %arg4[%c0_8, %c0_9, %c0_10] : memref<1x4x1xi32, #tpu.memory_space<vmem>>, vector<1x4x1xi32>
    %8 = vector.broadcast %7 : vector<1x4x1xi32> to vector<8x4x1xi32>
    %9 = arith.cmpi slt, %6, %8 : vector<8x4x1xi32>
    %cst = arith.constant dense<0.000000e+00> : vector<4x32xf32>
    %10 = vector.multi_reduction <add>, %1, %cst [0] : vector<8x4x32xf32> to vector<4x32xf32>
    %11 = vector.broadcast %5 : vector<4x1xf32> to vector<4x32xf32>
    %12 = arith.mulf %10, %11 : vector<4x32xf32>
    %cst_11 = arith.constant dense<0.000000e+00> : vector<4x32xf32>
    %13 = vector.multi_reduction <add>, %3, %cst_11 [0] : vector<8x4x32xf32> to vector<4x32xf32>
    %14 = vector.broadcast %5 : vector<4x1xf32> to vector<4x32xf32>
    %15 = arith.mulf %13, %14 : vector<4x32xf32>
    %cst_12 = arith.constant 0xFF800000 : f32
    %16 = vector.shape_cast %9 : vector<8x4x1xi1> to vector<8x4x1xi1>
    %17 = vector.broadcast %16 : vector<8x4x1xi1> to vector<8x4x32xi1>
    %18 = vector.broadcast %cst_12 : f32 to vector<8x4x32xf32>
    %19 = arith.select %17, %1, %18 : vector<8x4x32xi1>, vector<8x4x32xf32>
    %cst_13 = arith.constant dense<0xFF800000> : vector<4x32xf32>
    %20 = vector.multi_reduction <maximumf>, %19, %cst_13 [0] : vector<8x4x32xf32> to vector<4x32xf32>
    %cst_14 = arith.constant 0xFF800000 : f32
    %21 = vector.shape_cast %9 : vector<8x4x1xi1> to vector<8x4x1xi1>
    %22 = vector.broadcast %21 : vector<8x4x1xi1> to vector<8x4x32xi1>
    %23 = vector.broadcast %cst_14 : f32 to vector<8x4x32xf32>
    %24 = arith.select %22, %3, %23 : vector<8x4x32xi1>, vector<8x4x32xf32>
    %cst_15 = arith.constant dense<0xFF800000> : vector<4x32xf32>
    %25 = vector.multi_reduction <maximumf>, %24, %cst_15 [0] : vector<8x4x32xf32> to vector<4x32xf32>
    %26 = vector.extract_strided_slice %12 {offsets = [0, 0], sizes = [2, 32], strides = [1, 1]} : vector<4x32xf32> to vector<2x32xf32>
    %27 = vector.extract_strided_slice %15 {offsets = [0, 0], sizes = [2, 32], strides = [1, 1]} : vector<4x32xf32> to vector<2x32xf32>
    %28 = vector.extract_strided_slice %20 {offsets = [0, 0], sizes = [2, 32], strides = [1, 1]} : vector<4x32xf32> to vector<2x32xf32>
    %29 = vector.extract_strided_slice %25 {offsets = [0, 0], sizes = [2, 32], strides = [1, 1]} : vector<4x32xf32> to vector<2x32xf32>
    %30 = vector.extract_strided_slice %12 {offsets = [2, 0], sizes = [2, 32], strides = [1, 1]} : vector<4x32xf32> to vector<2x32xf32>
    %31 = vector.extract_strided_slice %15 {offsets = [2, 0], sizes = [2, 32], strides = [1, 1]} : vector<4x32xf32> to vector<2x32xf32>
    %32 = vector.extract_strided_slice %20 {offsets = [2, 0], sizes = [2, 32], strides = [1, 1]} : vector<4x32xf32> to vector<2x32xf32>
    %33 = vector.extract_strided_slice %25 {offsets = [2, 0], sizes = [2, 32], strides = [1, 1]} : vector<4x32xf32> to vector<2x32xf32>
    %34 = tpu.concatenate %26, %27, %28, %29, %30, %31, %32, %33 in 1 : vector<2x32xf32>, vector<2x32xf32>, vector<2x32xf32>, vector<2x32xf32>, vector<2x32xf32>, vector<2x32xf32>, vector<2x32xf32>, vector<2x32xf32> -> vector<2x256xf32>
    %35 = arith.truncf %34 : vector<2x256xf32> to vector<2x256xbf16>
    %c0_16 = arith.constant 0 : index
    %c0_17 = arith.constant 0 : index
    %36 = vector.load %arg5[%c0_16, %c0_17] : memref<256x32xbf16, #tpu.memory_space<vmem>>, vector<256x32xbf16>
    %cst_18 = arith.constant dense<0.000000e+00> : vector<2x32xf32>
    %37 = tpu.matmul %35, %36, %cst_18 {dimension_numbers = #tpu.dot_dimension_numbers<[1], [0], [0], [1], [0, 0, 1, 1], [], []>} : vector<2x256xbf16>, vector<256x32xbf16>, vector<2x32xf32> -> vector<2x32xf32>
    %c0_19 = arith.constant 0 : index
    %c0_20 = arith.constant 0 : index
    %38 = vector.load %arg6[%c0_19, %c0_20] : memref<1x32xf32, #tpu.memory_space<vmem>>, vector<1x32xf32>
    %39 = vector.broadcast %38 : vector<1x32xf32> to vector<2x32xf32>
    %40 = arith.addf %37, %39 : vector<2x32xf32>
    %41 = math.tanh %40 : vector<2x32xf32>
    %42 = arith.truncf %41 : vector<2x32xf32> to vector<2x32xbf16>
    %c0_21 = arith.constant 0 : index
    %c0_22 = arith.constant 0 : index
    %43 = vector.load %arg7[%c0_21, %c0_22] : memref<32x3xbf16, #tpu.memory_space<vmem>>, vector<32x3xbf16>
    %cst_23 = arith.constant dense<0.000000e+00> : vector<2x3xf32>
    %44 = tpu.matmul %42, %43, %cst_23 {dimension_numbers = #tpu.dot_dimension_numbers<[1], [0], [0], [1], [0, 0, 1, 1], [], []>} : vector<2x32xbf16>, vector<32x3xbf16>, vector<2x3xf32> -> vector<2x3xf32>
    %c0_24 = arith.constant 0 : index
    %c0_25 = arith.constant 0 : index
    %45 = vector.load %arg8[%c0_24, %c0_25] : memref<1x3xf32, #tpu.memory_space<vmem>>, vector<1x3xf32>
    %46 = vector.broadcast %45 : vector<1x3xf32> to vector<2x3xf32>
    %47 = arith.addf %44, %46 : vector<2x3xf32>
    %c0_26 = arith.constant 0 : index
    %c0_27 = arith.constant 0 : index
    %48 = vector.load %arg9[%c0_26, %c0_27] : memref<2x3xf32, #tpu.memory_space<vmem>>, vector<2x3xf32>
    tpu.vector_store %arg9[%c0_26, %c0_27], %47 {strides = array<i32>} : memref<2x3xf32, #tpu.memory_space<vmem>>, vector<2x3xf32>,
    %cst_28 = arith.constant dense<0xFF800000> : vector<2xf32>
    %49 = vector.multi_reduction <maximumf>, %47, %cst_28 [1] : vector<2x3xf32> to vector<2xf32>
    %50 = vector.shape_cast %49 : vector<2xf32> to vector<2x1xf32>
    %51 = vector.broadcast %50 : vector<2x1xf32> to vector<2x3xf32>
    %52 = arith.subf %47, %51 : vector<2x3xf32>
    %53 = math.exp %52 : vector<2x3xf32>
    %cst_29 = arith.constant dense<0.000000e+00> : vector<2xf32>
    %54 = vector.multi_reduction <add>, %53, %cst_29 [1] : vector<2x3xf32> to vector<2xf32>
    %55 = vector.shape_cast %54 : vector<2xf32> to vector<2x1xf32>
    %56 = vector.broadcast %55 : vector<2x1xf32> to vector<2x3xf32>
    %57 = arith.divf %53, %56 : vector<2x3xf32>
    %c0_30 = arith.constant 0 : index
    %c0_31 = arith.constant 0 : index
    %58 = vector.load %arg10[%c0_30, %c0_31] : memref<2x3xf32, #tpu.memory_space<vmem>>, vector<2x3xf32>
    tpu.vector_store %arg10[%c0_30, %c0_31], %57 {strides = array<i32>} : memref<2x3xf32, #tpu.memory_space<vmem>>, vector<2x3xf32>,
    return
  }
  func.func @transform_0(%arg0: i32) -> (i32, i32, i32) {
    %c0_i32 = arith.constant 0 : i32
    %c0_i32_0 = arith.constant 0 : i32
    %c0_i32_1 = arith.constant 0 : i32
    %c0_i32_2 = arith.constant 0 : i32
    return %c0_i32, %c0_i32_0, %c0_i32_1 : i32, i32, i32
  }
  func.func @transform_1(%arg0: i32) -> (i32, i32, i32) {
    %c0_i32 = arith.constant 0 : i32
    %c0_i32_0 = arith.constant 0 : i32
    %c0_i32_1 = arith.constant 0 : i32
    %c0_i32_2 = arith.constant 0 : i32
    return %c0_i32, %c0_i32_0, %c0_i32_1 : i32, i32, i32
  }
  func.func @transform_2(%arg0: i32) -> (i32, i32, i32) {
    %c0_i32 = arith.constant 0 : i32
    %c0_i32_0 = arith.constant 0 : i32
    %c0_i32_1 = arith.constant 0 : i32
    %c0_i32_2 = arith.constant 0 : i32
    return %c0_i32, %c0_i32_0, %c0_i32_1 : i32, i32, i32
  }
  func.func @transform_3(%arg0: i32) -> (i32, i32, i32) {
    %c0_i32 = arith.constant 0 : i32
    %c0_i32_0 = arith.constant 0 : i32
    %c0_i32_1 = arith.constant 0 : i32
    %c0_i32_2 = arith.constant 0 : i32
    return %c0_i32, %c0_i32_0, %c0_i32_1 : i32, i32, i32
  }
  func.func @transform_4(%arg0: i32) -> (i32, i32) {
    %c0_i32 = arith.constant 0 : i32
    %c0_i32_0 = arith.constant 0 : i32
    %c0_i32_1 = arith.constant 0 : i32
    return %c0_i32, %c0_i32_0 : i32, i32
  }
  func.func @transform_5(%arg0: i32) -> (i32, i32) {
    %c0_i32 = arith.constant 0 : i32
    %c0_i32_0 = arith.constant 0 : i32
    %c0_i32_1 = arith.constant 0 : i32
    return %c0_i32, %c0_i32_0 : i32, i32
  }
  func.func @transform_6(%arg0: i32) -> (i32, i32) {
    %c0_i32 = arith.constant 0 : i32
    %c0_i32_0 = arith.constant 0 : i32
    %c0_i32_1 = arith.constant 0 : i32
    return %c0_i32, %c0_i32_0 : i32, i32
  }
  func.func @transform_7(%arg0: i32) -> (i32, i32) {
    %c0_i32 = arith.constant 0 : i32
    %c0_i32_0 = arith.constant 0 : i32
    %c0_i32_1 = arith.constant 0 : i32
    return %c0_i32, %c0_i32_0 : i32, i32
  }
  func.func @transform_8(%arg0: i32) -> (i32, i32) {
    %c0_i32 = arith.constant 0 : i32
    %c0_i32_0 = arith.constant 0 : i32
    %c0_i32_1 = arith.constant 0 : i32
    return %c0_i32, %c0_i32_0 : i32, i32
  }
  func.func @transform_9(%arg0: i32) -> (i32, i32) {
    %c0_i32 = arith.constant 0 : i32
    %c0_i32_0 = arith.constant 0 : i32
    %c0_i32_1 = arith.constant 0 : i32
    return %c0_i32, %c0_i32_0 : i32, i32
  }
}

</mosaic_0001>

<bundles_post_ra>
// kernel: nli_forward.5
= control target key start
LH: loop header
LB: loop body
LE: loop exit
PB: predicated region body
PF: predicated region fallthrough
CT: control target
= control target key end

     0   :  { %8 = vsyncpa [#allocation3], 0  ;;  %s406_s0 = inlined_call_operand.hbm [shape: bf16[32,16], index: 0, kind: input, shape index: {}]   ;;  %s407_s1 = inlined_call_operand.hbm [shape: bf16[16,256], index: 1, kind: input, shape index: {}]   ;;  %s408_s2 = inlined_call_operand.hbm [shape: f32[1,256], index: 2, kind: input, shape index: {}]   ;;  %s409_s3 = inlined_call_operand.hbm [shape: bf16[32,256], index: 3, kind: output, shape index: {}]  }
   0x1   :  { %9 = vsyncpa [#allocation6], 0 }
   0x2   :  { %10 = vsyncpa [#allocation4], 0  ;;  %s323_s12 = smov [#allocation5]   ;;  %s229_s16 = scalar_lea.hbm %s407_s1, 256 }
   0x3   :  { %s28_s13 = sshll.u32 %s323_s12, 4  ;;  %p230_p0 = scmp.ne.s32.totalorder %s407_s1, %s229_s16  ;;  %s29_s13 = int_to_ptr.vmem [resolvable:$true] %s28_s13 }
   0x4   :  { %p233_p1 = scmp.lt.u32.totalorder %s229_s16, %s407_s1 }
   0x6   :  { %p235_p2 = pnand %p233_p1, %p230_p0 }
   0x8   :  { %238 = shalt.err (!%p235_p2)
}
   0x9   :  { %s239_s21 = scalar_lea.vmem %s29_s13, 256  ;;  %p244_p4 = scmp.lt.s32.totalorder %s29_s13, %s29_s13 }
   0xa   :  { %p240_p3 = scmp.ne.s32.totalorder %s29_s13, %s239_s21  ;;  %p245_p5 = scmp.lt.s32.totalorder %s239_s21, %s239_s21 }
   0xc   :  { %p246_p6 = por %p245_p5, %p244_p4 }
   0xe   :  { %p247_p7 = pnand %p246_p6, %p240_p3 }
  0x10   :  { %250 = shalt.err (!%p247_p7)
}
  0x11   :  { %s324_s22 = smov 128   ;;  %s325_s23 = smov 8  }
  0x12   :  { %34 = dma.hbm_to_vmem [thread:$0]  %s407_s1, 256, %s29_s13, [#allocation6], %s324_s22, %s324_s22, %s325_s23  }
  0x13   :  { %s326_s26 = smov [#allocation2]   ;;  %s251_s30 = scalar_lea.hbm %s406_s0, 256 }
  0x14   :  { %s16_s27 = sshll.u32 %s326_s26, 4  ;;  %p252_p8 = scmp.ne.s32.totalorder %s406_s0, %s251_s30  ;;  %s17_s27 = int_to_ptr.vmem [resolvable:$true] %s16_s27 }
  0x15   :  { %p255_p9 = scmp.lt.u32.totalorder %s251_s30, %s406_s0 }
  0x17   :  { %p257_p10 = pnand %p255_p9, %p252_p8 }
  0x19   :  { %260 = shalt.err (!%p257_p10)
}
  0x1a   :  { %s261_s8 = scalar_lea.vmem %s17_s27, 256  ;;  %p266_p12 = scmp.lt.s32.totalorder %s17_s27, %s17_s27 }
  0x1b   :  { %p262_p11 = scmp.ne.s32.totalorder %s17_s27, %s261_s8  ;;  %p267_p13 = scmp.lt.s32.totalorder %s261_s8, %s261_s8 }
  0x1d   :  { %p268_p0 = por %p267_p13, %p266_p12 }
  0x1f   :  { %p269_p1 = pnand %p268_p0, %p262_p11 }
  0x21   :  { %272 = shalt.err (!%p269_p1)
}
  0x22   :  { %s327_s1 = smov 64   ;;  %s328_s9 = smov 4  }
  0x23   :  { %22 = dma.hbm_to_vmem [thread:$0]  %s406_s0, 256, %s17_s27, [#allocation3], %s327_s1, %s327_s1, %s328_s9  }
  0x24   :  { %s329_s12 = smov [#allocation7]   ;;  %s273_s16 = scalar_lea.hbm %s408_s2, 32 }
  0x25   :  { %s41_s13 = sshll.u32 %s329_s12, 4  ;;  %p274_p2 = scmp.ne.s32.totalorder %s408_s2, %s273_s16  ;;  %s42_s13 = int_to_ptr.vmem [resolvable:$true] %s41_s13 }
  0x26   :  { %p277_p3 = scmp.lt.u32.totalorder %s273_s16, %s408_s2 }
  0x28   :  { %p279_p4 = pnand %p277_p3, %p274_p2 }
  0x2a   :  { %282 = shalt.err (!%p279_p4)
}
  0x2b   :  { %s283_s21 = scalar_lea.vmem %s42_s13, 32  ;;  %p288_p6 = scmp.lt.s32.totalorder %s42_s13, %s42_s13 }
  0x2c   :  { %p284_p5 = scmp.ne.s32.totalorder %s42_s13, %s283_s21  ;;  %p289_p7 = scmp.lt.s32.totalorder %s283_s21, %s283_s21 }
  0x2e   :  { %p290_p8 = por %p289_p7, %p288_p6 }
  0x30   :  { %p291_p9 = pnand %p290_p8, %p284_p5 }
  0x32   :  { %294 = shalt.err (!%p291_p9)
}
  0x33   :  { %44 = dma.hbm_to_vmem [thread:$0]  %s408_s2, 32, %s42_s13, [#allocation6]  }
  0x34   :  { %317 = dma.done.wait [#allocation3], 256  }
  0x35   :  { %318 = vsyncadd [#allocation3], 4294967040 }
  0x36   :  { %319 = dma.done.wait [#allocation6], 288  }
  0x37   :  { %320 = vsyncadd [#allocation6], 4294967008  ;;  %v330_v0 = vmov 0   ;;  %v224_v1 = vld [vmem:[#allocation5 + $0x4] ss:$8 sps:$4 sm:$0xff]   ;;  %v227_v3 = vld [vmem:[#allocation2] sm:$0xff]   ;;  %v63_v5 = vlaneseq }
  0x38   :  { %132 = vmatprep.mubr.bf16.mxu0 %v330_v0  ;;  %142 = vmatprep.mubr.bf16.mxu1 %v330_v0  ;;  %v226_v2 = vld [vmem:[#allocation5] ss:$8 sps:$4 sm:$0xff]   ;;  %vm93_vm0 = vcmask 130048   ;;  %v228_v4 = vld [vmem:[#allocation2 + $0x8] sm:$0xff]   ;;  %v61_v8 = vld [vmem:[#allocation7] sm:$0x3] }
  0x39   :  { %100 = vmatprep.subr.bf16.mxu0 %v224_v1  ;;  %213 = vmatprep.subr.bf16.mxu1 %v224_v1  ;;  %v64_v6 = vshrl.u32 %v63_v5, 7  ;;  %s331_s2 = smov [#allocation8]  }
  0x3a   :  { %101 = vmatpush1.bf16.msra.mxu0 %v226_v2  ;;  %214 = vmatpush1.bf16.msra.mxu1 %v226_v2  ;;  %s186_s25 = sshll.u32 %s331_s2, 4  ;;  %s187_s25 = int_to_ptr.vmem [resolvable:$true] %s186_s25 }
  0x3b   :  { %v65_v7 = vsub.s32 0, %v64_v6  ;;  %v69_v9 = vsub.s32 1, %v64_v6  ;;  %s295_s26 = scalar_lea.vmem %s187_s25, 512  ;;  %p300_p11 = scmp.lt.s32.totalorder %s187_s25, %s187_s25 }
  0x3c   :  { %p296_p10 = scmp.ne.s32.totalorder %s187_s25, %s295_s26  ;;  %p301_p12 = scmp.lt.s32.totalorder %s295_s26, %s295_s26 }
  0x3d   :  { %203 = vmatmul.mubr.msk.bf16.vlgmr.msra.gmra.mrb[0].mxu0 %vm93_vm0, %v227_v3  ;;  %204 = vmatmul.mubr.msk.bf16.vlgmr.msra.gmra.mrb[0].mxu1 %vm93_vm0, %v228_v4  ;;  %v66_v10 = vrot.slane %v61_v8, %v65_v7  ;;  %v70_v11 = vrot.slane %v61_v8, %v69_v9 }
  0x3e   :  { %p302_p13 = por %p301_p12, %p300_p11 }
  0x40   :  { %p303_p0 = pnand %p302_p13, %p296_p10 }
 0x110   :  { %v134_v12 = vpop.f32.mrb[0].mxu0  ;;  %v144_v13 = vpop.f32.mrb[0].mxu1 }
 0x111   :  { %v135_v14 = vadd.f32 %v134_v12, %v66_v10  ;;  %v145_v15 = vadd.f32 %v144_v13, %v66_v10  ;;  %v136_v16 = vpop.f32.mrb[1].mxu0  ;;  %v146_v17 = vpop.f32.mrb[1].mxu1 }
 0x112   :  { %v137_v18 = vadd.f32 %v136_v16, %v70_v11  ;;  %v147_v19 = vadd.f32 %v146_v17, %v70_v11  ;;  %v138_v20 = vpop.f32.mrb[2].mxu0  ;;  %v148_v21 = vpop.f32.mrb[2].mxu1 }
 0x113   :  { %v139_v22 = vadd.f32 %v138_v20, %v66_v10  ;;  %v149_v23 = vadd.f32 %v148_v21, %v66_v10  ;;  %v140_v24 = vpop.f32.mrb[3].mxu0  ;;  %v150_v25 = vpop.f32.mrb[3].mxu1 }
 0x114   :  { %v209_v26 = vpack.c.bf16 %v137_v18, %v135_v14  ;;  %v211_v27 = vpack.c.bf16 %v147_v19, %v145_v15  ;;  %v141_v28 = vadd.f32 %v140_v24, %v70_v11  ;;  %v151_v29 = vadd.f32 %v150_v25, %v70_v11 }
 0x116   :  { %177 = vst [vmem:[#allocation8] sm:$0xff] %v209_v26  ;;  %179 = vst [vmem:[#allocation8 + $0x10] sm:$0xff] %v211_v27  ;;  %v210_v30 = vpack.c.bf16 %v141_v28, %v139_v22  ;;  %v212_v31 = vpack.c.bf16 %v151_v29, %v149_v23 }
 0x118   :  { %178 = vst [vmem:[#allocation8 + $0x8] sm:$0xff] %v210_v30  ;;  %180 = vst [vmem:[#allocation8 + $0x18] sm:$0xff] %v212_v31 }
 0x119   :  { %306 = shalt.err (!%p303_p0)
}
 0x11a   :  { %s307_s29 = scalar_lea.hbm %s409_s3, 512 }
 0x11b   :  { %p308_p1 = scmp.ne.s32.totalorder %s409_s3, %s307_s29  ;;  %p311_p2 = scmp.lt.u32.totalorder %s307_s29, %s409_s3 }
 0x11d   :  { %p313_p3 = pnand %p311_p2, %p308_p1 }
 0x11f   :  { %316 = shalt.err (!%p313_p3)
}
 0x120   :  { %192 = dma.vmem_to_hbm [thread:$0]  %s187_s25, 512, %s409_s3, [#allocation4], %s324_s22, %s324_s22, %s325_s23  }
 0x121   :  { %321 = dma.done.wait [#allocation4], 512  }
 0x122   :  { %322 = vsyncadd [#allocation4], 4294966784 }
 0x123   :  { %196 = vsyncpa [#allocation3], 1 }
 0x124   :  { %197 = vsyncpa [#allocation6], 1 }
 0x125   :  { %198 = vsyncpa [#allocation4], 1 }

// kernel: nli_forward.6
= control target key start
LH: loop header
LB: loop body
LE: loop exit
PB: predicated region body
PF: predicated region fallthrough
CT: control target
= control target key end

     0   :  { %s2138_s0 = inlined_call_operand.hbm [shape: bf16[8,2,2,256], index: 0, kind: input, shape index: {}, may-alias: {0,1}]   ;;  %s2139_s1 = inlined_call_operand.hbm [shape: bf16[8,2,2,256], index: 1, kind: input, shape index: {}, may-alias: {0,1}]   ;;  %s2140_s2 = inlined_call_operand.hbm [shape: s32[2,2,1], index: 2, kind: input, shape index: {}]   ;;  %s2141_s3 = inlined_call_operand.hbm [shape: bf16[32,128], index: 3, kind: input, shape index: {}]   ;;  %s2142_s4 = inlined_call_operand.hbm [shape: bf16[32,128], index: 4, kind: input, shape index: {}]   ;;  %s2143_s5 = inlined_call_operand.hbm [shape: bf16[8,2,2,32], index: 5, kind: output, shape index: {0}]   ;;  %s2144_s6 = inlined_call_operand.hbm [shape: bf16[8,2,2,32], index: 6, kind: output, shape index: {1}]  }
   0x1   :  { %2175 = sst [smem:[#allocation36_spill]] %s2138_s0 }
   0x2   :  { %2176 = sst [smem:[#allocation37_spill]] %s2140_s2 }
   0x3   :  { %2177 = sst [smem:[#allocation38_spill]] %s2141_s3 }
   0x4   :  { %2178 = sst [smem:[#allocation39_spill]] %s2143_s5 }
   0x5   :  { %2179 = sst [smem:[#allocation40_spill]] %s2144_s6 }
   0x6   :  { %12 = vsyncpa [#allocation7], 0 }
   0x7   :  { %14 = vsyncpa [#allocation7 + $0x1], 0 }
   0x8   :  { %15 = vsyncpa [#allocation10], 0 }
   0x9   :  { %17 = vsyncpa [#allocation10 + $0x1], 0 }
   0xa   :  { %18 = vsyncpa [#allocation13], 0 }
   0xb   :  { %19 = vsyncpa [#allocation8], 0 }
   0xc   :  { %21 = vsyncpa [#allocation8 + $0x1], 0 }
   0xd   :  { %22 = vsyncpa [#allocation17], 0 }
   0xe   :  { %24 = vsyncpa [#allocation17 + $0x1], 0  ;;  %s1542_s21 = smov 0   ;;  %s1544_s22 = smov 0  }
   0xf   :  { %s1546_s23 = smov 0   ;;  %s1548_s24 = smov 0  }
  0x10   :  { %s1550_s25 = smov 0   ;;  %s1552_s26 = smov 0  }
  0x11   :  { %s1554_s27 = smov 0   ;;  %s1556_s28 = smov 0  }
  0x12   :  { %s1558_s29 = smov 0   ;;  %s1560_s30 = smov 0  }
  0x13   :  { %s1562_s7 = smov 0   ;;  %s1564_s8 = smov 0  }
  0x14   :  { %s1566_s9 = smov 0   ;;  %s1568_s10 = smov 0  }
  0x15 LB: > { %2180 = sst [smem:[#allocation24_spill]] %s1436_s21  ;;  %s1613_s11 = sadd.s32 4294967295, %s1488_s10   ;;  %s1488_s10 = sphi %s1568_s10, %s30_s10   ;;  %s1484_s9 = sphi %s1566_s9, %s2264_s9   ;;  %s1480_s8 = sphi %s1564_s8, %s2263_s8   ;;  %s1476_s7 = sphi %s1562_s7, %s2262_s7   ;;  %s1472_s30 = sphi %s1560_s30, %s2261_s30   ;;  %s1468_s29 = sphi %s1558_s29, %s2260_s29   ;;  %s1464_s28 = sphi %s1556_s28, %s2259_s28   ;;  %s1460_s27 = sphi %s1554_s27, %s2258_s27   ;;  %s1456_s26 = sphi %s1552_s26, %s2248_s26   ;;  %s1452_s25 = sphi %s1550_s25, %s2257_s25   ;;  %s1448_s24 = sphi %s1548_s24, %s2256_s24   ;;  %s1444_s23 = sphi %s1546_s23, %s2255_s23   ;;  %s1440_s22 = sphi %s1544_s22, %s2254_s22   ;;  %s1436_s21 = sphi %s1542_s21, %s2253_s21  }
  0x16   : > { %2181 = sst [smem:[#allocation25_spill]] %s1448_s24  ;;  %p902_p0 = scmp.ge.s32.totalorder %s1488_s10, 1 }
  0x17   : > { %2182 = sst [smem:[#allocation26_spill]] %s1456_s26  ;;  %p2146_p1 = scmp.eq.s32.totalorder %s1613_s11, 0 }
  0x18   : > { %2183 = sst [smem:[#allocation27_spill]] %s1472_s30  ;;  %p231_p2 = scmp.lt.s32.totalorder %s1488_s10, 17 }
  0x19   : > { %2184 = sst [smem:[#allocation28_spill]] %s1476_s7  ;;  %s1490_s13 = smov [#allocation12]  }
  0x1a   : > { %p1618_p3 = pnand %p902_p0, %p231_p2  ;;  %s243_s14 = sshll.u32 %s1490_s13, 4  ;;  %s244_s14 = int_to_ptr.vmem [resolvable:$true] %s243_s14 }
  0x1b   : > { %s2188_s3 = sld [smem:[#allocation38_spill]] }
  0x1c   : > { %s2185_s12 = scalar_select %p1618_p3, 1, 0 }
  0x1d   : > { %p975_p4 = pneg %p1618_p3 }
  0x1e   : > { %2186 = sst [smem:[#allocation29_spill]] %s2185_s12 }
  0x1f   : > { %p1626_p5 = pnand %p975_p4, %p2146_p1 }
  0x21   : > { %s1151_s18 = scalar_lea.hbm %s2188_s3, 256  ;;  %p2167_p7 = pneg %p1626_p5 }
  0x22   : > { %p1152_p6 = scmp.ne.s32.totalorder %s2188_s3, %s1151_s18  ;;  %p1158_p10 = scmp.lt.u32.totalorder %s1151_s18, %s2188_s3 }
  0x24   : > { %p1154_p8 = pnand %p2167_p7, %p1152_p6 }
  0x26   : > { %p1155_p9 = pneg %p1154_p8 }
  0x28   : > { %p1160_p11 = pnand %p1158_p10, %p1155_p9 }
  0x2a   : > { %1163 = shalt.err (!%p1160_p11)
}
  0x2b   : > { %s1164_s16 = scalar_lea.vmem %s244_s14, 256  ;;  %p1172_p2 = scmp.lt.s32.totalorder %s244_s14, %s244_s14 }
  0x2c   : > { %p1165_p12 = scmp.ne.s32.totalorder %s244_s14, %s1164_s16  ;;  %p1173_p4 = scmp.lt.s32.totalorder %s1164_s16, %s1164_s16 }
  0x2e   : > { %p1167_p13 = pnand %p1165_p12, %p2167_p7  ;;  %p1174_p1 = por %p1173_p4, %p1172_p2 }
  0x30   : > { %p1168_p0 = pneg %p1167_p13 }
  0x32   : > { %p1175_p3 = pnand %p1174_p1, %p1168_p0 }
  0x34   : > { %1178 = shalt.err (!%p1175_p3)
}
  0x35   : > { %s2150_s17 = smov 64   ;;  %s2151_s6 = smov 4  }
  0x36   : > { %978 = dma.hbm_to_vmem [thread:$0]  (!%p1626_p5), %s2188_s3, 256, %s244_s14, [#allocation13], %s2150_s17, %s2150_s17, %s2151_s6  }
  0x37   : > { %s901_s20 = sadd.s32 4294967294, %s1488_s10   ;;  %s39_s13 = sadd.s32 1, %s1480_s8 }
  0x38   : > { %s42_s16 = sadd.s32 1, %s1484_s9  ;;  %p40_p1 = scmp.ge.s32.totalorder %s39_s13, 8 }
  0x39   : > { %p2166_p3 = scmp.eq.s32.totalorder %s1488_s10, 0  ;;  %s74_s5 = ssub.s32 7, %s1480_s8 }
  0x3a   : > { %s81_s7 = sadd.s32 1, %s1456_s26  ;;  %s2266_s13 = smov (%p40_p1, %s39_s13), 0 }
  0x3b   : > { %2189 = sst [smem:[#allocation30_spill]] %s2266_s13  ;;  %s2268_s16 = smov (!%p40_p1, %s42_s16), %s1484_s9 }
  0x3c   : > { %s46_s14 = ssub.s32 %s1480_s8, %s2266_s13  ;;  %s75_s18 = ssub.s32 7, %s2266_s13 }
  0x3d   : > { %p44_p6 = scmp.ge.s32.totalorder %s2268_s16, 2  ;;  %s76_s19 = ssub.s32 %s74_s5, %s75_s18 }
  0x3e   : > { %p88_p8 = scmp.ne.s32.totalorder %s1456_s26, %s1452_s25  ;;  %p94_p9 = scmp.ne.s32.totalorder %s1452_s25, %s1448_s24 }
  0x3f   : > { %s2270_s16 = smov (%p44_p6, %s2268_s16), 0  ;;  %p2192_p11 = scmp.eq.s32.totalorder %s1613_s11, 0 }
  0x40   : > { %2190 = sst [smem:[#allocation31_spill]] %s2270_s16  ;;  %p1678_p10 = por %p88_p8, %p2166_p3 }
  0x41   : > { %p1687_p12 = por %p94_p9, %p2192_p11  ;;  %s1693_s6 = ssub.s32 %s1484_s9, %s2270_s16 }
  0x42   : > { %p2165_p13 = scmp.eq.s32.totalorder %s1613_s11, 15  ;;  %s1697_s3 = sor.u32 %s1693_s6, %s46_s14 }
  0x43   : > { %s2193_s18 = scalar_select %p1687_p12, 1, 0 }
  0x44   : > { %s78_s13 = sor.u32 %s76_s19, %s1693_s6  ;;  %p1702_p1 = scmp.eq.s32.totalorder %s901_s20, 15 }
  0x45   : > { %2194 = sst [smem:[#allocation32_spill]] %s2193_s18  ;;  %p79_p2 = scmp.eq.s32.totalorder %s78_s13, 0 }
  0x46   : > { %s2195_s30 = scalar_select %p1702_p1, 1, 0 }
  0x47   : > { %s1707_s16 = scalar_select %p79_p2, %s1456_s26, %s81_s7  }
  0x48   : > { %p1714_p6 = por %p2165_p13, %p88_p8  ;;  %p1723_p11 = por %p1702_p1, %p94_p9 }
  0x49   : > { %2196 = sst [smem:[#allocation33_spill]] %s1707_s16  ;;  %p2164_p4 = scmp.lt.s32.totalorder %s1488_s10, 16 }
  0x4a   : > { %s2197_s14 = scalar_select %p1714_p6, 1, 0 }
  0x4b   : > { %s2199_s13 = scalar_select %p1723_p11, 1, 0 }
  0x4c   : > { %2198 = sst [smem:[#allocation34_spill]] %s2197_s14  ;;  %s906_s20 = sshll.u32 %s1484_s9, 1 }
  0x4d   : > { %2200 = sst [smem:[#allocation35_spill]] %s2199_s13  ;;  %s290_s19 = sand.u32 1, %s1488_s10  }
  0x4e   : > { %s292_s18 = sand.u32 1, %s1456_s26   ;;  %s910_s12 = sshll.u32 %s74_s5, 2 }
  0x4f   : > { %s293_s2 = scalar_lea.vmem [#allocation9], %s292_s18  ;;  %s777_s16 = sadd.s32 %s910_s12, %s906_s20 }
  0x50   : > { %s305_s7 = sshll.u32 %s293_s2, 4  ;;  %s911_s21 = sshll.u32 %s777_s16, 4  ;;  %s1733_s7 = int_to_ptr.vmem [resolvable:$true] %s305_s7 }
  0x51   : > { %p1739_p8 = pnand %p2164_p4, %p1678_p10  ;;  %s779_s26 = scalar_lea.hbm %s2139_s1, %s911_s21 }
  0x52   : > { %s1746_s5 = scalar_lea.hbm %s779_s26, 16  ;;  %s1748_s2 = scalar_lea.sflag [#allocation10], %s290_s19 }
  0x53   : > { %s1209_s12 = scalar_lea.hbm %s779_s26, 32  ;;  %p1181_p10 = pneg %p1739_p8 }
  0x54   : > { %p1180_p9 = scmp.ne.s32.totalorder %s1746_s5, %s1209_s12  ;;  %s1184_s18 = scalar_lea.hbm %s2139_s1, 512 }
  0x55   : > { %p1185_p13 = scmp.lt.u32.totalorder %s1746_s5, %s2139_s1  ;;  %p1186_p3 = scmp.lt.u32.totalorder %s1184_s18, %s1209_s12 }
  0x56   : > { %p1182_p2 = pnand %p1181_p10, %p1180_p9  ;;  %p1188_p7 = scmp.lt.u32.totalorder %s1209_s12, %s1746_s5 }
  0x57   : > { %p1187_p0 = por %p1186_p3, %p1185_p13 }
  0x58   : > { %p1183_p4 = pneg %p1182_p2 }
  0x59   : > { %p1189_p11 = por %p1188_p7, %p1187_p0 }
  0x5b   : > { %p1190_p6 = pnand %p1189_p11, %p1183_p4 }
  0x5d   : > { %1193 = shalt.err (!%p1190_p6)
}
  0x5e   : > { %s1194_s26 = scalar_lea.vmem %s1733_s7, 16  ;;  %s1493_s13 = smov [#allocation9]  }
  0x5f   : > { %p1195_p9 = scmp.ne.s32.totalorder %s1733_s7, %s1194_s26  ;;  %s1199_s19 = sshll.u32 %s1493_s13, 4  ;;  %s1200_s19 = int_to_ptr.vmem [resolvable:$false] %s1199_s19 }
  0x60   : > { %s1201_s17 = scalar_lea.vmem %s1200_s19, 32  ;;  %p1202_p1 = scmp.lt.s32.totalorder %s1733_s7, %s1200_s19 }
  0x61   : > { %p1197_p2 = pnand %p1195_p9, %p1181_p10  ;;  %p1203_p3 = scmp.lt.s32.totalorder %s1201_s17, %s1194_s26 }
  0x63   : > { %p1198_p12 = pneg %p1197_p2  ;;  %p1204_p13 = por %p1203_p3, %p1202_p1 }
  0x65   : > { %p1205_p7 = pnand %p1204_p13, %p1198_p12 }
  0x67   : > { %1208 = shalt.err (!%p1205_p7)
}
  0x68   : > { %988 = dma.hbm_to_vmem [thread:$0]  (!%p1739_p8), %s1746_s5, 16, %s1733_s7, %s1748_s2  }
  0x69   : > { %s1494_s12 = smov [#allocation14]   ;;  %s1210_s14 = scalar_lea.hbm %s2142_s4, 256 }
  0x6a   : > { %s256_s16 = sshll.u32 %s1494_s12, 4  ;;  %p1211_p0 = scmp.ne.s32.totalorder %s2142_s4, %s1210_s14  ;;  %s257_s16 = int_to_ptr.vmem [resolvable:$true] %s256_s16 }
  0x6b   : > { %p2202_p12 = pneg %p1626_p5  ;;  %p1217_p6 = scmp.lt.u32.totalorder %s1210_s14, %s2142_s4 }
  0x6d   : > { %p1213_p4 = pnand %p1211_p0, %p2202_p12 }
  0x6f   : > { %p1214_p1 = pneg %p1213_p4 }
  0x71   : > { %p1219_p11 = pnand %p1217_p6, %p1214_p1 }
  0x73   : > { %1222 = shalt.err (!%p1219_p11)
}
  0x74   : > { %s1223_s7 = scalar_lea.vmem %s257_s16, 256  ;;  %p2203_p10 = pmov %p2202_p12 }
  0x75   : > { %p1224_p8 = scmp.ne.s32.totalorder %s257_s16, %s1223_s7  ;;  %p1231_p3 = scmp.lt.s32.totalorder %s257_s16, %s257_s16 }
  0x76   : > { %p1232_p13 = scmp.lt.s32.totalorder %s1223_s7, %s1223_s7 }
  0x77   : > { %p1226_p9 = pnand %p1224_p8, %p2203_p10 }
  0x78   : > { %p1233_p7 = por %p1232_p13, %p1231_p3 }
  0x79   : > { %p1227_p2 = pneg %p1226_p9 }
  0x7b   : > { %p1234_p0 = pnand %p1233_p7, %p1227_p2 }
  0x7d   : > { %1237 = shalt.err (!%p1234_p0)
}
  0x7e   : > { %s2204_s5 = smov 4   ;;  %s2205_s17 = smov 64  }
  0x7f   : > { %981 = dma.hbm_to_vmem [thread:$0]  (!%p1626_p5), %s2142_s4, 256, %s257_s16, [#allocation13], %s2205_s17, %s2205_s17, %s2204_s5  }
  0x80   : > { %s51_s15 = sadd.s32 1, %s1468_s29  ;;  %p58_p12 = scmp.ne.s32.totalorder %s1468_s29, %s1464_s28 }
  0x81   : > { %p2206_p4 = scmp.eq.s32.totalorder %s1697_s3, 0  ;;  %p2207_p1 = scmp.eq.s32.totalorder %s1488_s10, 0 }
  0x82   : > { %p64_p11 = scmp.ne.s32.totalorder %s1464_s28, %s1460_s27  ;;  %p2208_p8 = scmp.eq.s32.totalorder %s1613_s11, 15 }
  0x83   : > { %s1804_s21 = scalar_select %p2206_p4, %s1468_s29, %s51_s15  }
  0x84   : > { %p60_p6 = por %p2207_p1, %p58_p12  ;;  %p1812_p10 = por %p2208_p8, %p58_p12 }
  0x85   : > { %s270_s13 = sand.u32 1, %s1468_s29   ;;  %p2210_p9 = scmp.eq.s32.totalorder %s1613_s11, 0 }
  0x86   : > { %s2209_s14 = scalar_select %p1812_p10, 1, 0 }
  0x87   : > { %p1819_p2 = por %p2210_p9, %p64_p11  ;;  %p2212_p5 = scmp.ne.s32.totalorder %s2195_s30, 0 }
  0x88   : > { %s907_s3 = sshll.u32 %s1480_s8, 2  ;;  %s273_s24 = scalar_lea.vmem [#allocation6], %s270_s13 }
  0x89   : > { %s2211_s19 = scalar_select %p1819_p2, 1, 0 }
  0x8a   : > { %p1825_p3 = por %p2212_p5, %p64_p11  ;;  %s283_s26 = sshll.u32 %s273_s24, 4  ;;  %s1832_s26 = int_to_ptr.vmem [resolvable:$true] %s283_s26 }
  0x8b   : > { %s279_s7 = sadd.s32 %s907_s3, %s906_s20  ;;  %p2214_p13 = scmp.lt.s32.totalorder %s1488_s10, 16 }
  0x8c   : > { %s2213_s16 = scalar_select %p1825_p3, 1, 0 }
  0x8d   : > { %s908_s5 = sshll.u32 %s279_s7, 4  ;;  %p1836_p7 = pnand %p2214_p13, %p60_p6 }
  0x8e   : > { %s2216_s0 = sld [smem:[#allocation36_spill]]  ;;  %s271_s20 = scalar_lea.sflag [#allocation7], %s270_s13 }
  0x8f   : > { %p1240_p12 = pneg %p1836_p7 }
  0x94   : > { %s1843_s30 = scalar_lea.hbm %s2216_s0, %s908_s5  ;;  %s1243_s7 = scalar_lea.hbm %s2216_s0, 512 }
  0x95   : > { %s1238_s15 = scalar_lea.hbm %s1843_s30, 16  ;;  %p1244_p6 = scmp.lt.u32.totalorder %s1843_s30, %s2216_s0 }
  0x96   : > { %p1239_p0 = scmp.ne.s32.totalorder %s1843_s30, %s1238_s15  ;;  %p1245_p11 = scmp.lt.u32.totalorder %s1243_s7, %s1238_s15 }
  0x97   : > { %p1247_p9 = scmp.lt.u32.totalorder %s1238_s15, %s1843_s30 }
  0x98   : > { %p1241_p4 = pnand %p1240_p12, %p1239_p0  ;;  %p1246_p8 = por %p1245_p11, %p1244_p6 }
  0x9a   : > { %p1242_p1 = pneg %p1241_p4  ;;  %p1248_p5 = por %p1247_p9, %p1246_p8 }
  0x9c   : > { %p1249_p13 = pnand %p1248_p5, %p1242_p1 }
  0x9e   : > { %1252 = shalt.err (!%p1249_p13)
}
  0x9f   : > { %s1253_s13 = scalar_lea.vmem %s1832_s26, 16  ;;  %s1495_s18 = smov [#allocation6]  }
  0xa0   : > { %p1254_p0 = scmp.ne.s32.totalorder %s1832_s26, %s1253_s13  ;;  %s1258_s3 = sshll.u32 %s1495_s18, 4  ;;  %s1259_s3 = int_to_ptr.vmem [resolvable:$false] %s1258_s3 }
  0xa1   : > { %s1260_s24 = scalar_lea.vmem %s1259_s3, 32  ;;  %p1261_p10 = scmp.lt.s32.totalorder %s1832_s26, %s1259_s3 }
  0xa2   : > { %p1256_p4 = pnand %p1254_p0, %p1240_p12  ;;  %p1262_p6 = scmp.lt.s32.totalorder %s1260_s24, %s1253_s13 }
  0xa4   : > { %p1257_p3 = pneg %p1256_p4  ;;  %p1263_p11 = por %p1262_p6, %p1261_p10 }
  0xa6   : > { %p1264_p8 = pnand %p1263_p11, %p1257_p3 }
  0xa8   : > { %1267 = shalt.err (!%p1264_p8)
}
  0xa9   : > { %s2217_s15 = sld [smem:[#allocation24_spill]]  ;;  %s107_s7 = sadd.s32 1, %s1444_s23 }
  0xaa   : > { %985 = dma.hbm_to_vmem [thread:$0]  (!%p1836_p7), %s1843_s30, 16, %s1832_s26, %s271_s20  }
  0xab   : > { %p114_p10 = scmp.ne.s32.totalorder %s1444_s23, %s1440_s22  ;;  %p2218_p3 = scmp.eq.s32.totalorder %s1693_s6, 0 }
  0xac   : > { %p2219_p12 = scmp.eq.s32.totalorder %s1488_s10, 0  ;;  %s314_s17 = sand.u32 1, %s1444_s23  }
  0xad   : > { %s1876_s12 = scalar_select %p2218_p3, %s1444_s23, %s107_s7  }
  0xae   : > { %p116_p1 = por %p114_p10, %p2219_p12  ;;  %s913_s5 = sshll.u32 %s1484_s9, 5 }
  0xaf   : > { %p120_p9 = scmp.ne.s32.totalorder %s1440_s22, %s2217_s15  ;;  %p2220_p5 = scmp.eq.s32.totalorder %s1613_s11, 0 }
  0xb0   : > { %s912_s18 = sshll.u32 %s314_s17, 1  ;;  %s2222_s0 = sld [smem:[#allocation37_spill]] }
  0xb1   : > { %p1886_p13 = por %p120_p9, %p2220_p5  ;;  %s316_s6 = scalar_lea.vmem [#allocation11], %s912_s18 }
  0xb2   : > { %s323_s30 = sshll.u32 %s316_s6, 4  ;;  %p2223_p7 = scmp.lt.s32.totalorder %s1488_s10, 16  ;;  %s324_s30 = int_to_ptr.vmem [resolvable:$true] %s323_s30 }
  0xb3   : > { %s2221_s13 = scalar_select %p1886_p13, 1, 0 }
  0xb4   : > { %p1897_p0 = pnand %p2223_p7, %p116_p1 }
  0xb6   : > { %s1893_s26 = scalar_lea.hbm %s2222_s0, %s913_s5  ;;  %p1270_p6 = pneg %p1897_p0 }
  0xb7   : > { %s1268_s15 = scalar_lea.hbm %s1893_s26, 32  ;;  %s1273_s5 = scalar_lea.hbm %s2222_s0, 64 }
  0xb8   : > { %p1269_p4 = scmp.ne.s32.totalorder %s1893_s26, %s1268_s15  ;;  %p1274_p10 = scmp.lt.u32.totalorder %s1893_s26, %s2222_s0 }
  0xb9   : > { %p1275_p3 = scmp.lt.u32.totalorder %s1273_s5, %s1268_s15  ;;  %p1277_p1 = scmp.lt.u32.totalorder %s1268_s15, %s1893_s26 }
  0xba   : > { %p1271_p11 = pnand %p1270_p6, %p1269_p4 }
  0xbb   : > { %p1276_p12 = por %p1275_p3, %p1274_p10 }
  0xbc   : > { %p1272_p8 = pneg %p1271_p11 }
  0xbd   : > { %p1278_p9 = por %p1277_p1, %p1276_p12 }
  0xbf   : > { %p1279_p5 = pnand %p1278_p9, %p1272_p8 }
  0xc1   : > { %1282 = shalt.err (!%p1279_p5)
}
  0xc2   : > { %s1283_s24 = scalar_lea.vmem %s324_s30, 32  ;;  %s1496_s6 = smov [#allocation11]  }
  0xc3   : > { %p1284_p7 = scmp.ne.s32.totalorder %s324_s30, %s1283_s24  ;;  %s1288_s7 = sshll.u32 %s1496_s6, 4  ;;  %s1289_s7 = int_to_ptr.vmem [resolvable:$false] %s1288_s7 }
  0xc4   : > { %s1290_s17 = scalar_lea.vmem %s1289_s7, 64  ;;  %p1291_p13 = scmp.lt.s32.totalorder %s324_s30, %s1289_s7 }
  0xc5   : > { %p1286_p4 = pnand %p1284_p7, %p1270_p6  ;;  %p1292_p2 = scmp.lt.s32.totalorder %s1290_s17, %s1283_s24 }
  0xc7   : > { %p1287_p11 = pneg %p1286_p4  ;;  %p1293_p3 = por %p1292_p2, %p1291_p13 }
  0xc9   : > { %p1294_p10 = pnand %p1293_p3, %p1287_p11 }
  0xcb   : > { %1297 = shalt.err (!%p1294_p10)
}
  0xcc   : > { %991 = dma.hbm_to_vmem [thread:$0]  (!%p1897_p0), %s1893_s26, 32, %s324_s30, %s1748_s2  }
  0xcd   : > { %s2225_s15 = sld [smem:[#allocation29_spill]] }
  0xd3   : > { %p2226_p8 = scmp.ne.s32.totalorder %s2225_s15, 0 }
  0xd4   : > { %s1926_s5 = sand.u32 (!%p2226_p8), 1, %s1464_s28   ;;  %p2227_p6 = scmp.ne.s32.totalorder (!%p2226_p8), %s2211_s19, 0 }
  0xd5   : > { %332 = sbr.rel (%p2226_p8) target bundleno = 1012 (0x3f4), region = 40  ;;  %s335_s18 = scalar_lea.sflag (!%p2226_p8), [#allocation7], %s1926_s5 }
  0xd6   : > { %s337_s3 = scalar_lea.vmem (!%p2226_p8), [#allocation6], %s1926_s5 }
  0xdc   : > { %1411 = dma.done.wait (%p2227_p6), %s335_s18, 16  }
  0xdd   : > { %1413 = vsyncadd (%p2227_p6), %s335_s18, 4294967280  ;;  %s2228_s20 = sld [smem:[#allocation32_spill]]  ;;  %s342_s2 = sand.u32 1, %s1613_s11  }
  0xde   : > { %s1936_s26 = sand.u32 1, %s1452_s25   ;;  %s343_s30 = scalar_lea.sflag [#allocation10], %s342_s2 }
  0xdf   : > { %s345_s24 = scalar_lea.vmem [#allocation9], %s1936_s26 }
  0xe3   : > { %p2229_p2 = scmp.ne.s32.totalorder %s2228_s20, 0 }
  0xe5   : > { %1415 = dma.done.wait (%p2229_p2), %s343_s30, 16  }
  0xe6   : > { %1417 = vsyncadd (%p2229_p2), %s343_s30, 4294967280  ;;  %s352_s6 = sand.u32 1, %s1440_s22   ;;  %p2230_p13 = scmp.ne.s32.totalorder %s2221_s13, 0 }
  0xe7   : > { %s1944_s7 = sshll.u32 %s352_s6, 1 }
  0xe8   : > { %s354_s19 = scalar_lea.vmem [#allocation11], %s1944_s7 }
  0xe9   : > { %1419 = dma.done.wait (%p2230_p13), %s343_s30, 32  }
  0xea   : > { %1421 = vsyncadd (%p2230_p13), %s343_s30, 4294967264  ;;  %p2231_p0 = scmp.eq.s32.totalorder %s1613_s11, 0 }
  0xec   : > { %1423 = dma.done.wait (%p2231_p0), [#allocation13], 512   ;;  %p2232_p12 = pmov %p2231_p0 }
  0xed   : > { %s395_s17 = scalar_lea.vmem [#allocation15], %s1926_s5  ;;  %s2174_s15 = scalar_lea.vmem [#allocation16], %s1936_s26 }
  0xee   : > { %1425 = vsyncadd (%p2232_p12), [#allocation13], 4294966784  ;;  %s2233_s18 = sld [smem:[#allocation27_spill]] }
  0xf4   : > { %p918_p1 = scmp.ne.s32.totalorder %s2233_s18, 0 }
  0xf5   : > { %vm409_vm0 = vcmask (!%p918_p1), 254976   ;;  %v1497_v0 = vmov (!%p918_p1), 0.0  }
  0xf6   : > { %408 = sbr.rel (%p918_p1) target bundleno = 253 (0xfd), region = 64  ;;  %410 = vst.msk [vmem:[#allocation2] sm:$0x3] (!%p918_p1), %vm409_vm0, %v1497_v0  ;;  %411 = vst.msk [vmem:[#allocation3] sm:$0x3] (!%p918_p1), %vm409_vm0, %v1497_v0 }
  0xf7   : > { %412 = vst.msk [vmem:[#allocation4] sm:$0x3] (!%p918_p1), %vm409_vm0, %v1497_v0  ;;  %413 = vst.msk [vmem:[#allocation5] sm:$0x3] (!%p918_p1), %vm409_vm0, %v1497_v0 }
  0xfd PF: > { %v1131_v1 = vld [vmem:[#allocation12] sm:$0xff]   ;;  %v1498_v2 = vmov 0.0   ;;  %v1132_v3 = vld [vmem:[#allocation14] sm:$0xff]   ;;  %v1133_v4 = vld [vmem:[#allocation12 + $0x8] sm:$0xff]   ;;  %vm1499_vm1 = vmmov 0   ;;  %vm440_vm2 = vcmask 261120   ;;  %v530_v58 = vlaneseq }
  0xfe   : > { %941 = vmatprep.subr.bf16.mxu0 %v1498_v2  ;;  %949 = vmatprep.subr.bf16.mxu1 %v1498_v2  ;;  %v1134_v5 = vld [vmem:[#allocation14 + $0x8] sm:$0xff]   ;;  %v1958_v6 = vld [vmem:[#allocation2] sm:$0x3]  ;;  %v1960_v7 = vld [vmem:[#allocation4] sm:$0x3]  ;;  %s1500_s11 = smov 32  }
  0xff   : > { %942 = vmatpush3.bf16.msra.mxu0 %v1131_v1  ;;  %945 = vmatprep.mubr.msk.bf16.mxu0 %vm1499_vm1, %v1498_v2  ;;  %v423_v8 = vpack.c.bf16 %v1958_v6, %v1958_v6  ;;  %v923_v9 = vld.sshfl [vmem:[#allocation3] sm:$0x3 pattern:$0x76325410]  ;;  %v561_v10 = vpack.c.bf16 %v1960_v7, %v1960_v7  ;;  %v420_v12 = vld [vmem:[%s337_s3] sm:$0x1] }
 0x100   : > { %950 = vmatpush3.bf16.msra.mxu1 %v1132_v3  ;;  %943 = vmatprep.subr.bf16.mxu0 %v1498_v2  ;;  %v928_v11 = vld.sshfl [vmem:[#allocation5] sm:$0x3 pattern:$0x76325410]  ;;  %v558_v13 = vld [vmem:[%s345_s24] sm:$0x1]  ;;  %v421_v14 = vunpack.c.l.bf16 %v420_v12 }
 0x101   : > { %951 = vmatprep.subr.bf16.mxu1 %v1498_v2  ;;  %953 = vmatprep.mubr.msk.bf16.mxu1 %vm1499_vm1, %v1498_v2  ;;  %v559_v15 = vunpack.c.l.bf16 %v558_v13  ;;  %s1501_s13 = smov 64   ;;  %s2234_s3 = sld [smem:[#allocation27_spill]]  ;;  %v1502_v40 = vmov 0   ;;  %v414_v50 = vld [vmem:[%s354_s19] sm:$0x3]  ;;  %v531_v60 = vshrl.u32 %v530_v58, 7 }
 0x102   : > { %501 = vrot.lane.b32.xlu1 %v923_v9, %s1500_s11  ;;  %1129 = vset.pattern.permute.xlu0 %v1502_v40  ;;  %v1503_v56 = vmov 1983009808   ;;  %s2235_s2 = sld [smem:[#allocation28_spill]]  ;;  %s1504_s30 = smov 96   ;;  %vm538_vm6 = vcmask 254976   ;;  %vm556_vm7 = vcmask 253952  }
 0x103   : > { %944 = vmatpush3.bf16.msra.mxu0 %v1133_v4  ;;  %1130 = vset.pattern.permute.xlu1 %v1502_v40  ;;  %v528_v57 = vunpack.c.l.s4 %v1503_v56  ;;  %s712_s18 = sshll.u32 %s395_s17, 4  ;;  %p2237_p5 = scmp.ne.s32.totalorder %s2209_s14, 0  ;;  %s2004_s18 = int_to_ptr.vmem [resolvable:$true] %s712_s18 }
 0x104   : > { %952 = vmatpush3.bf16.msra.mxu1 %v1134_v5 }
 0x105   : > { %v529_v59 = vunpack.c.0.s8 %v528_v57 }
 0x106   : > { %946 = vmatmul.mubr.msk.bf16.vlgmr.msra.gmra.mrb[0].mxu0 %vm440_vm2, %v423_v8  ;;  %638 = vrot.lane.b32.xlu1 %v928_v11, %s1500_s11 }
 0x107   : > { %954 = vmatmul.mubr.msk.bf16.vlgmr.msra.gmra.mrb[0].mxu1 %vm440_vm2, %v561_v10  ;;  %v415_v49 = vstv %s2234_s3  ;;  %s417_s20 = ssub.s32 7, %s2234_s3  ;;  %v532_v62 = vsub.s32 %v529_v59, %v531_v60  ;;  %s929_s24 = sshll.u32 %s2234_s3, 1 }
 0x108   : > { %vm416_vm3 = vcmp.gt.s32.totalorder %v414_v50, %v415_v49  ;;  %v418_v52 = vstv %s417_s20  ;;  %s708_s6 = sadd.s32 %s2235_s2, %s929_s24  ;;  %s931_s7 = sshll.u32 %s417_s20, 1 }
 0x109   : > { %v521_v53 = vsel %vm416_vm3, 1, %v1502_v40  ;;  %vm419_vm4 = vcmp.gt.s32.totalorder %v414_v50, %v418_v52  ;;  %s930_s19 = sshll.u32 %s708_s6, 4  ;;  %s2236_s20 = sld [smem:[#allocation39_spill]] }
 0x10a   : > { %v658_v55 = vsel %vm419_vm4, 1, %v1502_v40  ;;  %s2010_s24 = sshll.u32 %s2174_s15, 4  ;;  %s694_s6 = scalar_lea.sflag [#allocation8], %s1926_s5  ;;  %s2053_s24 = int_to_ptr.vmem [resolvable:$true] %s2010_s24 }
 0x174   : > { %v502_v41 = vpop.permute.xlu1 %501 }
 0x178   : > { %v639_v43 = vpop.permute.xlu1 %638 }
 0x1d9   : > { %v478_v16 = vpop.f32.mrb[0].mxu0 }
 0x1da   : > { %v484_v17 = vadd.f32 %v478_v16, %v421_v14  ;;  %v947_v18 = vpop.f32.mrb[1].mxu0  ;;  %v615_v19 = vpop.f32.mrb[0].mxu1  ;;  %v540_v14 = vld [vmem:[#allocation3] sm:$0x3] }
 0x1db   : > { %v621_v20 = vadd.f32 %v615_v19, %v559_v15  ;;  %v481_v21 = vpop.f32.mrb[2].mxu0  ;;  %v955_v22 = vpop.f32.mrb[1].mxu1 }
 0x1dc   : > { %1135 = vtanh.f32 %v484_v17  ;;  %v948_v23 = vpop.f32.mrb[3].mxu0  ;;  %v618_v24 = vpop.f32.mrb[2].mxu1  ;;  %v922_v28 = vmul.f32 -1.442695, %v484_v17 }
 0x1dd   : > { %v956_v25 = vpop.f32.mrb[3].mxu1  ;;  %1137 = vtanh.f32 %v621_v20  ;;  %v927_v29 = vmul.f32 -1.442695, %v621_v20 }
 0x1de   : > { %1139 = vpow2.f32 %v922_v28 }
 0x1df   : > { %1141 = vpow2.f32 %v927_v29 }
 0x1e6   : > { %v1136_v26 = vpop.eup %1135 }
 0x1e7   : > { %506 = vrot.lane.b32.xlu0 %v1136_v26, %s1501_s13  ;;  %v1138_v27 = vpop.eup %1137 }
 0x1e8   : > { %v1140_v30 = vpop.eup %1139 }
 0x1e9   : > { %v488_v31 = vadd.f32 1.0, %v1140_v30  ;;  %v1142_v32 = vpop.eup %1141 }
 0x1ea   : > { %v625_v33 = vadd.f32 1.0, %v1142_v32 }
 0x1eb   : > { %643 = vrot.lane.b32.xlu0 %v1138_v27, %s1501_s13  ;;  %1143 = vrcp.f32 %v488_v31 }
 0x1ec   : > { %1145 = vrcp.f32 %v625_v33 }
 0x1f5   : > { %v1144_v34 = vpop.eup %1143 }
 0x1f6   : > { %v1146_v37 = vpop.eup %1145  ;;  %v504_v42 = vmul.f32 %v1144_v34, %v502_v41 }
 0x1f7   : > { %v641_v46 = vmul.f32 %v1146_v37, %v639_v43 }
 0x259   : > { %v507_v35 = vpop.permute.xlu0 %506 }
 0x25a   : > { %v509_v36 = vmul.f32 %v1144_v34, %v507_v35 }
 0x25c   : > { %511 = vrot.lane.b32.xlu0 %v509_v36, %s1500_s11 }
 0x25d   : > { %v644_v38 = vpop.permute.xlu0 %643 }
 0x25e   : > { %v646_v39 = vmul.f32 %v1146_v37, %v644_v38 }
 0x260   : > { %648 = vrot.lane.b32.xlu1 %v646_v39, %s1500_s11 }
 0x2ce   : > { %v512_v44 = vpop.permute.xlu0 %511 }
 0x2cf   : > { %v514_v45 = vadd.f32 %v512_v44, %v504_v42 }
 0x2d1   : > { %1147 = vtanh.f32 %v514_v45  ;;  %v548_v3 = vrot.slane %v514_v45, %v532_v62 }
 0x2d2   : > { %v649_v47 = vpop.permute.xlu1 %648 }
 0x2d3   : > { %v651_v48 = vadd.f32 %v649_v47, %v641_v46 }
 0x2d5   : > { %1149 = vtanh.f32 %v651_v48  ;;  %v684_v5 = vrot.slane %v651_v48, %v532_v62 }
 0x2db   : > { %v1148_v51 = vpop.eup %1147 }
 0x2dc   : > { %517 = vrot.lane.b32.xlu0 %v1148_v51, %s1501_s13 }
 0x2df   : > { %v1150_v54 = vpop.eup %1149 }
 0x2e0   : > { %654 = vrot.lane.b32.xlu1 %v1150_v54, %s1501_s13  ;;  %523 = vperm.xlu0 %1129, %v521_v53   ;;  %s724_s13 = sadd.s32 %s2235_s2, %s931_s7  ;;  %s1298_s7 = scalar_lea.vmem %s2004_s18, 16 }
 0x2e1   : > { %s2006_s2 = sshll.u32 %s724_s13, 4  ;;  %p1299_p9 = scmp.ne.s32.totalorder %s2004_s18, %s1298_s7 }
 0x2e3   : > { %p1300_p7 = pnand %p1299_p9, %p2237_p5 }
 0x2e4   : > { %660 = vperm.xlu1 %1130, %v658_v55  }
 0x2e5   : > { %p1301_p4 = pneg %p1300_p7 }
 0x34e   : > { %v518_v61 = vpop.permute.xlu0 %517 }
 0x34f   : > { %v520_v63 = vmul.f32 %v1144_v34, %v518_v61 }
 0x351   : > { %v533_v0 = vrot.slane %v520_v63, %v532_v62 }
 0x352   : > { %v655_v1 = vpop.permute.xlu1 %654 }
 0x353   : > { %v657_v2 = vmul.f32 %v1146_v37, %v655_v1  ;;  %534 = vrot.lane.b32.xlu1 %v533_v0, %s1500_s11 }
 0x355   : > { %v670_v4 = vrot.slane %v657_v2, %v532_v62 }
 0x357   : > { %549 = vrot.lane.b32.xlu1 %v548_v3, %s1504_s30  ;;  %671 = vrot.lane.b32.xlu0 %v670_v4, %s1500_s11 }
 0x35b   : > { %685 = vrot.lane.b32.xlu0 %v684_v5, %s1504_s30  ;;  %s2002_s30 = scalar_lea.hbm %s2236_s20, %s930_s19  ;;  %s1505_s19 = smov [#allocation15]  }
 0x35c   : > { %s1302_s13 = sshll.u32 %s1505_s19, 4  ;;  %s1303_s13 = int_to_ptr.vmem [resolvable:$false] %s1302_s13 }
 0x35d   : > { %s1304_s11 = scalar_lea.vmem %s1303_s13, 32  ;;  %p1305_p11 = scmp.lt.s32.totalorder %s2004_s18, %s1303_s13 }
 0x35e   : > { %p1306_p3 = scmp.lt.s32.totalorder %s1304_s11, %s1298_s7 }
 0x35f   : > { %v524_v9 = vpop.permute.xlu0 %523 }
 0x360   : > { %vm525_vm5 = vcmp.eq.s32.totalorder %v524_v9, 1  ;;  %p1307_p10 = por %p1306_p3, %p1305_p11 }
 0x362   : > { %p1308_p8 = pnand %p1307_p10, %p1301_p4 }
 0x363   : > { %v1987_v8 = vpop.permute.xlu1 %660 }
 0x364   : > { %vm662_vm8 = vcmp.eq.s32.totalorder %v1987_v8, 1 }
 0x3c5   : > { %v535_v10 = vpop.permute.xlu1 %534 }
 0x3c6   : > { %v537_v11 = vsel %vm525_vm5, %v535_v10, %v1958_v6  ;;  %v554_v12 = vsel %vm525_vm5, %v535_v10, 0.0 }
 0x3c7   : > { %539 = vst.msk [vmem:[#allocation2] sm:$0x3] %vm538_vm6, %v537_v11  ;;  %v555_v13 = vpack.c.bf16 %v554_v12, %v554_v12 }
 0x3c9   : > { %v550_v6 = vpop.permute.xlu1 %549  ;;  %v672_v15 = vpop.permute.xlu0 %671  ;;  %557 = vst.msk [vmem:[%s395_s17] sm:$0x1] %vm556_vm7, %v555_v13 }
 0x3ca   : > { %v552_v16 = vsel %vm525_vm5, %v550_v6, %v540_v14  ;;  %v674_v17 = vsel %vm662_vm8, %v672_v15, %v1960_v7  ;;  %v690_v18 = vsel %vm662_vm8, %v672_v15, 0.0 }
 0x3cb   : > { %1311 = shalt.err (!%p1308_p8)
}
 0x3cc   : > { %s1312_s5 = scalar_lea.hbm %s2002_s30, 16  ;;  %s1316_s19 = scalar_lea.hbm %s2236_s20, 256 }
 0x3cd   : > { %p1313_p6 = scmp.ne.s32.totalorder %s2002_s30, %s1312_s5  ;;  %p1317_p0 = scmp.lt.u32.totalorder %s2002_s30, %s2236_s20 }
 0x3ce   : > { %p1318_p12 = scmp.lt.u32.totalorder %s1316_s19, %s1312_s5  ;;  %p1320_p9 = scmp.lt.u32.totalorder %s1312_s5, %s2002_s30 }
 0x3cf   : > { %p1314_p2 = pnand %p1313_p6, %p2237_p5 }
 0x3d0   : > { %p1319_p1 = por %p1318_p12, %p1317_p0 }
 0x3d1   : > { %p1315_p13 = pneg %p1314_p2 }
 0x3d2   : > { %p1321_p7 = por %p1320_p9, %p1319_p1 }
 0x3d4   : > { %p1322_p4 = pnand %p1321_p7, %p1315_p13 }
 0x3d6   : > { %1325 = shalt.err (!%p1322_p4)
}
 0x3d7   : > { %s2238_s7 = sld [smem:[#allocation34_spill]]  ;;  %553 = vst.msk [vmem:[#allocation3] sm:$0x3] %vm538_vm6, %v552_v16  ;;  %675 = vst.msk [vmem:[#allocation4] sm:$0x3] %vm538_vm6, %v674_v17  ;;  %v691_v7 = vpack.c.bf16 %v690_v18, %v690_v18  ;;  %s2239_s5 = sld [smem:[#allocation40_spill]]  ;;  %v686_v20 = vpop.permute.xlu0 %685 }
 0x3d8   : > { %971 = dma.vmem_to_hbm [thread:$0]  (%p2237_p5), %s2004_s18, 16, %s2002_s30, %s694_s6   ;;  %v676_v19 = vld [vmem:[#allocation5] sm:$0x3] }
 0x3d9   : > { %s2240_s14 = scalar_lea.vmem [#allocation16], %s1936_s26  ;;  %v688_v21 = vsel %vm662_vm8, %v686_v20, %v676_v19  ;;  %s698_s18 = scalar_lea.sflag [#allocation17], %s1936_s26 }
 0x3da   : > { %692 = vst.msk [vmem:[%s2240_s14] sm:$0x1] %vm556_vm7, %v691_v7  ;;  %s1326_s30 = scalar_lea.vmem %s2053_s24, 16 }
 0x3db   : > { %p1327_p5 = scmp.ne.s32.totalorder %s2053_s24, %s1326_s30 }
 0x3dd   : > { %s2050_s17 = scalar_lea.hbm %s2239_s5, %s2006_s2  ;;  %p2241_p11 = scmp.ne.s32.totalorder %s2238_s7, 0 }
 0x3de   : > { %s1506_s2 = smov [#allocation16]  }
 0x3df   : > { %p1328_p3 = pnand %p1327_p5, %p2241_p11  ;;  %s1330_s6 = sshll.u32 %s1506_s2, 4  ;;  %s1331_s6 = int_to_ptr.vmem [resolvable:$false] %s1330_s6 }
 0x3e0   : > { %s1332_s3 = scalar_lea.vmem %s1331_s6, 32  ;;  %p1333_p8 = scmp.lt.s32.totalorder %s2053_s24, %s1331_s6 }
 0x3e1   : > { %p1329_p10 = pneg %p1328_p3  ;;  %p1334_p6 = scmp.lt.s32.totalorder %s1332_s3, %s1326_s30 }
 0x3e3   : > { %p1335_p2 = por %p1334_p6, %p1333_p8 }
 0x3e5   : > { %p1336_p13 = pnand %p1335_p2, %p1329_p10 }
 0x3e7   : > { %1339 = shalt.err (!%p1336_p13)
}
 0x3e8   : > { %s1340_s26 = scalar_lea.hbm %s2050_s17, 16  ;;  %s1344_s15 = scalar_lea.hbm %s2239_s5, 256 }
 0x3e9   : > { %p1341_p0 = scmp.ne.s32.totalorder %s2050_s17, %s1340_s26  ;;  %p1345_p9 = scmp.lt.u32.totalorder %s2050_s17, %s2239_s5 }
 0x3ea   : > { %p1346_p7 = scmp.lt.u32.totalorder %s1344_s15, %s1340_s26  ;;  %p1348_p5 = scmp.lt.u32.totalorder %s1340_s26, %s2050_s17 }
 0x3eb   : > { %p1342_p12 = pnand %p1341_p0, %p2241_p11 }
 0x3ec   : > { %p1347_p4 = por %p1346_p7, %p1345_p9 }
 0x3ed   : > { %p1343_p1 = pneg %p1342_p12 }
 0x3ee   : > { %p1349_p3 = por %p1348_p5, %p1347_p4 }
 0x3f0   : > { %p1350_p10 = pnand %p1349_p3, %p1343_p1 }
 0x3f2   : > { %1353 = shalt.err (!%p1350_p10)
}
 0x3f3   : > { %972 = dma.vmem_to_hbm [thread:$0]  (%p2241_p11), %s2053_s24, 16, %s2050_s17, %s698_s18   ;;  %689 = vst.msk [vmem:[#allocation5] sm:$0x3] %vm538_vm6, %v688_v21 }
 0x3f4 PF: > { %p1004_p8 = scmp.ge.s32.totalorder %s1488_s10, 2  ;;  %s740_s30 = sand.u32 1, %s1460_s27  }
 0x3f5   : > { %p2242_p6 = scmp.ne.s32.totalorder %s2213_s16, 0  ;;  %s741_s2 = scalar_lea.sflag [#allocation8], %s740_s30 }
 0x3f7   : > { %p993_p2 = pnand %p1004_p8, %p2242_p6 }
 0x3f9   : > { %1427 = dma.done.wait (!%p993_p2), %s741_s2, 16  }
 0x3fa   : > { %1429 = vsyncadd (!%p993_p2), %s741_s2, 4294967280  ;;  %s2243_s6 = sld [smem:[#allocation25_spill]]  ;;  %s2244_s3 = sld [smem:[#allocation35_spill]] }
 0x400   : > { %s748_s26 = sand.u32 1, %s2243_s6   ;;  %p2245_p13 = scmp.ne.s32.totalorder %s2244_s3, 0 }
 0x401   : > { %s749_s7 = scalar_lea.sflag [#allocation17], %s748_s26 }
 0x402   : > { %p996_p0 = pnand %p1004_p8, %p2245_p13 }
 0x404   : > { %1431 = dma.done.wait (!%p996_p0), %s749_s7, 16  }
 0x405   : > { %1433 = vsyncadd (!%p996_p0), %s749_s7, 4294967280  ;;  %s30_s10 = sadd.s32 1, %s1488_s10   ;;  %s2247_s27 = sld [smem:[#allocation26_spill]] }
 0x406   : > { %p2091_p11 = scmp.ge.s32.totalorder %s30_s10, 18   ;;  %s2248_s26 = sld [smem:[#allocation33_spill]] }
 0x407   : > { %s2249_s16 = smov %s1804_s21  ;;  %s2250_s17 = sld [smem:[#allocation30_spill]] }
 0x408   : > { %s2251_s18 = sld [smem:[#allocation31_spill]]  ;;  %s2253_s21 = smov %s1440_s22 }
 0x409   : > { %s2254_s22 = smov %s1444_s23  ;;  %s2255_s23 = smov %s1876_s12 }
 0x40a   : > { %s2256_s24 = smov %s1452_s25  ;;  %s2261_s30 = smov %s1480_s8 }
 0x40b   : > { %s2257_s25 = smov %s2247_s27  ;;  %s2258_s27 = smov %s1464_s28 }
 0x40c   : > { %s2259_s28 = smov %s1468_s29  ;;  %s2260_s29 = smov %s2249_s16 }
 0x40d   : > { %s2262_s7 = smov %s1484_s9  ;;  %s2263_s8 = smov %s2250_s17 }
 0x40e   : > { %s2264_s9 = smov %s2251_s18  ;;  %29 = sbr.rel (!%p2091_p11) target bundleno = 21 (0x15), region = 138 }
 0x415   :  { %753 = vsyncpa [#allocation7], 1 }
 0x416   :  { %755 = vsyncpa [#allocation7 + $0x1], 1 }
 0x417   :  { %756 = vsyncpa [#allocation10], 1 }
 0x418   :  { %758 = vsyncpa [#allocation10 + $0x1], 1 }
 0x419   :  { %759 = vsyncpa [#allocation13], 1 }
 0x41a   :  { %760 = vsyncpa [#allocation8], 1 }
 0x41b   :  { %762 = vsyncpa [#allocation8 + $0x1], 1 }
 0x41c   :  { %763 = vsyncpa [#allocation17], 1 }
 0x41d   :  { %765 = vsyncpa [#allocation17 + $0x1], 1 }

// kernel: nli_forward.7
= control target key start
LH: loop header
LB: loop body
LE: loop exit
PB: predicated region body
PF: predicated region fallthrough
CT: control target
= control target key end

     0   :  { %s2577_s0 = inlined_call_operand.hbm [shape: bf16[2,8,64], index: 0, kind: input, shape index: {}]   ;;  %s2578_s1 = inlined_call_operand.hbm [shape: bf16[2,8,64], index: 1, kind: input, shape index: {}]   ;;  %s2579_s2 = inlined_call_operand.hbm [shape: f32[2,8,1], index: 2, kind: input, shape index: {}]   ;;  %s2580_s3 = inlined_call_operand.hbm [shape: f32[2,1,8], index: 3, kind: input, shape index: {}]   ;;  %s2581_s4 = inlined_call_operand.hbm [shape: bf16[64,256], index: 4, kind: input, shape index: {}]   ;;  %s2582_s5 = inlined_call_operand.hbm [shape: bf16[64,256], index: 5, kind: input, shape index: {}]   ;;  %s2583_s6 = inlined_call_operand.hbm [shape: bf16[64,256], index: 6, kind: input, shape index: {}]   ;;  %s2584_s7 = inlined_call_operand.hbm [shape: f32[1,256], index: 7, kind: input, shape index: {}]   ;;  %s2585_s8 = inlined_call_operand.hbm [shape: bf16[2,8,256], index: 8, kind: output, shape index: {0}]   ;;  %s2586_s9 = inlined_call_operand.hbm [shape: bf16[2,8,256], index: 9, kind: output, shape index: {1}]  }
   0x1   :  { %2610 = sst [smem:[#allocation32_spill]] %s2578_s1 }
   0x2   :  { %2611 = sst [smem:[#allocation33_spill]] %s2581_s4 }
   0x3   :  { %2612 = sst [smem:[#allocation34_spill]] %s2582_s5 }
   0x4   :  { %2613 = sst [smem:[#allocation35_spill]] %s2586_s9 }
   0x5   :  { %15 = vsyncpa [#allocation3], 0 }
   0x6   :  { %17 = vsyncpa [#allocation3 + $0x1], 0 }
   0x7   :  { %18 = vsyncpa [#allocation6], 0 }
   0x8   :  { %20 = vsyncpa [#allocation6 + $0x1], 0 }
   0x9   :  { %21 = vsyncpa [#allocation9], 0 }
   0xa   :  { %23 = vsyncpa [#allocation9 + $0x1], 0 }
   0xb   :  { %24 = vsyncpa [#allocation12], 0 }
   0xc   :  { %25 = vsyncpa [#allocation15], 0 }
   0xd   :  { %26 = vsyncpa [#allocation4], 0 }
   0xe   :  { %28 = vsyncpa [#allocation4 + $0x1], 0 }
   0xf   :  { %29 = vsyncpa [#allocation18], 0 }
  0x10   :  { %31 = vsyncpa [#allocation18 + $0x1], 0  ;;  %s2080_s30 = smov 0   ;;  %s2082_s10 = smov 0  }
  0x11   :  { %s2084_s11 = smov 0   ;;  %s2086_s12 = smov 0  }
  0x12 LB: > { %2614 = sst [smem:[#allocation27_spill]] %s2001_s30  ;;  %s2101_s13 = sadd.s32 4294967295, %s2013_s12   ;;  %s2013_s12 = sphi %s2086_s12, %s2656_s12   ;;  %s2009_s11 = sphi %s2084_s11, %s2658_s11   ;;  %s2005_s10 = sphi %s2082_s10, %s2660_s10   ;;  %s2001_s30 = sphi %s2080_s30, %s2659_s30  }
  0x13   : > { %2615 = sst [smem:[#allocation28_spill]] %s2009_s11  ;;  %s1410_s14 = sadd.s32 4294967294, %s2013_s12  }
  0x14   : > { %p57_p0 = scmp.ne.s32.totalorder %s2005_s10, %s2001_s30  ;;  %p2587_p1 = scmp.eq.s32.totalorder %s2101_s13, 0 }
  0x15   : > { %p249_p3 = scmp.eq.s32.totalorder %s1410_s14, 1  ;;  %p1411_p5 = scmp.ge.s32.totalorder %s2013_s12, 1 }
  0x16   : > { %p2110_p4 = por %p2587_p1, %p57_p0  ;;  %p282_p7 = scmp.lt.s32.totalorder %s2013_s12, 3 }
  0x17   : > { %p2115_p6 = por %p249_p3, %p57_p0  ;;  %s2015_s18 = smov [#allocation10]  }
  0x18   : > { %s2616_s15 = scalar_select %p2110_p4, 1, 0 }
  0x19   : > { %s2617_s16 = scalar_select %p2115_p6, 1, 0 }
  0x1a   : > { %p2120_p8 = pnand %p1411_p5, %p282_p7  ;;  %s294_s19 = sshll.u32 %s2015_s18, 4  ;;  %s2124_s19 = int_to_ptr.vmem [resolvable:$true] %s294_s19 }
  0x1b   : > { %2618 = sst [smem:[#allocation29_spill]] %s2617_s16  ;;  %s2016_s21 = smov [#allocation11]  }
  0x1c   : > { %s2619_s17 = scalar_select %p2120_p8, 1, 0 }
  0x1d   : > { %p1534_p9 = pneg %p2120_p8  ;;  %s307_s22 = sshll.u32 %s2016_s21, 4  ;;  %s2135_s22 = int_to_ptr.vmem [resolvable:$true] %s307_s22 }
  0x1e   : > { %s2621_s4 = sld [smem:[#allocation33_spill]] }
  0x1f   : > { %p2131_p11 = pnand %p1534_p9, %p2587_p1 }
  0x21   : > { %s2620_s20 = scalar_select %p2131_p11, 1, 0 }
  0x22   : > { %p2145_p13 = pneg %p2131_p11 }
  0x24   : > { %s1663_s25 = scalar_lea.hbm %s2621_s4, 1024 }
  0x25   : > { %p1664_p12 = scmp.ne.s32.totalorder %s2621_s4, %s1663_s25  ;;  %p1670_p5 = scmp.lt.u32.totalorder %s1663_s25, %s2621_s4 }
  0x26   : > { %s2622_s28 = scalar_select %p2145_p13, 1, 0 }
  0x27   : > { %p1666_p0 = pnand %p2145_p13, %p1664_p12 }
  0x29   : > { %p1667_p3 = pneg %p1666_p0 }
  0x2b   : > { %p1672_p7 = pnand %p1670_p5, %p1667_p3 }
  0x2d   : > { %1675 = shalt.err (!%p1672_p7)
}
  0x2e   : > { %s1676_s18 = scalar_lea.vmem %s2124_s19, 1024  ;;  %p1684_p2 = scmp.lt.s32.totalorder %s2124_s19, %s2124_s19 }
  0x2f   : > { %p1677_p9 = scmp.ne.s32.totalorder %s2124_s19, %s1676_s18  ;;  %p1685_p6 = scmp.lt.s32.totalorder %s1676_s18, %s1676_s18 }
  0x31   : > { %p1679_p10 = pnand %p1677_p9, %p2145_p13  ;;  %p1686_p12 = por %p1685_p6, %p1684_p2 }
  0x33   : > { %p1680_p1 = pneg %p1679_p10 }
  0x35   : > { %p1687_p0 = pnand %p1686_p12, %p1680_p1 }
  0x37   : > { %1690 = shalt.err (!%p1687_p0)
}
  0x38   : > { %s2590_s21 = smov 128   ;;  %s2591_s23 = smov 8  }
  0x39   : > { %1537 = dma.hbm_to_vmem [thread:$0]  (!%p2131_p11), %s2621_s4, 1024, %s2124_s19, [#allocation9], %s2590_s21, %s2590_s21, %s2591_s23  }
  0x3a   : > { %s2623_s5 = sld [smem:[#allocation34_spill]] }
  0x40   : > { %s1691_s29 = scalar_lea.hbm %s2623_s5, 1024 }
  0x41   : > { %p1692_p1 = scmp.ne.s32.totalorder %s2623_s5, %s1691_s29  ;;  %p1698_p10 = scmp.lt.u32.totalorder %s1691_s29, %s2623_s5 }
  0x43   : > { %p1694_p2 = pnand %p1692_p1, %p2145_p13 }
  0x45   : > { %p1695_p6 = pneg %p1694_p2 }
  0x47   : > { %p1700_p3 = pnand %p1698_p10, %p1695_p6 }
  0x49   : > { %1703 = shalt.err (!%p1700_p3)
}
  0x4a   : > { %s1704_s19 = scalar_lea.vmem %s2135_s22, 1024  ;;  %p1712_p12 = scmp.lt.s32.totalorder %s2135_s22, %s2135_s22 }
  0x4b   : > { %p1705_p5 = scmp.ne.s32.totalorder %s2135_s22, %s1704_s19  ;;  %p1713_p0 = scmp.lt.s32.totalorder %s1704_s19, %s1704_s19 }
  0x4d   : > { %p1707_p7 = pnand %p1705_p5, %p2145_p13  ;;  %p1714_p1 = por %p1713_p0, %p1712_p12 }
  0x4f   : > { %p1708_p9 = pneg %p1707_p7 }
  0x51   : > { %p1715_p2 = pnand %p1714_p1, %p1708_p9 }
  0x53   : > { %1718 = shalt.err (!%p1715_p2)
}
  0x54   : > { %1540 = dma.hbm_to_vmem [thread:$0]  (!%p2131_p11), %s2623_s5, 1024, %s2135_s22, [#allocation12], %s2590_s21, %s2590_s21, %s2591_s23  }
  0x55   : > { %s2196_s24 = sadd.s32 1, %s2013_s12   ;;  %s44_s25 = sadd.s32 1, %s2009_s11 }
  0x56   : > { %2624 = sst [smem:[#allocation30_spill]] %s2196_s24  ;;  %s41_s26 = ssub.s32 %s2013_s12, %s2196_s24 }
  0x57   : > { %p51_p6 = scmp.ne.s32.totalorder %s2009_s11, %s2005_s10  ;;  %p42_p10 = scmp.eq.s32.totalorder %s41_s26, 0 }
  0x58   : > { %p52_p3 = scmp.eq.s32.totalorder %s2013_s12, 0  ;;  %p2625_p5 = scmp.eq.s32.totalorder %s2101_s13, 1 }
  0x59   : > { %p1571_p9 = scmp.lt.s32.totalorder %s2013_s12, 2  ;;  %s2215_s22 = sand.u32 1, %s2009_s11  }
  0x5a   : > { %p2206_p7 = por %p2625_p5, %p51_p6  ;;  %p53_p12 = por %p52_p3, %p51_p6 }
  0x5b   : > { %s2212_s29 = scalar_select %p42_p10, %s2009_s11, %s44_s25  }
  0x5c   : > { %s2626_s27 = scalar_select %p2206_p7, 1, 0 }
  0x5d   : > { %2627 = sst [smem:[#allocation31_spill]] %s2212_s29  ;;  %s2592_s14 = sshll.u32 %s2215_s22, 2 }
  0x5e   : > { %s2593_s18 = sshll.u32 %s2013_s12, 6  ;;  %p2219_p0 = pnand %p1571_p9, %p53_p12 }
  0x5f   : > { %s2596_s30 = sand.u32 1, %s2013_s12   ;;  %s2629_s1 = sld [smem:[#allocation32_spill]] }
  0x60   : > { %s2628_s19 = scalar_select %p2219_p0, 1, 0 }
  0x61   : > { %s367_s25 = scalar_lea.vmem [#allocation5], %s2592_s14  ;;  %s2237_s4 = scalar_lea.sflag [#allocation6], %s2596_s30 }
  0x62   : > { %s374_s23 = sshll.u32 %s367_s25, 4  ;;  %p2243_p2 = pneg %p2219_p0  ;;  %s2233_s23 = int_to_ptr.vmem [resolvable:$true] %s374_s23 }
  0x64   : > { %s2630_s29 = scalar_select %p2243_p2, 1, 0 }
  0x65   : > { %s2229_s21 = scalar_lea.hbm %s2629_s1, %s2593_s18  ;;  %s1724_s25 = scalar_lea.hbm %s2629_s1, 128 }
  0x66   : > { %s1719_s5 = scalar_lea.hbm %s2229_s21, 64  ;;  %p1725_p3 = scmp.lt.u32.totalorder %s2229_s21, %s2629_s1 }
  0x67   : > { %p1720_p1 = scmp.ne.s32.totalorder %s2229_s21, %s1719_s5  ;;  %p1726_p5 = scmp.lt.u32.totalorder %s1724_s25, %s1719_s5 }
  0x68   : > { %p1728_p12 = scmp.lt.u32.totalorder %s1719_s5, %s2229_s21 }
  0x69   : > { %p1722_p6 = pnand %p2243_p2, %p1720_p1  ;;  %p1727_p9 = por %p1726_p5, %p1725_p3 }
  0x6b   : > { %p1723_p10 = pneg %p1722_p6  ;;  %p1729_p7 = por %p1728_p12, %p1727_p9 }
  0x6d   : > { %p1730_p4 = pnand %p1729_p7, %p1723_p10 }
  0x6f   : > { %1733 = shalt.err (!%p1730_p4)
}
  0x70   : > { %s1734_s30 = scalar_lea.vmem %s2233_s23, 64  ;;  %s2019_s16 = smov [#allocation5]  }
  0x71   : > { %p1735_p1 = scmp.ne.s32.totalorder %s2233_s23, %s1734_s30  ;;  %s1739_s26 = sshll.u32 %s2019_s16, 4  ;;  %s1740_s26 = int_to_ptr.vmem [resolvable:$false] %s1739_s26 }
  0x72   : > { %s1741_s14 = scalar_lea.vmem %s1740_s26, 128  ;;  %p1742_p11 = scmp.lt.s32.totalorder %s2233_s23, %s1740_s26 }
  0x73   : > { %p1737_p6 = pnand %p1735_p1, %p2243_p2  ;;  %p1743_p13 = scmp.lt.s32.totalorder %s1741_s14, %s1734_s30 }
  0x75   : > { %p1738_p8 = pneg %p1737_p6  ;;  %p1744_p3 = por %p1743_p13, %p1742_p11 }
  0x77   : > { %p1745_p5 = pnand %p1744_p3, %p1738_p8 }
  0x79   : > { %1748 = shalt.err (!%p1745_p5)
}
  0x7a   : > { %1553 = dma.hbm_to_vmem [thread:$0]  (!%p2219_p0), %s2229_s21, 64, %s2233_s23, %s2237_s4  }
  0x7b   : > { %s2020_s5 = smov [#allocation13]   ;;  %s2021_s25 = smov [#allocation14]  }
  0x7c   : > { %s320_s18 = sshll.u32 %s2020_s5, 4  ;;  %s334_s1 = sshll.u32 %s2021_s25, 4  ;;  %s321_s18 = int_to_ptr.vmem [resolvable:$true] %s320_s18  ;;  %s335_s1 = int_to_ptr.vmem [resolvable:$true] %s334_s1 }
  0x7d   : > { %s1749_s26 = scalar_lea.hbm %s2583_s6, 1024  ;;  %p2631_p8 = scmp.ne.s32.totalorder %s2622_s28, 0 }
  0x7e   : > { %p1750_p4 = scmp.ne.s32.totalorder %s2583_s6, %s1749_s26  ;;  %p1756_p7 = scmp.lt.u32.totalorder %s1749_s26, %s2583_s6 }
  0x80   : > { %p1752_p11 = pnand %p1750_p4, %p2631_p8 }
  0x82   : > { %p1753_p13 = pneg %p1752_p11 }
  0x84   : > { %p1758_p10 = pnand %p1756_p7, %p1753_p13 }
  0x86   : > { %1761 = shalt.err (!%p1758_p10)
}
  0x87   : > { %s1762_s21 = scalar_lea.vmem %s321_s18, 1024  ;;  %p1770_p6 = scmp.lt.s32.totalorder %s321_s18, %s321_s18 }
  0x88   : > { %p1763_p9 = scmp.ne.s32.totalorder %s321_s18, %s1762_s21  ;;  %p1771_p3 = scmp.lt.s32.totalorder %s1762_s21, %s1762_s21 }
  0x8a   : > { %p1765_p12 = pnand %p1763_p9, %p2631_p8  ;;  %p1772_p5 = por %p1771_p3, %p1770_p6 }
  0x8c   : > { %p1766_p1 = pneg %p1765_p12 }
  0x8e   : > { %p1773_p0 = pnand %p1772_p5, %p1766_p1 }
  0x90   : > { %1776 = shalt.err (!%p1773_p0)
}
  0x91   : > { %p2632_p4 = scmp.ne.s32.totalorder %s2620_s20, 0  ;;  %s2633_s11 = smov 8  }
  0x92   : > { %s2634_s23 = smov 128   ;;  %s1777_s16 = scalar_lea.hbm %s2584_s7, 32 }
  0x93   : > { %1543 = dma.hbm_to_vmem [thread:$0]  (!%p2632_p4), %s2583_s6, 1024, %s321_s18, [#allocation12], %s2634_s23, %s2634_s23, %s2633_s11  }
  0x94   : > { %p1778_p11 = scmp.ne.s32.totalorder %s2584_s7, %s1777_s16  ;;  %p1784_p7 = scmp.lt.u32.totalorder %s1777_s16, %s2584_s7 }
  0x96   : > { %p1780_p0 = pnand %p1778_p11, %p2631_p8 }
  0x98   : > { %p1781_p13 = pneg %p1780_p0 }
  0x9a   : > { %p1786_p10 = pnand %p1784_p7, %p1781_p13 }
  0x9c   : > { %1789 = shalt.err (!%p1786_p10)
}
  0x9d   : > { %s1790_s9 = scalar_lea.vmem %s335_s1, 32  ;;  %p1798_p6 = scmp.lt.s32.totalorder %s335_s1, %s335_s1 }
  0x9e   : > { %p1791_p9 = scmp.ne.s32.totalorder %s335_s1, %s1790_s9  ;;  %p1799_p3 = scmp.lt.s32.totalorder %s1790_s9, %s1790_s9 }
  0xa0   : > { %p1793_p12 = pnand %p1791_p9, %p2631_p8  ;;  %p1800_p5 = por %p1799_p3, %p1798_p6 }
  0xa2   : > { %p1794_p1 = pneg %p1793_p12 }
  0xa4   : > { %p1801_p2 = pnand %p1800_p5, %p1794_p1 }
  0xa6   : > { %1804 = shalt.err (!%p1801_p2)
}
  0xa7   : > { %1546 = dma.hbm_to_vmem [thread:$0]  (!%p2632_p4), %s2584_s7, 32, %s335_s1, [#allocation15]  }
  0xa8   : > { %s2635_s23 = sshll.u32 %s2013_s12, 6  ;;  %s2636_s25 = sshll.u32 %s2215_s22, 2 }
  0xa9   : > { %s2311_s5 = scalar_lea.hbm %s2577_s0, %s2635_s23  ;;  %s349_s20 = scalar_lea.vmem [#allocation2], %s2636_s25 }
  0xaa   : > { %s356_s16 = sshll.u32 %s349_s20, 4  ;;  %s1421_s26 = sshll.u32 %s2215_s22, 3  ;;  %s357_s16 = int_to_ptr.vmem [resolvable:$true] %s356_s16 }
  0xab   : > { %s346_s30 = scalar_lea.sflag [#allocation3], %s2215_s22  ;;  %s1805_s14 = scalar_lea.hbm %s2311_s5, 64 }
  0xac   : > { %p1806_p2 = scmp.ne.s32.totalorder %s2311_s5, %s1805_s14  ;;  %p2637_p8 = scmp.ne.s32.totalorder %s2630_s29, 0 }
  0xad   : > { %s1810_s9 = scalar_lea.hbm %s2577_s0, 128  ;;  %p1811_p0 = scmp.lt.u32.totalorder %s2311_s5, %s2577_s0 }
  0xae   : > { %p1808_p4 = pnand %p1806_p2, %p2637_p8  ;;  %p1812_p13 = scmp.lt.u32.totalorder %s1810_s9, %s1805_s14 }
  0xaf   : > { %p1814_p10 = scmp.lt.u32.totalorder %s1805_s14, %s2311_s5 }
  0xb0   : > { %p1809_p11 = pneg %p1808_p4  ;;  %p1813_p7 = por %p1812_p13, %p1811_p0 }
  0xb2   : > { %p1815_p9 = por %p1814_p10, %p1813_p7 }
  0xb4   : > { %p1816_p12 = pnand %p1815_p9, %p1809_p11 }
  0xb6   : > { %1819 = shalt.err (!%p1816_p12)
}
  0xb7   : > { %s1820_s23 = scalar_lea.vmem %s357_s16, 64  ;;  %s2022_s28 = smov [#allocation2]  }
  0xb8   : > { %p1821_p1 = scmp.ne.s32.totalorder %s357_s16, %s1820_s23  ;;  %s1825_s24 = sshll.u32 %s2022_s28, 4  ;;  %s1826_s24 = int_to_ptr.vmem [resolvable:$false] %s1825_s24 }
  0xb9   : > { %s1827_s25 = scalar_lea.vmem %s1826_s24, 128  ;;  %p1828_p5 = scmp.lt.s32.totalorder %s357_s16, %s1826_s24 }
  0xba   : > { %p1823_p6 = pnand %p1821_p1, %p2637_p8  ;;  %p1829_p2 = scmp.lt.s32.totalorder %s1827_s25, %s1820_s23 }
  0xbc   : > { %p1824_p3 = pneg %p1823_p6  ;;  %p1830_p4 = por %p1829_p2, %p1828_p5 }
  0xbe   : > { %p1831_p0 = pnand %p1830_p4, %p1824_p3 }
  0xc0   : > { %1834 = shalt.err (!%p1831_p0)
}
  0xc1   : > { %p2638_p13 = scmp.ne.s32.totalorder %s2628_s19, 0  ;;  %s1422_s20 = sshll.u32 %s2013_s12, 7 }
  0xc2   : > { %s385_s14 = scalar_lea.vmem [#allocation7], %s1421_s26  ;;  %s390_s18 = scalar_lea.hbm %s2579_s2, %s1422_s20 }
  0xc3   : > { %1550 = dma.hbm_to_vmem [thread:$0]  (!%p2638_p13), %s2311_s5, 64, %s357_s16, %s346_s30  }
  0xc4   : > { %s392_s1 = sshll.u32 %s385_s14, 4  ;;  %s1835_s11 = scalar_lea.hbm %s390_s18, 128  ;;  %s393_s1 = int_to_ptr.vmem [resolvable:$true] %s392_s1 }
  0xc5   : > { %p1836_p11 = scmp.ne.s32.totalorder %s390_s18, %s1835_s11  ;;  %s1840_s24 = scalar_lea.hbm %s2579_s2, 256 }
  0xc6   : > { %p1841_p9 = scmp.lt.u32.totalorder %s390_s18, %s2579_s2  ;;  %p1842_p12 = scmp.lt.u32.totalorder %s1840_s24, %s1835_s11 }
  0xc7   : > { %p1838_p7 = pnand %p1836_p11, %p2637_p8  ;;  %p1844_p6 = scmp.lt.u32.totalorder %s1835_s11, %s390_s18 }
  0xc8   : > { %p1843_p1 = por %p1842_p12, %p1841_p9 }
  0xc9   : > { %p1839_p10 = pneg %p1838_p7 }
  0xca   : > { %p1845_p3 = por %p1844_p6, %p1843_p1 }
  0xcc   : > { %p1846_p5 = pnand %p1845_p3, %p1839_p10 }
  0xce   : > { %1849 = shalt.err (!%p1846_p5)
}
  0xcf   : > { %s1850_s16 = scalar_lea.vmem %s393_s1, 128  ;;  %s2023_s26 = smov [#allocation7]  }
  0xd0   : > { %p1851_p2 = scmp.ne.s32.totalorder %s393_s1, %s1850_s16  ;;  %s1855_s30 = sshll.u32 %s2023_s26, 4  ;;  %s1856_s30 = int_to_ptr.vmem [resolvable:$false] %s1855_s30 }
  0xd1   : > { %s1857_s20 = scalar_lea.vmem %s1856_s30, 256  ;;  %p1858_p11 = scmp.lt.s32.totalorder %s393_s1, %s1856_s30 }
  0xd2   : > { %p1853_p4 = pnand %p1851_p2, %p2637_p8  ;;  %p1859_p7 = scmp.lt.s32.totalorder %s1857_s20, %s1850_s16 }
  0xd4   : > { %p1854_p0 = pneg %p1853_p4  ;;  %p1860_p13 = por %p1859_p7, %p1858_p11 }
  0xd6   : > { %p1861_p9 = pnand %p1860_p13, %p1854_p0 }
  0xd8   : > { %1864 = shalt.err (!%p1861_p9)
}
  0xd9   : > { %p2639_p12 = scmp.ne.s32.totalorder %s2628_s19, 0  ;;  %s1423_s14 = sshll.u32 %s2013_s12, 4 }
  0xda   : > { %s2357_s11 = scalar_lea.hbm %s2580_s3, %s1423_s14  ;;  %s402_s23 = scalar_lea.vmem [#allocation8], %s2215_s22 }
  0xdb   : > { %1556 = dma.hbm_to_vmem [thread:$0]  (!%p2639_p12), %s390_s18, 128, %s393_s1, %s2237_s4  }
  0xdc   : > { %s409_s28 = sshll.u32 %s402_s23, 4  ;;  %s2640_s24 = sand.u32 1, %s2013_s12   ;;  %s410_s28 = int_to_ptr.vmem [resolvable:$true] %s409_s28 }
  0xdd   : > { %s400_s25 = scalar_lea.sflag [#allocation9], %s2640_s24  ;;  %s1865_s5 = scalar_lea.hbm %s2357_s11, 16 }
  0xde   : > { %p1866_p13 = scmp.ne.s32.totalorder %s2357_s11, %s1865_s5  ;;  %s1870_s18 = scalar_lea.hbm %s2580_s3, 32 }
  0xdf   : > { %p1871_p6 = scmp.lt.u32.totalorder %s2357_s11, %s2580_s3  ;;  %p1872_p3 = scmp.lt.u32.totalorder %s1870_s18, %s1865_s5 }
  0xe0   : > { %p1868_p10 = pnand %p1866_p13, %p2637_p8  ;;  %p1874_p2 = scmp.lt.u32.totalorder %s1865_s5, %s2357_s11 }
  0xe1   : > { %p1873_p5 = por %p1872_p3, %p1871_p6 }
  0xe2   : > { %p1869_p1 = pneg %p1868_p10 }
  0xe3   : > { %p1875_p4 = por %p1874_p2, %p1873_p5 }
  0xe5   : > { %p1876_p0 = pnand %p1875_p4, %p1869_p1 }
  0xe7   : > { %1879 = shalt.err (!%p1876_p0)
}
  0xe8   : > { %s1880_s22 = scalar_lea.vmem %s410_s28, 16  ;;  %s2024_s30 = smov [#allocation8]  }
  0xe9   : > { %p1881_p11 = scmp.ne.s32.totalorder %s410_s28, %s1880_s22  ;;  %s1885_s20 = sshll.u32 %s2024_s30, 4  ;;  %s1886_s20 = int_to_ptr.vmem [resolvable:$false] %s1885_s20 }
  0xea   : > { %s1887_s14 = scalar_lea.vmem %s1886_s20, 32  ;;  %p1888_p13 = scmp.lt.s32.totalorder %s410_s28, %s1886_s20 }
  0xeb   : > { %p1883_p7 = pnand %p1881_p11, %p2637_p8  ;;  %p1889_p10 = scmp.lt.s32.totalorder %s1887_s14, %s1880_s22 }
  0xed   : > { %p1884_p9 = pneg %p1883_p7  ;;  %p1890_p12 = por %p1889_p10, %p1888_p13 }
  0xef   : > { %p1891_p3 = pnand %p1890_p12, %p1884_p9 }
  0xf1   : > { %1894 = shalt.err (!%p1891_p3)
}
  0xf2   : > { %p2641_p6 = scmp.ne.s32.totalorder %s2628_s19, 0  ;;  %p2642_p1 = scmp.ne.s32.totalorder %s2619_s17, 0 }
  0xf3   : > { %s2382_s29 = sand.u32 (!%p2642_p1), 1, %s2005_s10   ;;  %p2643_p8 = scmp.ne.s32.totalorder (!%p2642_p1), %s2616_s15, 0 }
  0xf4   : > { %1559 = dma.hbm_to_vmem [thread:$0]  (!%p2641_p6), %s2357_s11, 16, %s410_s28, %s400_s25  }
  0xf5   : > { %418 = sbr.rel (%p2642_p1) target bundleno = 1297 (0x511), region = 52  ;;  %s1425_s21 = sshll.u32 (!%p2642_p1), %s2382_s29, 2 }
  0xf6   : > { %s421_s9 = scalar_lea.sflag (!%p2642_p1), [#allocation3], %s2382_s29  ;;  %s2386_s23 = scalar_lea.vmem (!%p2642_p1), [#allocation2], %s1425_s21 }
  0xfc   : > { %1968 = dma.done.wait (%p2643_p8), %s421_s9, 64  }
  0xfd   : > { %1970 = vsyncadd (%p2643_p8), %s421_s9, 4294967232  ;;  %s429_s19 = sand.u32 1, %s2101_s13   ;;  %s433_s11 = scalar_lea.vmem [#allocation5], %s1425_s21 }
  0xfe   : > { %s430_s17 = scalar_lea.sflag [#allocation6], %s429_s19 }
  0xff   : > { %1972 = dma.done.wait (%p2643_p8), %s430_s17, 192  }
 0x100   : > { %1974 = vsyncadd (%p2643_p8), %s430_s17, 4294967104  ;;  %s2398_s28 = sshll.u32 %s2382_s29, 3  ;;  %s448_s25 = scalar_lea.sflag [#allocation9], %s429_s19 }
 0x101   : > { %s442_s24 = scalar_lea.vmem [#allocation7], %s2398_s28  ;;  %s450_s5 = scalar_lea.vmem [#allocation8], %s2382_s29 }
 0x102   : > { %1976 = dma.done.wait (%p2643_p8), %s448_s25, 16  }
 0x103   : > { %1978 = vsyncadd (%p2643_p8), %s448_s25, 4294967280  ;;  %p2644_p12 = scmp.eq.s32.totalorder %s2101_s13, 0 }
 0x105   : > { %1980 = dma.done.wait (%p2644_p12), [#allocation9], 1024   ;;  %p2645_p5 = pmov %p2644_p12 }
 0x107   : > { %1982 = vsyncadd (%p2645_p5), [#allocation9], 4294966272  ;;  %p2646_p2 = pmov %p2645_p5 }
 0x109   : > { %1984 = dma.done.wait (%p2646_p2), [#allocation12], 2048   ;;  %p2647_p4 = pmov %p2646_p2 }
 0x10a   : > { %p2648_p0 = pmov %p2646_p2 }
 0x10b   : > { %1986 = vsyncadd (%p2647_p4), [#allocation12], 4294965248 }
 0x10c   : > { %1988 = dma.done.wait (%p2648_p0), [#allocation15], 32   ;;  %p2649_p11 = pmov %p2648_p0 }
 0x10d   : > { %v2025_v0 = vmov 0.0   ;;  %vm2026_vm0 = vmmov 0   ;;  %v2027_v1 = vmov 0   ;;  %vm562_vm1 = vcmask 523264   ;;  %v2425_v2 = vld [vmem:[%s433_s11] sm:$0xf] }
 0x10e   : > { %1990 = vsyncadd (%p2649_p11), [#allocation15], 4294967264  ;;  %1488 = vmatprep.subr.bf16.mxu0 %v2025_v0  ;;  %1490 = vmatprep.mubr.msk.bf16.mxu0 %vm2026_vm0, %v2025_v0  ;;  %v523_v3 = vld [vmem:[%s442_s24] sm:$0xff]  ;;  %v567_v4 = vsel %vm562_vm1, %v2425_v2, 0  ;;  %v2430_v5 = vld [vmem:[%s2386_s23] sm:$0xf] }
 0x10f   : > { %1618 = vset.pattern.permute.xlu0 %v2027_v1  ;;  %1494 = vmatprep.subr.bf16.mxu1 %v2025_v0  ;;  %v1434_v6 = vld [vmem:[%s450_s5] ss:$0 sm:$0xff]  ;;  %vm611_vm3 = vcmask 64512   ;;  %vm645_vm4 = vcmask 1043456   ;;  %v1625_v39 = vld [vmem:[#allocation11] ss:$8 sps:$4 sm:$0xff]  }
 0x110   : > { %1496 = vmatprep.mubr.msk.bf16.mxu1 %vm2026_vm0, %v2025_v0  ;;  %527 = vperm.xlu0 %1618, %v523_v3   ;;  %v646_v34 = vsel %vm645_vm4, %v2425_v2, 0  ;;  %v1627_v40 = vld [vmem:[#allocation11 + $0x4] ss:$8 sps:$4 sm:$0xff]   ;;  %v1631_v42 = vld [vmem:[#allocation11 + $0x10] ss:$8 sps:$4 sm:$0xff]   ;;  %v708_v51 = vsel %vm645_vm4, %v2430_v5, 0 }
 0x111   : > { %1489 = vmatpush3.bf16.xpose.msra.mxu0 %v567_v4  ;;  %1495 = vmatpush3.bf16.msra.mxu1 %v646_v34  ;;  %v1633_v43 = vld [vmem:[#allocation11 + $0x14] ss:$8 sps:$4 sm:$0xff]   ;;  %v1637_v44 = vld [vmem:[#allocation11 + $0x20] ss:$8 sps:$4 sm:$0xff]   ;;  %v1639_v45 = vld [vmem:[#allocation11 + $0x24] ss:$8 sps:$4 sm:$0xff]  }
 0x112   : > { %1500 = vmatprep.subr.bf16.mxu1 %v2025_v0  ;;  %797 = vmatprep.subr.bf16.mxu0 %v1627_v40  ;;  %v1640_v46 = vld [vmem:[#allocation11 + $0x30] ss:$8 sps:$4 sm:$0xff]   ;;  %v1642_v47 = vld [vmem:[#allocation11 + $0x34] ss:$8 sps:$4 sm:$0xff]   ;;  %v2443_v53 = vld [vmem:[#allocation10 + $0x4] ss:$8 sps:$4 sm:$0xff]  }
 0x113   : > { %v2449_v55 = vld [vmem:[#allocation10] ss:$8 sps:$4 sm:$0xff]   ;;  %v2451_v56 = vld [vmem:[#allocation10 + $0x14] ss:$8 sps:$4 sm:$0xff]   ;;  %v2455_v57 = vld [vmem:[#allocation10 + $0x10] ss:$8 sps:$4 sm:$0xff]  }
 0x114   : > { %v2459_v58 = vld [vmem:[#allocation10 + $0x24] ss:$8 sps:$4 sm:$0xff]   ;;  %v2462_v59 = vld [vmem:[#allocation10 + $0x20] ss:$8 sps:$4 sm:$0xff]   ;;  %v2465_v60 = vld [vmem:[#allocation10 + $0x34] ss:$8 sps:$4 sm:$0xff]  }
 0x115   : > { %v2468_v61 = vld [vmem:[#allocation10 + $0x30] ss:$8 sps:$4 sm:$0xff]   ;;  %v1645_v62 = vld [vmem:[#allocation13 + $0x4] ss:$8 sps:$4 sm:$0xff]   ;;  %s1480_s15 = sshll.u32 %s2101_s13, 7  ;;  %s512_s4 = scalar_lea.vmem [#allocation16], %s2398_s28 }
 0x116   : > { %s1193_s1 = sshll.u32 %s512_s4, 4  ;;  %s2501_s26 = scalar_lea.hbm %s2585_s8, %s1480_s15  ;;  %s2503_s1 = int_to_ptr.vmem [resolvable:$true] %s1193_s1 }
 0x117   : > { %s1174_s22 = scalar_lea.sflag [#allocation4], %s2382_s29  ;;  %s1895_s30 = scalar_lea.vmem %s2503_s1, 128 }
 0x118   : > { %1491 = vmatmul.mubr.msk.bf16.vlgmr.msra.gmra.mrb[0].mxu0 %vm562_vm1, %v2430_v5  ;;  %p1896_p7 = scmp.ne.s32.totalorder %s2503_s1, %s1895_s30  ;;  %p2650_p9 = scmp.ne.s32.totalorder %s2626_s27, 0 }
 0x119   : > { %829 = vmatprep.mubr.bf16.mxu0 %v2027_v1  ;;  %798 = vmatpush1.bf16.msra.mxu0 %v1625_v39  ;;  %s2028_s20 = smov [#allocation16]  }
 0x11a   : > { %799 = vmatprep.subr.bf16.mxu0 %v1633_v43  ;;  %p1897_p13 = pnand %p1896_p7, %p2650_p9  ;;  %s1899_s14 = sshll.u32 %s2028_s20, 4  ;;  %s1900_s14 = int_to_ptr.vmem [resolvable:$false] %s1899_s14 }
 0x11b   : > { %s1901_s21 = scalar_lea.vmem %s1900_s14, 256  ;;  %p1902_p3 = scmp.lt.s32.totalorder %s2503_s1, %s1900_s14 }
 0x11c   : > { %p1898_p10 = pneg %p1897_p13  ;;  %p1903_p6 = scmp.lt.s32.totalorder %s1901_s21, %s1895_s30 }
 0x11d   : > { %800 = vmatpush1.bf16.msra.mxu0 %v1631_v42 }
 0x11e   : > { %801 = vmatprep.subr.bf16.mxu0 %v1639_v45  ;;  %p1904_p1 = por %p1903_p6, %p1902_p3 }
 0x120   : > { %p1905_p8 = pnand %p1904_p1, %p1898_p10 }
 0x121   : > { %802 = vmatpush1.bf16.msra.mxu0 %v1637_v44 }
 0x122   : > { %803 = vmatprep.subr.bf16.mxu0 %v1642_v47 }
 0x125   : > { %804 = vmatpush1.bf16.msra.mxu0 %v1640_v46 }
 0x126   : > { %962 = vmatprep.subr.bf16.mxu0 %v1645_v62 }
 0x18f   : > { %v528_v7 = vpop.permute.xlu0 %527 }
 0x190   : > { %v536_v8 = vmul.f32 %v1434_v6, %v528_v7  ;;  %v1648_v6 = vld [vmem:[#allocation13 + $0x14] ss:$8 sps:$4 sm:$0xff]  }
 0x192   : > { %vm609_vm2 = vcmp.lt.f32.partialorder %v536_v8, 1e-08 }
 0x1eb   : > { %v603_v9 = vpop.f32.mrb[0].mxu0 }
 0x1ec   : > { %v610_v10 = vsel %vm609_vm2, -1e-07, %v603_v9  ;;  %v1492_v11 = vpop.f32.mrb[1].mxu0  ;;  %v1646_v9 = vld [vmem:[#allocation13 + $0x10] ss:$8 sps:$4 sm:$0xff]  }
 0x1ed   : > { %v606_v12 = vpop.f32.mrb[2].mxu0  ;;  %v612_v13 = vsel %vm611_vm3, %v610_v10, -inf }
 0x1ee   : > { %613 = vmax.xlane.f32.xlu0 %v612_v13  ;;  %v1493_v14 = vpop.f32.mrb[3].mxu0  ;;  %v623_v15 = vrot.slane %v612_v13, 4  ;;  %v1649_v12 = vld [vmem:[#allocation13 + $0x20] ss:$8 sps:$4 sm:$0xff]  }
 0x1f0   : > { %v624_v16 = vmax.f32 %v612_v13, %v623_v15  ;;  %v750_v13 = vunpack.c.l.bf16 %v2430_v5  ;;  %v1654_v15 = vld [vmem:[#allocation13 + $0x34] ss:$8 sps:$4 sm:$0xff]  }
 0x1f2   : > { %v625_v17 = vrot.slane %v624_v16, 2 }
 0x1f4   : > { %v626_v18 = vmax.f32 %v624_v16, %v625_v17 }
 0x1f6   : > { %v627_v19 = vrot.slane %v626_v18, 1 }
 0x1f8   : > { %v628_v20 = vmax.f32 %v626_v18, %v627_v19  ;;  %v1652_v19 = vld [vmem:[#allocation13 + $0x30] ss:$8 sps:$4 sm:$0xff]  }
 0x1fa   : > { %v629_v21 = vsub.f32 %v610_v10, %v628_v20 }
 0x1fc   : > { %v630_v22 = vmul.f32 1.442695, %v629_v21 }
 0x1fe   : > { %1655 = vpow2.f32 %v630_v22 }
 0x208   : > { %v1656_v26 = vpop.eup %1655 }
 0x209   : > { %v632_v28 = vsel %vm611_vm3, %v1656_v26, 0.0 }
 0x20a   : > { %v633_v30 = vrot.slane %v632_v28, 4 }
 0x20c   : > { %v634_v31 = vadd.f32 %v633_v30, %v632_v28 }
 0x20e   : > { %v635_v32 = vrot.slane %v634_v31, 2 }
 0x210   : > { %v636_v33 = vadd.f32 %v635_v32, %v634_v31 }
 0x212   : > { %v637_v35 = vrot.slane %v636_v33, 1 }
 0x214   : > { %v638_v36 = vadd.f32 %v637_v35, %v636_v33  ;;  %v1006_v33 = vlaneseq }
 0x216   : > { %v1007_v34 = vshrl.u32 %v1006_v33, 7 }
 0x27b   : > { %v614_v23 = vpop.xlane.xlu0 %613 }
 0x27c   : > { %v615_v24 = vsub.f32 %v610_v10, %v614_v23  ;;  %v1651_v10 = vld [vmem:[#allocation13 + $0x24] ss:$8 sps:$4 sm:$0xff]  }
 0x27e   : > { %v616_v25 = vmul.f32 1.442695, %v615_v24 }
 0x280   : > { %1657 = vpow2.f32 %v616_v25 }
 0x281   : > { %1659 = vrcp.f32 %v638_v36 }
 0x28a   : > { %v1658_v27 = vpop.eup %1657 }
 0x28b   : > { %v618_v29 = vsel %vm611_vm3, %v1658_v27, 0.0  ;;  %v1660_v37 = vpop.eup %1659 }
 0x28c   : > { %619 = vadd.xlane.f32.xlu1 %v618_v29  ;;  %v640_v38 = vmul.f32 %v1660_v37, %v1656_v26 }
 0x28e   : > { %v688_v41 = vpack.c.bf16 %v640_v38, %v640_v38  ;;  %v1008_v38 = vsub.s32 0, %v1007_v34 }
 0x2b9   : > { %689 = vxpose.xlu1.c.b16.start.end [1/1] (short) (narrow) %v688_v41, 16 }
 0x319   : > { %v620_v48 = vpop.xlane.xlu1 %619 }
 0x31a   : > { %1661 = vrcp.f32 %v620_v48 }
 0x31f   : > { %v697_v54 = vpop.trf.xlu1 }
 0x324   : > { %v1662_v49 = vpop.eup %1661 }
 0x325   : > { %v622_v50 = vmul.f32 %v1662_v49, %v1658_v27 }
 0x327   : > { %v641_v52 = vpack.c.bf16 %v622_v50, %v622_v50 }
 0x329   : > { %1497 = vmatmul.mubr.msk.bf16.vlgmr.msra.gmra.mrb[0].mxu1 %vm611_vm3, %v641_v52 }
 0x32a   : > { %1501 = vmatpush3.bf16.msra.mxu1 %v708_v51  ;;  %1502 = vmatprep.mubr.msk.bf16.mxu1 %vm2026_vm0, %v2025_v0  ;;  %v1643_v0 = vld [vmem:[#allocation13] ss:$8 sps:$4 sm:$0xff]  }
 0x32b   : > { %878 = vmatprep.subr.bf16.mxu1 %v2443_v53 }
 0x331   : > { %1503 = vmatmul.mubr.msk.bf16.vlgmr.msra.gmra.mrb[4].mxu1 %vm611_vm3, %v697_v54 }
 0x332   : > { %879 = vmatpush1.bf16.msra.mxu1 %v2449_v55  ;;  %910 = vmatprep.mubr.bf16.mxu1 %v2027_v1 }
 0x333   : > { %880 = vmatprep.subr.bf16.mxu1 %v2451_v56 }
 0x336   : > { %881 = vmatpush1.bf16.msra.mxu1 %v2455_v57 }
 0x337   : > { %882 = vmatprep.subr.bf16.mxu1 %v2459_v58 }
 0x33a   : > { %883 = vmatpush1.bf16.msra.mxu1 %v2462_v59 }
 0x33b   : > { %884 = vmatprep.subr.bf16.mxu1 %v2465_v60 }
 0x33e   : > { %885 = vmatpush1.bf16.msra.mxu1 %v2468_v61 }
 0x33f   : > { %1034 = vmatprep.subr.bf16.mxu1 %v1627_v40  ;;  %v561_v40 = vld [vmem:[#allocation14] sm:$0x3] }
 0x340   : > { %v1009_v41 = vrot.slane %v561_v40, %v1008_v38 }
 0x341   : > { %1455 = vmatmul.mubr.msk.bf16.vlgmr.msra.gmra.mrb[8].mxu1 %vm562_vm1, %v2430_v5  ;;  %v1027_v5 = vunpack.c.l.bf16 %v2425_v2 }
 0x342   : > { %1035 = vmatpush1.bf16.msra.mxu1 %v1625_v39  ;;  %1066 = vmatprep.mubr.bf16.mxu1 %v2027_v1 }
 0x343   : > { %1036 = vmatprep.subr.bf16.mxu1 %v1633_v43 }
 0x346   : > { %1037 = vmatpush1.bf16.msra.mxu1 %v1631_v42 }
 0x347   : > { %1038 = vmatprep.subr.bf16.mxu1 %v1639_v45 }
 0x34a   : > { %1039 = vmatpush1.bf16.msra.mxu1 %v1637_v44 }
 0x34b   : > { %1040 = vmatprep.subr.bf16.mxu1 %v1642_v47 }
 0x34e   : > { %1041 = vmatpush1.bf16.msra.mxu1 %v1640_v46 }
 0x34f   : > { %1119 = vmatprep.subr.bf16.mxu1 %v1645_v62 }
 0x3fc   : > { %v682_v63 = vpop.f32.mrb[0].mxu1 }
 0x3fd   : > { %v753_v3 = vpack.c.bf16 %v682_v63, %v682_v63  ;;  %v1498_v4 = vpop.f32.mrb[1].mxu1  ;;  %v751_v20 = vmul.f32 %v750_v13, %v682_v63 }
 0x3fe   : > { %v685_v7 = vpop.f32.mrb[2].mxu1 }
 0x3ff   : > { %v1499_v8 = vpop.f32.mrb[3].mxu1  ;;  %1446 = vmatmul.mubr.msk.bf16.vlgmr.msra.gmra.mrb[4].mxu0 %vm562_vm1, %v753_v3  ;;  %v752_v21 = vpack.c.bf16 %v751_v20, %v751_v20 }
 0x400   : > { %963 = vmatpush1.bf16.msra.mxu0 %v1643_v0  ;;  %994 = vmatprep.mubr.bf16.mxu0 %v2027_v1 }
 0x401   : > { %964 = vmatprep.subr.bf16.mxu0 %v1648_v6 }
 0x404   : > { %965 = vmatpush1.bf16.msra.mxu0 %v1646_v9  ;;  %v744_v11 = vpop.f32.mrb[4].mxu1 }
 0x405   : > { %v1030_v14 = vpack.c.bf16 %v744_v11, %v744_v11  ;;  %966 = vmatprep.subr.bf16.mxu0 %v1651_v10  ;;  %v1504_v16 = vpop.f32.mrb[5].mxu1  ;;  %v1028_v22 = vmul.f32 %v1027_v5, %v744_v11 }
 0x406   : > { %v747_v17 = vpop.f32.mrb[6].mxu1 }
 0x407   : > { %1466 = vmatmul.mubr.msk.bf16.vlgmr.msra.gmra.mrb[12].mxu1 %vm562_vm1, %v1030_v14  ;;  %v1505_v18 = vpop.f32.mrb[7].mxu1  ;;  %v1029_v24 = vpack.c.bf16 %v1028_v22, %v1028_v22 }
 0x408   : > { %967 = vmatpush1.bf16.msra.mxu0 %v1649_v12  ;;  %1120 = vmatpush1.bf16.msra.mxu1 %v1643_v0 }
 0x409   : > { %968 = vmatprep.subr.bf16.mxu0 %v1654_v15  ;;  %1121 = vmatprep.subr.bf16.mxu1 %v1648_v6 }
 0x40a   : > { %1151 = vmatprep.mubr.bf16.mxu1 %v2027_v1 }
 0x40c   : > { %969 = vmatpush1.bf16.msra.mxu0 %v1652_v19  ;;  %1122 = vmatpush1.bf16.msra.mxu1 %v1646_v9 }
 0x40d   : > { %1075 = vmatprep.subr.bf16.mxu0 %v2443_v53  ;;  %1123 = vmatprep.subr.bf16.mxu1 %v1651_v10 }
 0x40f   : > { %1464 = vmatmul.mubr.msk.bf16.vlgmr.msra.gmra.mrb[8].mxu0 %vm562_vm1, %v752_v21 }
 0x410   : > { %1076 = vmatpush1.bf16.msra.mxu0 %v2449_v55  ;;  %1124 = vmatpush1.bf16.msra.mxu1 %v1649_v12 }
 0x411   : > { %1077 = vmatprep.subr.bf16.mxu0 %v2451_v56  ;;  %1125 = vmatprep.subr.bf16.mxu1 %v1654_v15 }
 0x412   : > { %1107 = vmatprep.mubr.bf16.mxu0 %v2027_v1 }
 0x414   : > { %1078 = vmatpush1.bf16.msra.mxu0 %v2455_v57  ;;  %1126 = vmatpush1.bf16.msra.mxu1 %v1652_v19  ;;  %v912_v23 = vpop.f32.mrb[8].mxu1 }
 0x415   : > { %1079 = vmatprep.subr.bf16.mxu0 %v2459_v58  ;;  %v914_v25 = vpop.f32.mrb[9].mxu1 }
 0x416   : > { %v916_v1 = vpop.f32.mrb[10].mxu1 }
 0x417   : > { %1468 = vmatmul.mubr.msk.bf16.vlgmr.msra.gmra.mrb[16].mxu1 %vm562_vm1, %v1029_v24  ;;  %v917_v26 = vpop.f32.mrb[11].mxu1 }
 0x418   : > { %1080 = vmatpush1.bf16.msra.mxu0 %v2462_v59 }
 0x419   : > { %1081 = vmatprep.subr.bf16.mxu0 %v2465_v60 }
 0x41c   : > { %1082 = vmatpush1.bf16.msra.mxu0 %v2468_v61 }
 0x41f   : > { %1467 = vmatmul.mubr.msk.bf16.vlgmr.msra.gmra.mrb[12].mxu0 %vm562_vm1, %v2425_v2  ;;  %v1012_v2 = vsub.s32 1, %v1007_v34 }
 0x421   : > { %v1013_v43 = vrot.slane %v561_v40, %v1012_v2 }
 0x4d2   : > { %v831_v27 = vpop.f32.mrb[4].mxu0 }
 0x4d3   : > { %v913_v28 = vadd.f32 %v912_v23, %v831_v27  ;;  %v833_v29 = vpop.f32.mrb[5].mxu0 }
 0x4d4   : > { %v915_v30 = vadd.f32 %v914_v25, %v833_v29  ;;  %v835_v31 = vpop.f32.mrb[6].mxu0 }
 0x4d5   : > { %v836_v32 = vpop.f32.mrb[7].mxu0 }
 0x4da   : > { %v1068_v35 = vpop.f32.mrb[12].mxu1 }
 0x4db   : > { %v1070_v36 = vpop.f32.mrb[13].mxu1 }
 0x4dc   : > { %v1072_v37 = vpop.f32.mrb[14].mxu1 }
 0x4dd   : > { %v1073_v39 = vpop.f32.mrb[15].mxu1 }
 0x4e2   : > { %v996_v42 = vpop.f32.mrb[8].mxu0 }
 0x4e3   : > { %v1003_v44 = vadd.f32 %v996_v42, %v913_v28  ;;  %v998_v45 = vpop.f32.mrb[9].mxu0 }
 0x4e4   : > { %v1004_v46 = vadd.f32 %v998_v45, %v915_v30  ;;  %v1000_v47 = vpop.f32.mrb[10].mxu0 }
 0x4e5   : > { %v1016_v48 = vadd.f32 %v1009_v41, %v1003_v44  ;;  %v1001_v49 = vpop.f32.mrb[11].mxu0 }
 0x4e6   : > { %v1017_v50 = vadd.f32 %v1013_v43, %v1004_v46 }
 0x4e8   : > { %v1478_v51 = vpack.c.bf16 %v1017_v50, %v1016_v48 }
 0x4ea   : > { %v1153_v52 = vpop.f32.mrb[16].mxu1  ;;  %1026 = vst [vmem:[%s512_s4] sm:$0xff] %v1478_v51 }
 0x4eb   : > { %v1155_v53 = vpop.f32.mrb[17].mxu1 }
 0x4ec   : > { %1908 = shalt.err (!%p1905_p8)
}
 0x4ed   : > { %s1909_s9 = scalar_lea.hbm %s2501_s26, 128  ;;  %s1913_s17 = scalar_lea.hbm %s2585_s8, 256 }
 0x4ee   : > { %p1910_p12 = scmp.ne.s32.totalorder %s2501_s26, %s1909_s9  ;;  %p1914_p4 = scmp.lt.u32.totalorder %s2501_s26, %s2585_s8 }
 0x4ef   : > { %p1915_p0 = scmp.lt.u32.totalorder %s1913_s17, %s1909_s9  ;;  %p1917_p7 = scmp.lt.u32.totalorder %s1909_s9, %s2501_s26 }
 0x4f0   : > { %p1911_p5 = pnand %p1910_p12, %p2650_p9 }
 0x4f1   : > { %p1916_p11 = por %p1915_p0, %p1914_p4 }
 0x4f2   : > { %p1912_p2 = pneg %p1911_p5 }
 0x4f3   : > { %p1918_p13 = por %p1917_p7, %p1916_p11 }
 0x4f5   : > { %p1919_p10 = pnand %p1918_p13, %p1912_p2 }
 0x4f7   : > { %1922 = shalt.err (!%p1919_p10)
}
 0x4f8   : > { %1530 = dma.vmem_to_hbm [thread:$0]  (%p2650_p9), %s2503_s1, 128, %s2501_s26, %s1174_s22   ;;  %v1157_v54 = vpop.f32.mrb[18].mxu1  ;;  %v1109_v56 = vpop.f32.mrb[12].mxu0 }
 0x4f9   : > { %v1158_v55 = vpop.f32.mrb[19].mxu1  ;;  %v1110_v57 = vadd.f32 %v1109_v56, %v1068_v35  ;;  %v1111_v58 = vpop.f32.mrb[13].mxu0  ;;  %s519_s25 = scalar_lea.vmem [#allocation17], %s2398_s28  ;;  %s2651_s18 = sld [smem:[#allocation35_spill]] }
 0x4fa   : > { %v1112_v59 = vadd.f32 %v1111_v58, %v1070_v36  ;;  %v1113_v60 = vpop.f32.mrb[14].mxu0  ;;  %s1207_s5 = sshll.u32 %s519_s25, 4  ;;  %s1179_s26 = scalar_lea.sflag [#allocation18], %s2382_s29  ;;  %s2535_s5 = int_to_ptr.vmem [resolvable:$true] %s1207_s5 }
 0x4fb   : > { %v1160_v61 = vadd.f32 %v1153_v52, %v1110_v57  ;;  %v1114_v62 = vpop.f32.mrb[15].mxu0  ;;  %s1923_s22 = scalar_lea.vmem %s2535_s5, 128  ;;  %s2029_s28 = smov [#allocation17]  }
 0x4fc   : > { %v1161_v63 = vadd.f32 %v1155_v53, %v1112_v59  ;;  %p1924_p3 = scmp.ne.s32.totalorder %s2535_s5, %s1923_s22  ;;  %s1927_s30 = sshll.u32 %s2029_s28, 4  ;;  %s1928_s30 = int_to_ptr.vmem [resolvable:$false] %s1927_s30 }
 0x4fd   : > { %v1162_v0 = vadd.f32 %v1160_v61, %v1009_v41  ;;  %s1929_s13 = scalar_lea.vmem %s1928_s30, 256  ;;  %p1930_p8 = scmp.lt.s32.totalorder %s2535_s5, %s1928_s30 }
 0x4fe   : > { %v1163_v3 = vadd.f32 %v1161_v63, %v1013_v43  ;;  %p1925_p6 = pnand %p1924_p3, %p2650_p9  ;;  %p1931_p12 = scmp.lt.s32.totalorder %s1929_s13, %s1923_s22 }
 0x4ff   : > { %s2533_s16 = scalar_lea.hbm %s2651_s18, %s1480_s15 }
 0x500   : > { %v1479_v4 = vpack.c.bf16 %v1163_v3, %v1162_v0  ;;  %p1926_p1 = pneg %p1925_p6  ;;  %p1932_p5 = por %p1931_p12, %p1930_p8 }
 0x502   : > { %1172 = vst [vmem:[%s519_s25] sm:$0xff] %v1479_v4  ;;  %p1933_p2 = pnand %p1932_p5, %p1926_p1 }
 0x504   : > { %1936 = shalt.err (!%p1933_p2)
}
 0x505   : > { %s1937_s29 = scalar_lea.hbm %s2533_s16, 128  ;;  %s1941_s14 = scalar_lea.hbm %s2651_s18, 256 }
 0x506   : > { %p1938_p4 = scmp.ne.s32.totalorder %s2533_s16, %s1937_s29  ;;  %p1942_p7 = scmp.lt.u32.totalorder %s2533_s16, %s2651_s18 }
 0x507   : > { %p1943_p13 = scmp.lt.u32.totalorder %s1941_s14, %s1937_s29  ;;  %p1945_p3 = scmp.lt.u32.totalorder %s1937_s29, %s2533_s16 }
 0x508   : > { %p1939_p0 = pnand %p1938_p4, %p2650_p9 }
 0x509   : > { %p1944_p10 = por %p1943_p13, %p1942_p7 }
 0x50a   : > { %p1940_p11 = pneg %p1939_p0 }
 0x50b   : > { %p1946_p6 = por %p1945_p3, %p1944_p10 }
 0x50d   : > { %p1947_p1 = pnand %p1946_p6, %p1940_p11 }
 0x50f   : > { %1950 = shalt.err (!%p1947_p1)
}
 0x510   : > { %1531 = dma.vmem_to_hbm [thread:$0]  (%p2650_p9), %s2535_s5, 128, %s2533_s16, %s1179_s26  }
 0x511 PF: > { %s2652_s23 = sld [smem:[#allocation27_spill]]  ;;  %s2653_s19 = sld [smem:[#allocation29_spill]] }
 0x512   : > { %p2655_p12 = scmp.ge.s32.totalorder %s2013_s12, 2 }
 0x517   : > { %s1219_s17 = sand.u32 1, %s2652_s23   ;;  %p2654_p8 = scmp.ne.s32.totalorder %s2653_s19, 0 }
 0x518   : > { %s1220_s11 = scalar_lea.sflag [#allocation4], %s1219_s17 }
 0x519   : > { %p1561_p5 = pnand %p2655_p12, %p2654_p8 }
 0x51b   : > { %1992 = dma.done.wait (!%p1561_p5), %s1220_s11, 128  }
 0x51c   : > { %1994 = vsyncadd (!%p1561_p5), %s1220_s11, 4294967168  ;;  %s1229_s24 = scalar_lea.sflag [#allocation18], %s1219_s17 }
 0x51d   : > { %1996 = dma.done.wait (!%p1561_p5), %s1229_s24, 128  }
 0x51e   : > { %1998 = vsyncadd (!%p1561_p5), %s1229_s24, 4294967168  ;;  %s2656_s12 = sld [smem:[#allocation30_spill]]  ;;  %s2657_s27 = sld [smem:[#allocation28_spill]] }
 0x51f   : > { %s2658_s11 = sld [smem:[#allocation31_spill]]  ;;  %s2659_s30 = smov %s2005_s10 }
 0x524   : > { %p34_p9 = scmp.ge.s32.totalorder %s2656_s12, 4   ;;  %s2660_s10 = smov %s2657_s27 }
 0x526   :  { %36 = sbr.rel (!%p34_p9) target bundleno = 18 (0x12), region = 167 }
 0x52d   :  { %1234 = vsyncpa [#allocation3], 1 }
 0x52e   :  { %1236 = vsyncpa [#allocation3 + $0x1], 1 }
 0x52f   :  { %1237 = vsyncpa [#allocation6], 1 }
 0x530   :  { %1239 = vsyncpa [#allocation6 + $0x1], 1 }
 0x531   :  { %1240 = vsyncpa [#allocation9], 1 }
 0x532   :  { %1242 = vsyncpa [#allocation9 + $0x1], 1 }
 0x533   :  { %1243 = vsyncpa [#allocation12], 1 }
 0x534   :  { %1244 = vsyncpa [#allocation15], 1 }
 0x535   :  { %1245 = vsyncpa [#allocation4], 1 }
 0x536   :  { %1247 = vsyncpa [#allocation4 + $0x1], 1 }
 0x537   :  { %1248 = vsyncpa [#allocation18], 1 }
 0x538   :  { %1250 = vsyncpa [#allocation18 + $0x1], 1 }

// kernel: nli_forward.9
= control target key start
LH: loop header
LB: loop body
LE: loop exit
PB: predicated region body
PF: predicated region fallthrough
CT: control target
= control target key end

     0   :  { %15 = vsyncpa [#allocation3], 0  ;;  %s1307_s0 = inlined_call_operand.hbm [shape: bf16[8,4,32], index: 0, kind: input, shape index: {}]   ;;  %s1308_s1 = inlined_call_operand.hbm [shape: bf16[8,4,32], index: 1, kind: input, shape index: {}]   ;;  %s1309_s2 = inlined_call_operand.hbm [shape: f32[1,4,1], index: 2, kind: input, shape index: {}]   ;;  %s1310_s3 = inlined_call_operand.hbm [shape: s32[1,4,1], index: 3, kind: input, shape index: {}]   ;;  %s1311_s4 = inlined_call_operand.hbm [shape: bf16[256,32], index: 4, kind: input, shape index: {}]   ;;  %s1312_s5 = inlined_call_operand.hbm [shape: f32[1,32], index: 5, kind: input, shape index: {}]   ;;  %s1313_s6 = inlined_call_operand.hbm [shape: bf16[32,3], index: 6, kind: input, shape index: {}]   ;;  %s1314_s7 = inlined_call_operand.hbm [shape: f32[1,3], index: 7, kind: input, shape index: {}]   ;;  %s1315_s8 = inlined_call_operand.hbm [shape: f32[2,3], index: 8, kind: output, shape index: {0}]   ;;  %s1316_s9 = inlined_call_operand.hbm [shape: f32[2,3], index: 9, kind: output, shape index: {1}]  }
   0x1   :  { %16 = vsyncpa [#allocation6], 0 }
   0x2   :  { %17 = vsyncpa [#allocation9], 0 }
   0x3   :  { %18 = vsyncpa [#allocation12], 0 }
   0x4   :  { %19 = vsyncpa [#allocation15], 0 }
   0x5   :  { %20 = vsyncpa [#allocation4], 0 }
   0x6   :  { %21 = vsyncpa [#allocation18], 0  ;;  %s976_s30 = smov [#allocation5]   ;;  %s977_s11 = smov [#allocation8]  }
   0x7   :  { %s39_s10 = sshll.u32 %s976_s30, 4  ;;  %s62_s12 = sshll.u32 %s977_s11, 4  ;;  %s40_s10 = int_to_ptr.vmem [resolvable:$true] %s39_s10  ;;  %s63_s12 = int_to_ptr.vmem [resolvable:$true] %s62_s12 }
   0x8   :  { %s742_s15 = scalar_lea.hbm %s1308_s1, 256 }
   0x9   :  { %p743_p0 = scmp.ne.s32.totalorder %s1308_s1, %s742_s15  ;;  %p746_p1 = scmp.lt.u32.totalorder %s742_s15, %s1308_s1 }
   0xb   :  { %p748_p2 = pnand %p746_p1, %p743_p0 }
   0xd   :  { %751 = shalt.err (!%p748_p2)
}
   0xe   :  { %s752_s20 = scalar_lea.vmem %s40_s10, 256  ;;  %p757_p4 = scmp.lt.s32.totalorder %s40_s10, %s40_s10 }
   0xf   :  { %p753_p3 = scmp.ne.s32.totalorder %s40_s10, %s752_s20  ;;  %p758_p5 = scmp.lt.s32.totalorder %s752_s20, %s752_s20 }
  0x11   :  { %p759_p6 = por %p758_p5, %p757_p4 }
  0x13   :  { %p760_p7 = pnand %p759_p6, %p753_p3 }
  0x15   :  { %763 = shalt.err (!%p760_p7)
}
  0x16   :  { %s978_s21 = smov 32   ;;  %s979_s22 = smov 2  }
  0x17   :  { %45 = dma.hbm_to_vmem [thread:$0]  %s1308_s1, 256, %s40_s10, [#allocation6], %s978_s21, %s978_s21, %s979_s22  }
  0x18   :  { %s764_s27 = scalar_lea.hbm %s1310_s3, 64 }
  0x19   :  { %p765_p8 = scmp.ne.s32.totalorder %s1310_s3, %s764_s27  ;;  %p768_p9 = scmp.lt.u32.totalorder %s764_s27, %s1310_s3 }
  0x1b   :  { %p770_p10 = pnand %p768_p9, %p765_p8 }
  0x1d   :  { %773 = shalt.err (!%p770_p10)
}
  0x1e   :  { %s774_s13 = scalar_lea.vmem %s63_s12, 64  ;;  %p779_p12 = scmp.lt.s32.totalorder %s63_s12, %s63_s12 }
  0x1f   :  { %p775_p11 = scmp.ne.s32.totalorder %s63_s12, %s774_s13  ;;  %p780_p13 = scmp.lt.s32.totalorder %s774_s13, %s774_s13 }
  0x21   :  { %p781_p0 = por %p780_p13, %p779_p12 }
  0x23   :  { %p782_p1 = pnand %p781_p0, %p775_p11 }
  0x25   :  { %785 = shalt.err (!%p782_p1)
}
  0x26   :  { %65 = dma.hbm_to_vmem [thread:$0]  %s1310_s3, 64, %s63_s12, [#allocation9]  }
  0x27   :  { %s980_s14 = smov [#allocation11]   ;;  %s981_s16 = smov [#allocation2]  }
  0x28   :  { %s84_s15 = sshll.u32 %s980_s14, 4  ;;  %s27_s17 = sshll.u32 %s981_s16, 4  ;;  %s85_s15 = int_to_ptr.vmem [resolvable:$true] %s84_s15  ;;  %s1071_s17 = int_to_ptr.vmem [resolvable:$true] %s27_s17 }
  0x29   :  { %s786_s20 = scalar_lea.hbm %s1312_s5, 16 }
  0x2a   :  { %p787_p2 = scmp.ne.s32.totalorder %s1312_s5, %s786_s20  ;;  %p790_p3 = scmp.lt.u32.totalorder %s786_s20, %s1312_s5 }
  0x2c   :  { %p792_p4 = pnand %p790_p3, %p787_p2 }
  0x2e   :  { %795 = shalt.err (!%p792_p4)
}
  0x2f   :  { %s796_s3 = scalar_lea.vmem %s85_s15, 16  ;;  %s800_s12 = scalar_lea.vmem %s85_s15, 32 }
  0x30   :  { %p797_p5 = scmp.ne.s32.totalorder %s85_s15, %s796_s3  ;;  %p801_p6 = scmp.lt.s32.totalorder %s85_s15, %s85_s15 }
  0x31   :  { %p802_p7 = scmp.lt.s32.totalorder %s800_s12, %s796_s3 }
  0x33   :  { %p803_p8 = por %p802_p7, %p801_p6 }
  0x35   :  { %p804_p9 = pnand %p803_p8, %p797_p5 }
  0x37   :  { %807 = shalt.err (!%p804_p9)
}
  0x38   :  { %87 = dma.hbm_to_vmem [thread:$0]  %s1312_s5, 16, %s85_s15, [#allocation12]  }
  0x39   :  { %s808_s11 = scalar_lea.hbm %s1307_s0, 256 }
  0x3a   :  { %p809_p10 = scmp.ne.s32.totalorder %s1307_s0, %s808_s11  ;;  %p812_p11 = scmp.lt.u32.totalorder %s808_s11, %s1307_s0 }
  0x3c   :  { %p814_p12 = pnand %p812_p11, %p809_p10 }
  0x3e   :  { %817 = shalt.err (!%p814_p12)
}
  0x3f   :  { %s818_s16 = scalar_lea.vmem %s1071_s17, 256  ;;  %p823_p0 = scmp.lt.s32.totalorder %s1071_s17, %s1071_s17 }
  0x40   :  { %p819_p13 = scmp.ne.s32.totalorder %s1071_s17, %s818_s16  ;;  %p824_p1 = scmp.lt.s32.totalorder %s818_s16, %s818_s16 }
  0x42   :  { %p825_p2 = por %p824_p1, %p823_p0 }
  0x44   :  { %p826_p3 = pnand %p825_p2, %p819_p13 }
  0x46   :  { %829 = shalt.err (!%p826_p3)
}
  0x47   :  { %33 = dma.hbm_to_vmem [thread:$0]  %s1307_s0, 256, %s1071_s17, [#allocation3], %s978_s21, %s978_s21, %s979_s22  }
  0x48   :  { %s982_s18 = smov [#allocation7]   ;;  %s983_s20 = smov [#allocation10]  }
  0x49   :  { %s52_s19 = sshll.u32 %s982_s18, 4  ;;  %s71_s23 = sshll.u32 %s983_s20, 4  ;;  %s53_s19 = int_to_ptr.vmem [resolvable:$true] %s52_s19  ;;  %s1105_s23 = int_to_ptr.vmem [resolvable:$true] %s71_s23 }
  0x4a   :  { %s830_s26 = scalar_lea.hbm %s1309_s2, 64 }
  0x4b   :  { %p831_p4 = scmp.ne.s32.totalorder %s1309_s2, %s830_s26  ;;  %p834_p5 = scmp.lt.u32.totalorder %s830_s26, %s1309_s2 }
  0x4d   :  { %p836_p6 = pnand %p834_p5, %p831_p4 }
  0x4f   :  { %839 = shalt.err (!%p836_p6)
}
  0x50   :  { %s840_s0 = scalar_lea.vmem %s53_s19, 64  ;;  %p845_p8 = scmp.lt.s32.totalorder %s53_s19, %s53_s19 }
  0x51   :  { %p841_p7 = scmp.ne.s32.totalorder %s53_s19, %s840_s0  ;;  %p846_p9 = scmp.lt.s32.totalorder %s840_s0, %s840_s0 }
  0x53   :  { %p847_p10 = por %p846_p9, %p845_p8 }
  0x55   :  { %p848_p11 = pnand %p847_p10, %p841_p7 }
  0x57   :  { %851 = shalt.err (!%p848_p11)
}
  0x58   :  { %55 = dma.hbm_to_vmem [thread:$0]  %s1309_s2, 64, %s53_s19, [#allocation6]  }
  0x59   :  { %s852_s11 = scalar_lea.hbm %s1311_s4, 2048 }
  0x5a   :  { %p853_p12 = scmp.ne.s32.totalorder %s1311_s4, %s852_s11  ;;  %p856_p13 = scmp.lt.u32.totalorder %s852_s11, %s1311_s4 }
  0x5c   :  { %p858_p0 = pnand %p856_p13, %p853_p12 }
  0x5e   :  { %861 = shalt.err (!%p858_p0)
}
  0x5f   :  { %s862_s16 = scalar_lea.vmem %s1105_s23, 2048  ;;  %p867_p2 = scmp.lt.s32.totalorder %s1105_s23, %s1105_s23 }
  0x60   :  { %p863_p1 = scmp.ne.s32.totalorder %s1105_s23, %s862_s16  ;;  %p868_p3 = scmp.lt.s32.totalorder %s862_s16, %s862_s16 }
  0x62   :  { %p869_p4 = por %p868_p3, %p867_p2 }
  0x64   :  { %p870_p5 = pnand %p869_p4, %p863_p1 }
  0x66   :  { %873 = shalt.err (!%p870_p5)
}
  0x67   :  { %s984_s2 = smov 64   ;;  %s985_s5 = smov 4  }
  0x68   :  { %77 = dma.hbm_to_vmem [thread:$0]  %s1311_s4, 2048, %s1105_s23, [#allocation9], %s984_s2, %s984_s2, %s985_s5  }
  0x69   :  { %s986_s19 = smov [#allocation13]   ;;  %s987_s24 = smov [#allocation14]  }
  0x6a   :  { %s93_s20 = sshll.u32 %s986_s19, 4  ;;  %s106_s25 = sshll.u32 %s987_s24, 4  ;;  %s94_s20 = int_to_ptr.vmem [resolvable:$true] %s93_s20  ;;  %s107_s25 = int_to_ptr.vmem [resolvable:$true] %s106_s25 }
  0x6b   :  { %s874_s12 = scalar_lea.hbm %s1313_s6, 256 }
  0x6c   :  { %p875_p6 = scmp.ne.s32.totalorder %s1313_s6, %s874_s12  ;;  %p878_p7 = scmp.lt.u32.totalorder %s874_s12, %s1313_s6 }
  0x6e   :  { %p880_p8 = pnand %p878_p7, %p875_p6 }
  0x70   :  { %883 = shalt.err (!%p880_p8)
}
  0x71   :  { %s884_s4 = scalar_lea.vmem %s94_s20, 256  ;;  %p889_p10 = scmp.lt.s32.totalorder %s94_s20, %s94_s20 }
  0x72   :  { %p885_p9 = scmp.ne.s32.totalorder %s94_s20, %s884_s4  ;;  %p890_p11 = scmp.lt.s32.totalorder %s884_s4, %s884_s4 }
  0x74   :  { %p891_p12 = por %p890_p11, %p889_p10 }
  0x76   :  { %p892_p13 = pnand %p891_p12, %p885_p9 }
  0x78   :  { %895 = shalt.err (!%p892_p13)
}
  0x79   :  { %99 = dma.hbm_to_vmem [thread:$0]  %s1313_s6, 256, %s94_s20, [#allocation12], %s984_s2, %s984_s2, %s985_s5  }
  0x7a   :  { %s896_s11 = scalar_lea.hbm %s1314_s7, 16 }
  0x7b   :  { %p897_p0 = scmp.ne.s32.totalorder %s1314_s7, %s896_s11  ;;  %p900_p1 = scmp.lt.u32.totalorder %s896_s11, %s1314_s7 }
  0x7d   :  { %p902_p2 = pnand %p900_p1, %p897_p0 }
  0x7f   :  { %905 = shalt.err (!%p902_p2)
}
  0x80   :  { %s906_s16 = scalar_lea.vmem %s107_s25, 16  ;;  %s910_s15 = scalar_lea.vmem %s107_s25, 32 }
  0x81   :  { %p907_p3 = scmp.ne.s32.totalorder %s107_s25, %s906_s16  ;;  %p911_p4 = scmp.lt.s32.totalorder %s107_s25, %s107_s25 }
  0x82   :  { %p912_p5 = scmp.lt.s32.totalorder %s910_s15, %s906_s16 }
  0x84   :  { %p913_p6 = por %p912_p5, %p911_p4 }
  0x86   :  { %p914_p7 = pnand %p913_p6, %p907_p3 }
  0x88   :  { %917 = shalt.err (!%p914_p7)
}
  0x89   :  { %109 = dma.hbm_to_vmem [thread:$0]  %s1314_s7, 16, %s107_s25, [#allocation15]  }
  0x8a   :  { %962 = dma.done.wait [#allocation3], 256  }
  0x8b   :  { %963 = vsyncadd [#allocation3], 4294967040 }
  0x8c   :  { %964 = dma.done.wait [#allocation6], 320  }
  0x8d   :  { %965 = vsyncadd [#allocation6], 4294966976 }
  0x8e   :  { %966 = dma.done.wait [#allocation9], 2112  }
  0x8f   :  { %967 = vsyncadd [#allocation9], 4294965184 }
  0x90   :  { %968 = dma.done.wait [#allocation12], 272  }
  0x91   :  { %969 = vsyncadd [#allocation12], 4294967024 }
  0x92   :  { %970 = dma.done.wait [#allocation15], 16  }
  0x93   :  { %971 = vsyncadd [#allocation15], 4294967280  ;;  %v988_v0 = vmov 0   ;;  %v168_v1 = vld [vmem:[#allocation8] sm:$0xf]  ;;  %v718_v11 = vld [vmem:[#allocation10 + $0x40] sm:$0xff]  }
  0x94   :  { %702 = vset.pattern.permute.xlu1 %v988_v0  ;;  %701 = vset.pattern.permute.xlu0 %v988_v0  ;;  %vm171_vm0 = vcmp.gt.s32.totalorder %v168_v1, 2  ;;  %vm169_vm1 = vcmp.gt.s32.totalorder %v168_v1, 0  ;;  %vm172_vm2 = vcmp.gt.s32.totalorder %v168_v1, 3  ;;  %vm170_vm3 = vcmp.gt.s32.totalorder %v168_v1, 1  ;;  %v167_v10 = vld [vmem:[#allocation7] sm:$0xf] }
  0x95   :  { %v217_v2 = vsel %vm171_vm0, 1, %v988_v0  ;;  %v215_v3 = vsel %vm169_vm1, 1, %v988_v0  ;;  %v218_v4 = vsel %vm172_vm2, 1, %v988_v0  ;;  %v216_v5 = vsel %vm170_vm3, 1, %v988_v0  ;;  %v719_v12 = vld [vmem:[#allocation10] sm:$0xff]   ;;  %v720_v13 = vld [vmem:[#allocation10 + $0x48] sm:$0xff]   ;;  %650 = vmatprep.subr.bf16.mxu0 %v718_v11 }
  0x96   :  { %230 = vperm.xlu1 %702, %v217_v2   ;;  %224 = vperm.xlu0 %701, %v215_v3   ;;  %vm174_vm4 = vcmp.gt.s32.totalorder %v168_v1, 5  ;;  %vm173_vm5 = vcmp.gt.s32.totalorder %v168_v1, 4  ;;  %vm176_vm6 = vcmp.gt.s32.totalorder %v168_v1, 7  ;;  %vm175_vm7 = vcmp.gt.s32.totalorder %v168_v1, 6  ;;  %v721_v14 = vld [vmem:[#allocation10 + $0x8] sm:$0xff]   ;;  %v722_v15 = vld [vmem:[#allocation10 + $0x50] sm:$0xff]  }
  0x97   :  { %v220_v6 = vsel %vm174_vm4, 1, %v988_v0  ;;  %v219_v7 = vsel %vm173_vm5, 1, %v988_v0  ;;  %v222_v8 = vsel %vm176_vm6, 1, %v988_v0  ;;  %v221_v9 = vsel %vm175_vm7, 1, %v988_v0  ;;  %651 = vmatpush3.bf16.msra.mxu0 %v719_v12  ;;  %v723_v16 = vld [vmem:[#allocation10 + $0x10] sm:$0xff]   ;;  %v724_v17 = vld [vmem:[#allocation10 + $0x58] sm:$0xff]  }
  0x98   :  { %652 = vmatprep.subr.bf16.mxu0 %v720_v13  ;;  %v725_v18 = vld [vmem:[#allocation10 + $0x18] sm:$0xff]   ;;  %v726_v19 = vld [vmem:[#allocation10 + $0x60] sm:$0xff]   ;;  %v728_v21 = vld [vmem:[#allocation10 + $0x68] sm:$0xff]   ;;  %vm177_vm8 = vcmask 257024   ;;  %s989_s7 = smov 96   ;;  %vm328_vm1 = vcmask 261120  }
  0x99   :  { %v727_v20 = vld [vmem:[#allocation10 + $0x20] sm:$0xff]   ;;  %v729_v22 = vld [vmem:[#allocation10 + $0x28] sm:$0xff]   ;;  %v1172_v35 = vld [vmem:[#allocation5 + $0x8] sm:$0x3]  ;;  %vm330_vm2 = vcmask 523264   ;;  %vm332_vm3 = vcmask 785408  }
  0x9a   :  { %233 = vperm.xlu1 %702, %v218_v4   ;;  %227 = vperm.xlu0 %701, %v216_v5   ;;  %v151_v23 = vld [vmem:[#allocation5] sm:$0x3]  ;;  %v1164_v24 = vld [vmem:[#allocation5 + $0x2] sm:$0x3]  ;;  %v153_v27 = vld [vmem:[#allocation5 + $0x4] sm:$0x3]  ;;  %v163_v38 = vunpack.c.l.bf16 %v1172_v35 }
  0x9b   :  { %653 = vmatpush3.bf16.msra.mxu0 %v721_v14  ;;  %v159_v25 = vunpack.c.l.bf16 %v151_v23  ;;  %v160_v26 = vunpack.c.l.bf16 %v1164_v24  ;;  %v154_v30 = vld [vmem:[#allocation5 + $0x6] sm:$0x3]  ;;  %v161_v31 = vunpack.c.l.bf16 %v153_v27  ;;  %v156_v39 = vld [vmem:[#allocation5 + $0xa] sm:$0x3]  ;;  %v1177_v43 = vld [vmem:[#allocation5 + $0xc] sm:$0x3] }
  0x9c   :  { %654 = vmatprep.subr.bf16.mxu0 %v722_v15  ;;  %v162_v34 = vunpack.c.l.bf16 %v154_v30  ;;  %v164_v41 = vunpack.c.l.bf16 %v156_v39  ;;  %v206_v42 = vsel %vm177_vm8, %v163_v38, 0.0  ;;  %v165_v46 = vunpack.c.l.bf16 %v1177_v43  ;;  %v1181_v47 = vld [vmem:[#allocation2 + $0x4] sm:$0x3]  ;;  %v1183_v48 = vld [vmem:[#allocation5 + $0xe] sm:$0x3] }
  0x9d   :  { %v199_v28 = vsel %vm177_vm8, %v159_v25, 0.0  ;;  %v200_v29 = vsel %vm177_vm8, %v160_v26, 0.0  ;;  %v202_v33 = vsel %vm177_vm8, %v161_v31, 0.0  ;;  %v1185_v49 = vld [vmem:[#allocation2] sm:$0x3]  ;;  %v145_v52 = vunpack.c.l.bf16 %v1181_v47 }
  0x9e   :  { %239 = vperm.xlu1 %702, %v220_v6   ;;  %236 = vperm.xlu0 %701, %v219_v7   ;;  %v201_v32 = vadd.f32 %v200_v29, %v199_v28  ;;  %v204_v37 = vsel %vm177_vm8, %v162_v34, 0.0  ;;  %v208_v45 = vsel %vm177_vm8, %v164_v41, 0.0  ;;  %v1188_v54 = vld [vmem:[#allocation2 + $0x6] sm:$0x3]  ;;  %v166_v55 = vunpack.c.l.bf16 %v1183_v48  ;;  %v1195_v58 = vld [vmem:[#allocation2 + $0x2] sm:$0x3] }
  0x9f   :  { %655 = vmatpush3.bf16.msra.mxu0 %v723_v16  ;;  %v210_v56 = vsel %vm177_vm8, %v165_v46, 0.0  ;;  %v143_v57 = vunpack.c.l.bf16 %v1185_v49  ;;  %v146_v59 = vunpack.c.l.bf16 %v1188_v54  ;;  %v1198_v60 = vld [vmem:[#allocation2 + $0xa] sm:$0x3]  ;;  %v1200_v61 = vld [vmem:[#allocation2 + $0x8] sm:$0x3]  ;;  %v144_v4 = vunpack.c.l.bf16 %v1195_v58 }
  0xa0   :  { %656 = vmatprep.subr.bf16.mxu0 %v724_v17  ;;  %v203_v36 = vadd.f32 %v202_v33, %v201_v32  ;;  %v1202_v62 = vld [vmem:[#allocation2 + $0xc] sm:$0x3]  ;;  %v1207_v5 = vld [vmem:[#allocation2 + $0xe] sm:$0x3]  ;;  %v212_v6 = vsel %vm177_vm8, %v166_v55, 0.0  ;;  %v147_v11 = vunpack.c.l.bf16 %v1200_v61  ;;  %vm991_vm4 = vmmov 0  }
  0xa1   :  { %v149_v12 = vunpack.c.l.bf16 %v1202_v62  ;;  %v150_v15 = vunpack.c.l.bf16 %v1207_v5  ;;  %vm582_vm5 = vcmask 17408  }
  0xa2   :  { %245 = vperm.xlu1 %702, %v222_v8   ;;  %242 = vperm.xlu0 %701, %v221_v9   ;;  %v205_v40 = vadd.f32 %v204_v37, %v203_v36  ;;  %v185_v49 = vsel %vm177_vm8, %v147_v11, 0.0 }
  0xa3   :  { %657 = vmatpush3.bf16.msra.mxu0 %v725_v18  ;;  %v189_v47 = vsel %vm177_vm8, %v149_v12, 0.0  ;;  %v191_v54 = vsel %vm177_vm8, %v150_v15, 0.0 }
  0xa4   :  { %658 = vmatprep.subr.bf16.mxu0 %v726_v19  ;;  %v207_v44 = vadd.f32 %v206_v42, %v205_v40  ;;  %v730_v40 = vld [vmem:[#allocation10 + $0x70] sm:$0xff]  }
  0xa5   :  { %v731_v42 = vld [vmem:[#allocation10 + $0x30] sm:$0xff]  }
  0xa6   :  { %195 = vperm.xlu0 %701, %v167_v10   ;;  %v209_v50 = vadd.f32 %v208_v45, %v207_v44  ;;  %v148_v10 = vunpack.c.l.bf16 %v1198_v60 }
  0xa7   :  { %659 = vmatpush3.bf16.msra.mxu0 %v727_v20 }
  0xa8   :  { %660 = vmatprep.subr.bf16.mxu0 %v728_v21  ;;  %v211_v63 = vadd.f32 %v210_v56, %v209_v50  ;;  %v187_v58 = vsel %vm177_vm8, %v148_v10, 0.0 }
  0xaa   :  { %v213_v16 = vadd.f32 %v212_v6, %v211_v63 }
  0xab   :  { %661 = vmatpush3.bf16.msra.mxu0 %v729_v22 }
  0xac   :  { %662 = vmatprep.subr.bf16.mxu0 %v730_v40 }
  0xaf   :  { %663 = vmatpush3.bf16.msra.mxu0 %v731_v42  ;;  %v734_v42 = vld [vmem:[#allocation13] sm:$0xff]  }
 0x115   :  { %v231_v51 = vpop.permute.xlu1 %230  ;;  %v225_v53 = vpop.permute.xlu0 %224 }
 0x116   :  { %vm249_vm9 = vcmp.eq.s32.totalorder %v231_v51, 1  ;;  %vm247_vm10 = vcmp.eq.s32.totalorder %v225_v53, 1  ;;  %v732_v51 = vld [vmem:[#allocation10 + $0x78] sm:$0xff]  }
 0x117   :  { %v257_v0 = vsel %vm249_vm9, %v145_v52, -inf  ;;  %v280_v1 = vsel %vm249_vm9, %v161_v31, -inf  ;;  %v255_v7 = vsel %vm247_vm10, %v143_v57, -inf  ;;  %v278_v8 = vsel %vm247_vm10, %v159_v25, -inf  ;;  %664 = vmatprep.subr.bf16.mxu0 %v732_v51 }
 0x118   :  { %v265_v13 = vsel %vm177_vm8, %v257_v0, -inf  ;;  %v288_v14 = vsel %vm177_vm8, %v280_v1, -inf  ;;  %v263_v17 = vsel %vm177_vm8, %v255_v7, -inf  ;;  %v286_v18 = vsel %vm177_vm8, %v278_v8, -inf  ;;  %v733_v1 = vld [vmem:[#allocation10 + $0x38] sm:$0xff]  }
 0x119   :  { %v234_v2 = vpop.permute.xlu1 %233  ;;  %v228_v3 = vpop.permute.xlu0 %227  ;;  %665 = vmatpush3.bf16.msra.mxu0 %v733_v1 }
 0x11a   :  { %vm250_vm11 = vcmp.eq.s32.totalorder %v234_v2, 1  ;;  %vm248_vm12 = vcmp.eq.s32.totalorder %v228_v3, 1 }
 0x11b   :  { %v256_v9 = vsel %vm248_vm12, %v144_v4, -inf  ;;  %v258_v19 = vsel %vm250_vm11, %v146_v59, -inf  ;;  %v281_v20 = vsel %vm250_vm11, %v162_v34, -inf  ;;  %v279_v25 = vsel %vm248_vm12, %v160_v26, -inf }
 0x11c   :  { %v264_v23 = vsel %vm177_vm8, %v256_v9, -inf  ;;  %v266_v26 = vsel %vm177_vm8, %v258_v19, -inf  ;;  %v289_v34 = vsel %vm177_vm8, %v281_v20, -inf  ;;  %v287_v35 = vsel %vm177_vm8, %v279_v25, -inf }
 0x11d   :  { %v240_v21 = vpop.permute.xlu1 %239  ;;  %v237_v22 = vpop.permute.xlu0 %236 }
 0x11e   :  { %vm252_vm13 = vcmp.eq.s32.totalorder %v240_v21, 1  ;;  %vm251_vm14 = vcmp.eq.s32.totalorder %v237_v22, 1 }
 0x11f   :  { %v260_v27 = vsel %vm252_vm13, %v148_v10, -inf  ;;  %v283_v28 = vsel %vm252_vm13, %v164_v41, -inf  ;;  %v259_v29 = vsel %vm251_vm14, %v147_v11, -inf  ;;  %v282_v30 = vsel %vm251_vm14, %v163_v38, -inf }
 0x120   :  { %v269_v31 = vsel %vm177_vm8, %v260_v27, -inf  ;;  %v292_v32 = vsel %vm177_vm8, %v283_v28, -inf  ;;  %v267_v33 = vsel %vm177_vm8, %v259_v29, -inf  ;;  %v290_v24 = vsel %vm177_vm8, %v282_v30, -inf }
 0x121   :  { %v270_v36 = vmax.f32 %v264_v23, %v269_v31  ;;  %v246_v37 = vpop.permute.xlu1 %245  ;;  %v243_v39 = vpop.permute.xlu0 %242  ;;  %v293_v41 = vmax.f32 %v287_v35, %v292_v32  ;;  %v268_v38 = vmax.f32 %v263_v17, %v267_v33  ;;  %v291_v44 = vmax.f32 %v286_v18, %v290_v24 }
 0x122   :  { %vm254_vm15 = vcmp.eq.s32.totalorder %v246_v37, 1  ;;  %vm253_vm0 = vcmp.eq.s32.totalorder %v243_v39, 1  ;;  %v181_v29 = vsel %vm177_vm8, %v145_v52, 0.0  ;;  %v183_v31 = vsel %vm177_vm8, %v146_v59, 0.0 }
 0x123   :  { %v262_v45 = vsel %vm254_vm15, %v150_v15, -inf  ;;  %v285_v48 = vsel %vm254_vm15, %v166_v55, -inf  ;;  %v261_v50 = vsel %vm253_vm0, %v149_v12, -inf  ;;  %v284_v0 = vsel %vm253_vm0, %v165_v46, -inf }
 0x124   :  { %v273_v53 = vsel %vm177_vm8, %v262_v45, -inf  ;;  %v296_v56 = vsel %vm177_vm8, %v285_v48, -inf  ;;  %v271_v63 = vsel %vm177_vm8, %v261_v50, -inf  ;;  %v294_v55 = vsel %vm177_vm8, %v284_v0, -inf  ;;  %v735_v45 = vld [vmem:[#allocation13 + $0x8] sm:$0xff]  }
 0x125   :  { %v274_v2 = vmax.f32 %v266_v26, %v273_v53  ;;  %v297_v3 = vmax.f32 %v289_v34, %v296_v56  ;;  %v272_v6 = vmax.f32 %v265_v13, %v271_v63  ;;  %v196_v7 = vpop.permute.xlu0 %195  ;;  %v295_v8 = vmax.f32 %v288_v14, %v294_v55  ;;  %v629_v50 = vld [vmem:[#allocation11] ss:$0 sm:$0xff] }
 0x126   :  { %v214_v9 = vmul.f32 %v213_v16, %v196_v7  ;;  %v275_v17 = vmax.f32 %v268_v38, %v270_v36  ;;  %v298_v19 = vmax.f32 %v291_v44, %v293_v41  ;;  %v178_v14 = vsel %vm177_vm8, %v143_v57, 0.0 }
 0x127   :  { %v276_v18 = vmax.f32 %v272_v6, %v274_v2  ;;  %v299_v20 = vmax.f32 %v295_v8, %v297_v3  ;;  %v179_v16 = vsel %vm177_vm8, %v144_v4, 0.0  ;;  %v990_v44 = vmov 0.0   ;;  %v646_v3 = vld [vmem:[#allocation14] ss:$0 sm:$0xff] }
 0x128   :  { %v316_v21 = vrot.slane %v214_v9, 2  ;;  %v180_v28 = vadd.f32 %v179_v16, %v178_v14  ;;  %675 = vmatprep.subr.bf16.mxu1 %v990_v44  ;;  %679 = vmatprep.mubr.msk.bf16.mxu1 %vm991_vm4, %v990_v44 }
 0x129   :  { %v277_v22 = vmax.f32 %v275_v17, %v276_v18  ;;  %v300_v46 = vmax.f32 %v298_v19, %v299_v20  ;;  %676 = vmatpush3.bf16.msra.mxu1 %v734_v42 }
 0x12a   :  { %v703_v43 = vpack.i.bf16 %v214_v9, %v316_v21  ;;  %v182_v30 = vadd.f32 %v181_v29, %v180_v28  ;;  %677 = vmatprep.subr.bf16.mxu1 %v990_v44 }
 0x12b   :  { %v320_v23 = vrot.slane %v277_v22, 2  ;;  %v324_v25 = vrot.slane %v300_v46, 2 }
 0x12c   :  { %704 = vrot.lane.b32.xlu1 %v703_v43, %s978_s21  ;;  %v184_v32 = vadd.f32 %v183_v31, %v182_v30  ;;  %s992_s21 = smov [#allocation16]  }
 0x12d   :  { %v708_v13 = vpack.i.bf16 %v277_v22, %v320_v23  ;;  %v713_v27 = vpack.i.bf16 %v300_v46, %v324_v25  ;;  %678 = vmatpush3.bf16.msra.mxu1 %v735_v45 }
 0x12e   :  { %v186_v57 = vadd.f32 %v185_v49, %v184_v32 }
 0x12f   :  { %709 = vrot.lane.b32.xlu0 %v708_v13, %s984_s2  ;;  %s602_s2 = sshll.u32 %s992_s21, 4  ;;  %s603_s2 = int_to_ptr.vmem [resolvable:$true] %s602_s2 }
 0x130   :  { %714 = vrot.lane.b32.xlu1 %v713_v27, %s989_s7  ;;  %v188_v4 = vadd.f32 %v187_v58, %v186_v57  ;;  %s918_s18 = scalar_lea.vmem %s603_s2, 32  ;;  %p923_p9 = scmp.lt.s32.totalorder %s603_s2, %s603_s2 }
 0x131   :  { %p919_p8 = scmp.ne.s32.totalorder %s603_s2, %s918_s18  ;;  %p924_p10 = scmp.lt.s32.totalorder %s918_s18, %s918_s18 }
 0x132   :  { %v190_v52 = vadd.f32 %v189_v47, %v188_v4 }
 0x133   :  { %p925_p11 = por %p924_p10, %p923_p9 }
 0x134   :  { %v192_v59 = vadd.f32 %v191_v54, %v190_v52 }
 0x135   :  { %p926_p12 = pnand %p925_p11, %p919_p8 }
 0x136   :  { %v198_v33 = vmul.f32 %v196_v7, %v192_v59 }
 0x138   :  { %v314_v26 = vrot.slane %v198_v33, 2 }
 0x19e   :  { %v705_v61 = vpop.permute.xlu1 %704 }
 0x19f   :  { %v707_v24 = vunpack.i.h.bf16 %v705_v61  ;;  %v706_v11 = vunpack.i.l.bf16 %v705_v61 }
 0x1a1   :  { %v710_v60 = vpop.permute.xlu0 %709  ;;  %v329_v62 = vsel %vm328_vm1, %v198_v33, %v707_v24  ;;  %v334_v5 = vsel %vm328_vm1, %v314_v26, %v706_v11 }
 0x1a2   :  { %v712_v10 = vunpack.i.h.bf16 %v710_v60  ;;  %v711_v34 = vunpack.i.l.bf16 %v710_v60  ;;  %v715_v35 = vpop.permute.xlu1 %714 }
 0x1a3   :  { %v717_v12 = vunpack.i.h.bf16 %v715_v35  ;;  %v716_v36 = vunpack.i.l.bf16 %v715_v35 }
 0x1a4   :  { %v335_v15 = vsel %vm330_vm2, %v334_v5, %v711_v34  ;;  %v331_v37 = vsel %vm330_vm2, %v329_v62, %v712_v10 }
 0x1a5   :  { %v336_v39 = vsel %vm332_vm3, %v335_v15, %v716_v36  ;;  %v333_v40 = vsel %vm332_vm3, %v331_v37, %v717_v12 }
 0x1a6   :  { %v338_v41 = vpack.c.bf16 %v336_v39, %v336_v39  ;;  %v337_v38 = vpack.c.bf16 %v333_v40, %v333_v40 }
 0x1a8   :  { %506 = vmatprep.mubr.bf16.mxu0 %v338_v41 }
 0x1a9   :  { %507 = vmatmul.mubr.bf16.vlgmr.msra.gmra.mrb[0].mxu0 %v337_v38 }
 0x27c   :  { %v666_v48 = vpop.f32.mrb[0].mxu0 }
 0x27d   :  { %v667_v51 = vpop.f32.mrb[1].mxu0 }
 0x27e   :  { %v668_v53 = vadd.f32 %v667_v51, %v666_v48  ;;  %v669_v56 = vpop.f32.mrb[2].mxu0 }
 0x27f   :  { %v670_v63 = vpop.f32.mrb[3].mxu0 }
 0x280   :  { %v509_v0 = vadd.f32 %v668_v53, %v629_v50 }
 0x282   :  { %736 = vtanh.f32 %v509_v0 }
 0x28c   :  { %v737_v1 = vpop.eup %736 }
 0x28d   :  { %v515_v2 = vpack.c.bf16 %v737_v1, %v737_v1 }
 0x28f   :  { %680 = vmatmul.mubr.msk.bf16.vlgmr.msra.gmra.mrb[0].mxu1 %vm328_vm1, %v515_v2 }
 0x362   :  { %v576_v6 = vpop.f32.mrb[0].mxu1 }
 0x363   :  { %v577_v55 = vadd.f32 %v646_v3, %v576_v6  ;;  %v681_v7 = vpop.f32.mrb[1].mxu1 }
 0x364   :  { %v579_v8 = vpop.f32.mrb[2].mxu1 }
 0x365   :  { %v682_v9 = vpop.f32.mrb[3].mxu1  ;;  %v584_v17 = vsel %vm582_vm5, %v577_v55, -inf  ;;  %583 = vst.msk [vmem:[#allocation16] sm:$0x3] %vm582_vm5, %v577_v55 }
 0x366   :  { %585 = vmax.xlane.f32.xlu0 %v584_v17 }
 0x3f3   :  { %v586_v18 = vpop.xlane.xlu0 %585 }
 0x3f4   :  { %v587_v19 = vsub.f32 %v577_v55, %v586_v18 }
 0x3f6   :  { %v588_v20 = vmul.f32 1.442695, %v587_v19 }
 0x3f8   :  { %738 = vpow2.f32 %v588_v20 }
 0x402   :  { %v739_v21 = vpop.eup %738 }
 0x403   :  { %v590_v22 = vsel %vm582_vm5, %v739_v21, 0.0 }
 0x404   :  { %591 = vadd.xlane.f32.xlu1 %v590_v22 }
 0x405   :  { %929 = shalt.err (!%p926_p12)
}
 0x406   :  { %s930_s24 = scalar_lea.hbm %s1315_s8, 32 }
 0x407   :  { %p931_p13 = scmp.ne.s32.totalorder %s1315_s8, %s930_s24  ;;  %p934_p0 = scmp.lt.u32.totalorder %s930_s24, %s1315_s8 }
 0x409   :  { %p936_p1 = pnand %p934_p0, %p931_p13 }
 0x40b   :  { %939 = shalt.err (!%p936_p1)
}
 0x40c   :  { %605 = dma.vmem_to_hbm [thread:$0]  %s603_s2, 32, %s1315_s8, [#allocation4]  }
 0x40d   :  { %s993_s0 = smov [#allocation17]  }
 0x40e   :  { %s612_s22 = sshll.u32 %s993_s0, 4  ;;  %s613_s22 = int_to_ptr.vmem [resolvable:$true] %s612_s22 }
 0x40f   :  { %s940_s4 = scalar_lea.vmem %s613_s22, 32  ;;  %p945_p3 = scmp.lt.s32.totalorder %s613_s22, %s613_s22 }
 0x410   :  { %p941_p2 = scmp.ne.s32.totalorder %s613_s22, %s940_s4  ;;  %p946_p4 = scmp.lt.s32.totalorder %s940_s4, %s940_s4 }
 0x412   :  { %p947_p5 = por %p946_p4, %p945_p3 }
 0x414   :  { %p948_p6 = pnand %p947_p5, %p941_p2 }
 0x491   :  { %v592_v43 = vpop.xlane.xlu1 %591 }
 0x492   :  { %740 = vrcp.f32 %v592_v43 }
 0x49c   :  { %v741_v46 = vpop.eup %740 }
 0x49d   :  { %v594_v23 = vmul.f32 %v741_v46, %v739_v21 }
 0x49f   :  { %595 = vst.msk [vmem:[#allocation17] sm:$0x3] %vm582_vm5, %v594_v23 }
 0x4a0   :  { %951 = shalt.err (!%p948_p6)
}
 0x4a1   :  { %s952_s8 = scalar_lea.hbm %s1316_s9, 32 }
 0x4a2   :  { %p953_p7 = scmp.ne.s32.totalorder %s1316_s9, %s952_s8  ;;  %p956_p8 = scmp.lt.u32.totalorder %s952_s8, %s1316_s9 }
 0x4a4   :  { %p958_p9 = pnand %p956_p8, %p953_p7 }
 0x4a6   :  { %961 = shalt.err (!%p958_p9)
}
 0x4a7   :  { %615 = dma.vmem_to_hbm [thread:$0]  %s613_s22, 32, %s1316_s9, [#allocation18]  }
 0x4a8   :  { %972 = dma.done.wait [#allocation4], 32  }
 0x4a9   :  { %973 = vsyncadd [#allocation4], 4294967264 }
 0x4aa   :  { %974 = dma.done.wait [#allocation18], 32  }
 0x4ab   :  { %975 = vsyncadd [#allocation18], 4294967264 }
 0x4ac   :  { %622 = vsyncpa [#allocation3], 1 }
 0x4ad   :  { %623 = vsyncpa [#allocation6], 1 }
 0x4ae   :  { %624 = vsyncpa [#allocation9], 1 }
 0x4af   :  { %625 = vsyncpa [#allocation12], 1 }
 0x4b0   :  { %626 = vsyncpa [#allocation15], 1 }
 0x4b1   :  { %627 = vsyncpa [#allocation4], 1 }
 0x4b2   :  { %628 = vsyncpa [#allocation18], 1 }

</bundles_post_ra>
